<compile_context>
chip_gen: v5e
topology: v5e:2x2
jax: 0.10.0
libtpu: 0.0.40
codegen_flags: <defaults>
</compile_context>

<pallas_src>
import functools

import jax
import jax.numpy as jnp
from jax import lax
from jax.experimental import pallas as pl
from jax.experimental.pallas import tpu as pltpu


def _double_conv_kernel(x_ref, w1_ref, b1_ref, w2_ref, b2_ref, o_ref,
                        xpad_ref, midpad_ref, *, row_chunk, unroll):
    # x_ref   : (1, H, W, Cin)            unpadded input tile (one batch element), compute dtype
    # w1_ref  : (9*Cin, Cmid_p)           conv1 weights, BN1 scale folded, channel-padded
    # b1_ref  : (1, Cmid_p)               folded BN1 bias (f32)
    # w2_ref  : (9*Cmid_p, Cout_p)        conv2 weights, BN2 scale folded, channel-padded
    # b2_ref  : (1, Cout_p)               folded BN2 bias (f32)
    # o_ref   : (1, H, W, Cout_p)         f32 output tile (lane-dense channel dim)
    # xpad_ref  : VMEM (H+2, W+2, Cin)    zero-halo staging of the input tile
    # midpad_ref: VMEM (H+2, W+2, Cmid_p) zero-halo mid activation (halo == conv2's padding)
    H, W, Cin = x_ref.shape[1], x_ref.shape[2], x_ref.shape[3]
    Cmid = w1_ref.shape[1]       # already padded to a multiple of 128
    Cout = w2_ref.shape[1]       # already padded to a multiple of 128
    cdt = xpad_ref.dtype
    RH = row_chunk
    n_chunks = H // RH

    # ---- stage input into the zero-halo padded scratch (zero only the 1-pixel halo) ----
    xpad_ref[0:1, :, :] = jnp.zeros((1, W + 2, Cin), cdt)
    xpad_ref[H + 1:H + 2, :, :] = jnp.zeros((1, W + 2, Cin), cdt)
    xpad_ref[:, 0:1, :] = jnp.zeros((H + 2, 1, Cin), cdt)
    xpad_ref[:, W + 1:W + 2, :] = jnp.zeros((H + 2, 1, Cin), cdt)
    xpad_ref[1:H + 1, 1:W + 1, :] = x_ref[0].astype(cdt)

    # halo of the mid activation = conv2's zero padding; interior is overwritten below.
    midpad_ref[0:1, :, :] = jnp.zeros((1, W + 2, Cmid), cdt)
    midpad_ref[H + 1:H + 2, :, :] = jnp.zeros((1, W + 2, Cmid), cdt)
    midpad_ref[:, 0:1, :] = jnp.zeros((H + 2, 1, Cmid), cdt)
    midpad_ref[:, W + 1:W + 2, :] = jnp.zeros((H + 2, 1, Cmid), cdt)

    def _r0(r):
        r0 = r * RH
        if isinstance(r0, int):
            return r0
        return pl.multiple_of(r0, RH)

    def im2col_dot(src_ref, w_ref, r0, c):
        # Patch matrix for output rows [r0, r0+RH): concat the 9 shifted 3x3 windows along the
        # channel axis -> (RH*W, 9*c), then one deep matmul on the MXU (f32 accumulation).
        taps = []
        for ky in range(3):
            for kx in range(3):
                taps.append(src_ref[pl.ds(r0 + ky, RH), kx:kx + W, :])
        patch = jnp.concatenate(taps, axis=-1).reshape(RH * W, 9 * c)
        return jnp.dot(patch, w_ref[...], preferred_element_type=jnp.float32)

    # ---- conv1 (3x3, pad=1, bias=False) + folded BN1 + ReLU -> midpad interior ----
    def conv1_step(r):
        r0 = _r0(r)
        acc = im2col_dot(xpad_ref, w1_ref, r0, Cin)
        a = jnp.maximum(acc + b1_ref[0], 0.0).astype(cdt)
        midpad_ref[pl.ds(r0 + 1, RH), 1:W + 1, :] = a.reshape(RH, W, Cmid)

    # ---- conv2 (3x3, pad=1, bias=False) + folded BN2 + ReLU -> output ----
    def conv2_step(r):
        r0 = _r0(r)
        acc = im2col_dot(midpad_ref, w2_ref, r0, Cmid)
        a = jnp.maximum(acc + b2_ref[0], 0.0)
        o_ref[0, pl.ds(r0, RH), :, :] = a.reshape(RH, W, Cout).astype(o_ref.dtype)

    def run_chunks(step_fn):
        if n_chunks == 1:
            step_fn(0)
        else:
            lax.fori_loop(0, n_chunks,
                          lambda r, carry: (step_fn(r), carry)[1],
                          0, unroll=unroll)

    # conv1 must fully populate midpad (incl. rows read as halo by other chunks) before conv2.
    run_chunks(conv1_step)
    run_chunks(conv2_step)


def _round_up(x, m):
    return (x + m - 1) // m * m


def _pick_row_chunk(H, W, max_rows=1024):
    """Largest divisor RH of H with RH*W <= max_rows (falls back to 1)."""
    best = 1
    for rh in range(1, H + 1):
        if H % rh == 0 and rh * W <= max_rows:
            best = rh
    return best


def double_conv_block(x_nchw, w1, gamma1, beta1, mean1, var1,
                      w2, gamma2, beta2, mean2, var2,
                      eps=1e-5, compute_dtype=jnp.bfloat16):
    """Pallas implementation of DoubleConvBlock.forward (eval-mode BN). Input/output are NCHW."""
    N, Cin, H, W = x_nchw.shape
    Cmid = w1.shape[0]
    Cout = w2.shape[0]
    Cmid_p = _round_up(Cmid, 128)
    Cout_p = _round_up(Cout, 128)

    # NCHW -> NHWC (channels on lanes); matmul inputs in compute_dtype (default bf16).
    x = jnp.transpose(x_nchw, (0, 2, 3, 1)).astype(compute_dtype)

    # Fold inference-mode BN into the conv weights (scale) and per-channel biases.
    inv1 = (gamma1 / jnp.sqrt(var1 + eps)).astype(jnp.float32)
    inv2 = (gamma2 / jnp.sqrt(var2 + eps)).astype(jnp.float32)

    # torch weight (Cout, Cin, kh, kw) -> (9, Cin, Cout'), BN scale folded, channels zero-padded.
    w1_ = jnp.transpose(w1.astype(jnp.float32), (2, 3, 1, 0)).reshape(9, Cin, Cmid)
    w1_ = w1_ * inv1[None, None, :]
    w1p = jnp.zeros((9, Cin, Cmid_p), jnp.float32).at[:, :, :Cmid].set(w1_)
    w1p = w1p.reshape(9 * Cin, Cmid_p).astype(compute_dtype)

    w2_ = jnp.transpose(w2.astype(jnp.float32), (2, 3, 1, 0)).reshape(9, Cmid, Cout)
    w2_ = w2_ * inv2[None, None, :]
    w2p = jnp.zeros((9, Cmid_p, Cout_p), jnp.float32).at[:, :Cmid, :Cout].set(w2_)
    w2p = w2p.reshape(9 * Cmid_p, Cout_p).astype(compute_dtype)

    b1p = jnp.zeros((1, Cmid_p), jnp.float32).at[0, :Cmid].set(beta1 - mean1 * inv1)
    b2p = jnp.zeros((1, Cout_p), jnp.float32).at[0, :Cout].set(beta2 - mean2 * inv2)

    row_chunk = _pick_row_chunk(H, W)
    assert H % row_chunk == 0
    n_chunks = H // row_chunk
    unroll = n_chunks if n_chunks <= 4 else 2
    kernel = functools.partial(_double_conv_kernel, row_chunk=row_chunk, unroll=unroll)

    itemsize = jnp.dtype(compute_dtype).itemsize
    flops = int(2 * N * H * W * 9 * (Cin * Cmid_p + Cmid_p * Cout_p))
    bytes_accessed = int(N * H * W * Cin * itemsize
                         + (9 * Cin * Cmid_p + 9 * Cmid_p * Cout_p) * itemsize
                         + (Cmid_p + Cout_p) * 4
                         + N * H * W * Cout_p * 4)

    # Scoped-VMEM budget: scratch + double-buffered blocks, with headroom; clamp to v7x's 64 MiB.
    scratch_bytes = (H + 2) * (W + 2) * (Cin + Cmid_p) * itemsize
    block_bytes = 2 * (H * W * Cin * itemsize
                       + (9 * Cin * Cmid_p + 9 * Cmid_p * Cout_p) * itemsize
                       + (Cmid_p + Cout_p) * 4
                       + H * W * Cout_p * 4)
    vmem_limit = int(min(max(2 * (scratch_bytes + block_bytes), 32 * 1024 * 1024),
                         64 * 1024 * 1024))

    out_nhwc = pl.pallas_call(
        kernel,
        out_shape=jax.ShapeDtypeStruct((N, H, W, Cout_p), jnp.float32),
        grid_spec=pltpu.PrefetchScalarGridSpec(
            num_scalar_prefetch=0,
            grid=(N,),
            in_specs=[
                pl.BlockSpec((1, H, W, Cin), lambda n: (n, 0, 0, 0)),
                pl.BlockSpec((9 * Cin, Cmid_p), lambda n: (0, 0)),
                pl.BlockSpec((1, Cmid_p), lambda n: (0, 0)),
                pl.BlockSpec((9 * Cmid_p, Cout_p), lambda n: (0, 0)),
                pl.BlockSpec((1, Cout_p), lambda n: (0, 0)),
            ],
            out_specs=pl.BlockSpec((1, H, W, Cout_p), lambda n: (n, 0, 0, 0)),
            scratch_shapes=[
                pltpu.VMEM((H + 2, W + 2, Cin), compute_dtype),      # zero-halo input staging
                pltpu.VMEM((H + 2, W + 2, Cmid_p), compute_dtype),   # zero-halo mid activation
            ],
        ),
        compiler_params=pltpu.CompilerParams(
            dimension_semantics=("parallel",),
            vmem_limit_bytes=vmem_limit,
        ),
        cost_estimate=pl.CostEstimate(
            flops=flops, transcendentals=0, bytes_accessed=bytes_accessed),
    )(x, w1p, b1p, w2p, b2p)

    # strip channel padding, NHWC -> NCHW to match PyTorch output convention.
    return jnp.transpose(out_nhwc[..., :Cout], (0, 3, 1, 2)).astype(x_nchw.dtype)


def _reference_forward(x_nchw, w1, gamma1, beta1, mean1, var1,
                       w2, gamma2, beta2, mean2, var2, eps=1e-5):
    """Plain-JAX reference (NCHW convs) for correctness checking."""
    def bn(y, g, b, m, v):
        return g[None, :, None, None] * (y - m[None, :, None, None]) \
            / jnp.sqrt(v[None, :, None, None] + eps) + b[None, :, None, None]

    dn = ("NCHW", "OIHW", "NCHW")
    y = lax.conv_general_dilated(x_nchw, w1, (1, 1), "SAME", dimension_numbers=dn)
    y = jnp.maximum(bn(y, gamma1, beta1, mean1, var1), 0.0)
    y = lax.conv_general_dilated(y, w2, (1, 1), "SAME", dimension_numbers=dn)
    y = jnp.maximum(bn(y, gamma2, beta2, mean2, var2), 0.0)
    return y


if __name__ == "__main__":
    key = jax.random.PRNGKey(0)
    keys = jax.random.split(key, 11)

    N, Cin, Cmid, Cout, H, W = 2, 4, 8, 8, 16, 16

    x = jax.random.normal(keys[0], (N, Cin, H, W), jnp.float32)
    w1 = 0.1 * jax.random.normal(keys[1], (Cmid, Cin, 3, 3), jnp.float32)
    w2 = 0.1 * jax.random.normal(keys[2], (Cout, Cmid, 3, 3), jnp.float32)

    gamma1 = 1.0 + 0.1 * jax.random.normal(keys[3], (Cmid,), jnp.float32)
    beta1 = 0.1 * jax.random.normal(keys[4], (Cmid,), jnp.float32)
    mean1 = 0.1 * jax.random.normal(keys[5], (Cmid,), jnp.float32)
    var1 = jax.random.uniform(keys[6], (Cmid,), jnp.float32, 0.5, 1.5)

    gamma2 = 1.0 + 0.1 * jax.random.normal(keys[7], (Cout,), jnp.float32)
    beta2 = 0.1 * jax.random.normal(keys[8], (Cout,), jnp.float32)
    mean2 = 0.1 * jax.random.normal(keys[9], (Cout,), jnp.float32)
    var2 = jax.random.uniform(keys[10], (Cout,), jnp.float32, 0.5, 1.5)

    args = (x, w1, gamma1, beta1, mean1, var1, w2, gamma2, beta2, mean2, var2)

    ref = jax.block_until_ready(_reference_forward(*args))

    # f32 compute path: tight structural check.
    out_f32 = jax.block_until_ready(double_conv_block(*args, compute_dtype=jnp.float32))
    assert out_f32.shape == (N, Cout, H, W), out_f32.shape
    assert jnp.allclose(out_f32, ref, atol=1e-4, rtol=1e-4), \
        f"f32 max abs err = {float(jnp.max(jnp.abs(out_f32 - ref)))}"

    # bf16 MXU fast path (default): tolerance loosened only by bf16 input/weight rounding.
    out_bf16 = jax.block_until_ready(double_conv_block(*args))
    assert out_bf16.shape == (N, Cout, H, W), out_bf16.shape
    assert jnp.allclose(out_bf16, ref, atol=5e-2, rtol=5e-2), \
        f"bf16 max abs err = {float(jnp.max(jnp.abs(out_bf16 - ref)))}"

    print("KERNEL_OK")
</pallas_src>

<mosaic_0001>
module attributes {stable_mosaic.version = 11 : i64} {
  func.func @_double_conv_kernel(%arg0: i32, %arg1: memref<1x16x16x4xf32, #tpu.memory_space<vmem>>, %arg2: memref<36x128xf32, #tpu.memory_space<vmem>>, %arg3: memref<1x128xf32, #tpu.memory_space<vmem>>, %arg4: memref<1152x128xf32, #tpu.memory_space<vmem>>, %arg5: memref<1x128xf32, #tpu.memory_space<vmem>>, %arg6: memref<1x16x16x128xf32, #tpu.memory_space<vmem>>, %arg7: memref<18x18x4xf32, #tpu.memory_space<vmem>>, %arg8: memref<18x18x128xf32, #tpu.memory_space<vmem>>) attributes {dimension_semantics = [#tpu.dimension_semantics<parallel>], iteration_bounds = array<i64: 2>, scalar_prefetch = 0 : i64, scratch_operands = 2 : i64, tpu.core_type = #tpu.core_type<tc>, window_params = [{transform_indices = @transform_0, window_bounds = array<i64: 1, 16, 16, 4>}, {pipeline_mode = #tpu.pipeline_mode<synchronous>, transform_indices = @transform_1, window_bounds = array<i64: 36, 128>}, {pipeline_mode = #tpu.pipeline_mode<synchronous>, transform_indices = @transform_2, window_bounds = array<i64: 1, 128>}, {pipeline_mode = #tpu.pipeline_mode<synchronous>, transform_indices = @transform_3, window_bounds = array<i64: 1152, 128>}, {pipeline_mode = #tpu.pipeline_mode<synchronous>, transform_indices = @transform_4, window_bounds = array<i64: 1, 128>}, {transform_indices = @transform_5, window_bounds = array<i64: 1, 16, 16, 128>}]} {
    %cst = arith.constant 0.000000e+00 : f32
    %0 = vector.broadcast %cst : f32 to vector<1x18x4xf32>
    %c0 = arith.constant 0 : index
    %c0_0 = arith.constant 0 : index
    %c0_1 = arith.constant 0 : index
    %1 = vector.load %arg7[%c0, %c0_0, %c0_1] : memref<18x18x4xf32, #tpu.memory_space<vmem>>, vector<1x18x4xf32>
    tpu.vector_store %arg7[%c0, %c0_0, %c0_1], %0 {strides = array<i32>} : memref<18x18x4xf32, #tpu.memory_space<vmem>>, vector<1x18x4xf32>,
    %cst_2 = arith.constant 0.000000e+00 : f32
    %2 = vector.broadcast %cst_2 : f32 to vector<1x18x4xf32>
    %c17 = arith.constant 17 : index
    %c0_3 = arith.constant 0 : index
    %c0_4 = arith.constant 0 : index
    %3 = vector.load %arg7[%c17, %c0_3, %c0_4] : memref<18x18x4xf32, #tpu.memory_space<vmem>>, vector<1x18x4xf32>
    tpu.vector_store %arg7[%c17, %c0_3, %c0_4], %2 {strides = array<i32>} : memref<18x18x4xf32, #tpu.memory_space<vmem>>, vector<1x18x4xf32>,
    %cst_5 = arith.constant 0.000000e+00 : f32
    %4 = vector.broadcast %cst_5 : f32 to vector<18x1x4xf32>
    %c0_6 = arith.constant 0 : index
    %c0_7 = arith.constant 0 : index
    %c0_8 = arith.constant 0 : index
    %5 = vector.load %arg7[%c0_6, %c0_7, %c0_8] : memref<18x18x4xf32, #tpu.memory_space<vmem>>, vector<18x1x4xf32>
    tpu.vector_store %arg7[%c0_6, %c0_7, %c0_8], %4 {strides = array<i32>} : memref<18x18x4xf32, #tpu.memory_space<vmem>>, vector<18x1x4xf32>,
    %cst_9 = arith.constant 0.000000e+00 : f32
    %6 = vector.broadcast %cst_9 : f32 to vector<18x1x4xf32>
    %c0_10 = arith.constant 0 : index
    %c17_11 = arith.constant 17 : index
    %c0_12 = arith.constant 0 : index
    %7 = vector.load %arg7[%c0_10, %c17_11, %c0_12] : memref<18x18x4xf32, #tpu.memory_space<vmem>>, vector<18x1x4xf32>
    tpu.vector_store %arg7[%c0_10, %c17_11, %c0_12], %6 {strides = array<i32>} : memref<18x18x4xf32, #tpu.memory_space<vmem>>, vector<18x1x4xf32>,
    %c0_13 = arith.constant 0 : index
    %c0_14 = arith.constant 0 : index
    %c0_15 = arith.constant 0 : index
    %c0_16 = arith.constant 0 : index
    %8 = vector.load %arg1[%c0_13, %c0_14, %c0_15, %c0_16] : memref<1x16x16x4xf32, #tpu.memory_space<vmem>>, vector<1x16x16x4xf32>
    %9 = vector.shape_cast %8 : vector<1x16x16x4xf32> to vector<16x16x4xf32>
    %c1 = arith.constant 1 : index
    %c1_17 = arith.constant 1 : index
    %c0_18 = arith.constant 0 : index
    %10 = vector.load %arg7[%c1, %c1_17, %c0_18] : memref<18x18x4xf32, #tpu.memory_space<vmem>>, vector<16x16x4xf32>
    tpu.vector_store %arg7[%c1, %c1_17, %c0_18], %9 {strides = array<i32>} : memref<18x18x4xf32, #tpu.memory_space<vmem>>, vector<16x16x4xf32>,
    %cst_19 = arith.constant 0.000000e+00 : f32
    %11 = vector.broadcast %cst_19 : f32 to vector<1x18x128xf32>
    %c0_20 = arith.constant 0 : index
    %c0_21 = arith.constant 0 : index
    %c0_22 = arith.constant 0 : index
    %12 = vector.load %arg8[%c0_20, %c0_21, %c0_22] : memref<18x18x128xf32, #tpu.memory_space<vmem>>, vector<1x18x128xf32>
    tpu.vector_store %arg8[%c0_20, %c0_21, %c0_22], %11 {strides = array<i32>} : memref<18x18x128xf32, #tpu.memory_space<vmem>>, vector<1x18x128xf32>,
    %cst_23 = arith.constant 0.000000e+00 : f32
    %13 = vector.broadcast %cst_23 : f32 to vector<1x18x128xf32>
    %c17_24 = arith.constant 17 : index
    %c0_25 = arith.constant 0 : index
    %c0_26 = arith.constant 0 : index
    %14 = vector.load %arg8[%c17_24, %c0_25, %c0_26] : memref<18x18x128xf32, #tpu.memory_space<vmem>>, vector<1x18x128xf32>
    tpu.vector_store %arg8[%c17_24, %c0_25, %c0_26], %13 {strides = array<i32>} : memref<18x18x128xf32, #tpu.memory_space<vmem>>, vector<1x18x128xf32>,
    %cst_27 = arith.constant 0.000000e+00 : f32
    %15 = vector.broadcast %cst_27 : f32 to vector<18x1x128xf32>
    %c0_28 = arith.constant 0 : index
    %c0_29 = arith.constant 0 : index
    %c0_30 = arith.constant 0 : index
    %16 = vector.load %arg8[%c0_28, %c0_29, %c0_30] : memref<18x18x128xf32, #tpu.memory_space<vmem>>, vector<18x1x128xf32>
    tpu.vector_store %arg8[%c0_28, %c0_29, %c0_30], %15 {strides = array<i32>} : memref<18x18x128xf32, #tpu.memory_space<vmem>>, vector<18x1x128xf32>,
    %cst_31 = arith.constant 0.000000e+00 : f32
    %17 = vector.broadcast %cst_31 : f32 to vector<18x1x128xf32>
    %c0_32 = arith.constant 0 : index
    %c17_33 = arith.constant 17 : index
    %c0_34 = arith.constant 0 : index
    %18 = vector.load %arg8[%c0_32, %c17_33, %c0_34] : memref<18x18x128xf32, #tpu.memory_space<vmem>>, vector<18x1x128xf32>
    tpu.vector_store %arg8[%c0_32, %c17_33, %c0_34], %17 {strides = array<i32>} : memref<18x18x128xf32, #tpu.memory_space<vmem>>, vector<18x1x128xf32>,
    %c0_35 = arith.constant 0 : index
    %c0_36 = arith.constant 0 : index
    %c0_37 = arith.constant 0 : index
    %19 = vector.load %arg7[%c0_35, %c0_36, %c0_37] : memref<18x18x4xf32, #tpu.memory_space<vmem>>, vector<16x16x4xf32>
    %c0_38 = arith.constant 0 : index
    %c1_39 = arith.constant 1 : index
    %c0_40 = arith.constant 0 : index
    %20 = vector.load %arg7[%c0_38, %c1_39, %c0_40] : memref<18x18x4xf32, #tpu.memory_space<vmem>>, vector<16x16x4xf32>
    %c0_41 = arith.constant 0 : index
    %c2 = arith.constant 2 : index
    %c0_42 = arith.constant 0 : index
    %21 = vector.load %arg7[%c0_41, %c2, %c0_42] : memref<18x18x4xf32, #tpu.memory_space<vmem>>, vector<16x16x4xf32>
    %c1_43 = arith.constant 1 : index
    %c0_44 = arith.constant 0 : index
    %c0_45 = arith.constant 0 : index
    %22 = vector.load %arg7[%c1_43, %c0_44, %c0_45] : memref<18x18x4xf32, #tpu.memory_space<vmem>>, vector<16x16x4xf32>
    %c1_46 = arith.constant 1 : index
    %c1_47 = arith.constant 1 : index
    %c0_48 = arith.constant 0 : index
    %23 = vector.load %arg7[%c1_46, %c1_47, %c0_48] : memref<18x18x4xf32, #tpu.memory_space<vmem>>, vector<16x16x4xf32>
    %c1_49 = arith.constant 1 : index
    %c2_50 = arith.constant 2 : index
    %c0_51 = arith.constant 0 : index
    %24 = vector.load %arg7[%c1_49, %c2_50, %c0_51] : memref<18x18x4xf32, #tpu.memory_space<vmem>>, vector<16x16x4xf32>
    %c2_52 = arith.constant 2 : index
    %c0_53 = arith.constant 0 : index
    %c0_54 = arith.constant 0 : index
    %25 = vector.load %arg7[%c2_52, %c0_53, %c0_54] : memref<18x18x4xf32, #tpu.memory_space<vmem>>, vector<16x16x4xf32>
    %c2_55 = arith.constant 2 : index
    %c1_56 = arith.constant 1 : index
    %c0_57 = arith.constant 0 : index
    %26 = vector.load %arg7[%c2_55, %c1_56, %c0_57] : memref<18x18x4xf32, #tpu.memory_space<vmem>>, vector<16x16x4xf32>
    %c2_58 = arith.constant 2 : index
    %c2_59 = arith.constant 2 : index
    %c0_60 = arith.constant 0 : index
    %27 = vector.load %arg7[%c2_58, %c2_59, %c0_60] : memref<18x18x4xf32, #tpu.memory_space<vmem>>, vector<16x16x4xf32>
    %28 = tpu.concatenate %19, %20, %21, %22, %23, %24, %25, %26, %27 in 2 : vector<16x16x4xf32>, vector<16x16x4xf32>, vector<16x16x4xf32>, vector<16x16x4xf32>, vector<16x16x4xf32>, vector<16x16x4xf32>, vector<16x16x4xf32>, vector<16x16x4xf32>, vector<16x16x4xf32> -> vector<16x16x36xf32>
    %29 = vector.shape_cast %28 : vector<16x16x36xf32> to vector<256x36xf32>
    %c0_61 = arith.constant 0 : index
    %c0_62 = arith.constant 0 : index
    %30 = vector.load %arg2[%c0_61, %c0_62] : memref<36x128xf32, #tpu.memory_space<vmem>>, vector<36x128xf32>
    %cst_63 = arith.constant dense<0.000000e+00> : vector<256x128xf32>
    %31 = tpu.matmul %29, %30, %cst_63 {dimension_numbers = #tpu.dot_dimension_numbers<[1], [0], [0], [1], [0, 0, 1, 1], [], []>} : vector<256x36xf32>, vector<36x128xf32>, vector<256x128xf32> -> vector<256x128xf32>
    %c0_64 = arith.constant 0 : index
    %c0_65 = arith.constant 0 : index
    %32 = vector.load %arg3[%c0_64, %c0_65] : memref<1x128xf32, #tpu.memory_space<vmem>>, vector<1x128xf32>
    %33 = vector.shape_cast %32 : vector<1x128xf32> to vector<128xf32>
    %34 = vector.shape_cast %33 : vector<128xf32> to vector<1x128xf32>
    %35 = vector.broadcast %34 : vector<1x128xf32> to vector<256x128xf32>
    %36 = arith.addf %31, %35 : vector<256x128xf32>
    %cst_66 = arith.constant 0.000000e+00 : f32
    %37 = vector.broadcast %cst_66 : f32 to vector<256x128xf32>
    %38 = arith.maximumf %36, %37 : vector<256x128xf32>
    %39 = vector.shape_cast %38 : vector<256x128xf32> to vector<16x16x128xf32>
    %c1_67 = arith.constant 1 : index
    %c1_68 = arith.constant 1 : index
    %c0_69 = arith.constant 0 : index
    %40 = vector.load %arg8[%c1_67, %c1_68, %c0_69] : memref<18x18x128xf32, #tpu.memory_space<vmem>>, vector<16x16x128xf32>
    tpu.vector_store %arg8[%c1_67, %c1_68, %c0_69], %39 {strides = array<i32>} : memref<18x18x128xf32, #tpu.memory_space<vmem>>, vector<16x16x128xf32>,
    %c0_70 = arith.constant 0 : index
    %c0_71 = arith.constant 0 : index
    %c0_72 = arith.constant 0 : index
    %41 = vector.load %arg8[%c0_70, %c0_71, %c0_72] : memref<18x18x128xf32, #tpu.memory_space<vmem>>, vector<16x16x128xf32>
    %c0_73 = arith.constant 0 : index
    %c1_74 = arith.constant 1 : index
    %c0_75 = arith.constant 0 : index
    %42 = vector.load %arg8[%c0_73, %c1_74, %c0_75] : memref<18x18x128xf32, #tpu.memory_space<vmem>>, vector<16x16x128xf32>
    %c0_76 = arith.constant 0 : index
    %c2_77 = arith.constant 2 : index
    %c0_78 = arith.constant 0 : index
    %43 = vector.load %arg8[%c0_76, %c2_77, %c0_78] : memref<18x18x128xf32, #tpu.memory_space<vmem>>, vector<16x16x128xf32>
    %c1_79 = arith.constant 1 : index
    %c0_80 = arith.constant 0 : index
    %c0_81 = arith.constant 0 : index
    %44 = vector.load %arg8[%c1_79, %c0_80, %c0_81] : memref<18x18x128xf32, #tpu.memory_space<vmem>>, vector<16x16x128xf32>
    %c1_82 = arith.constant 1 : index
    %c1_83 = arith.constant 1 : index
    %c0_84 = arith.constant 0 : index
    %45 = vector.load %arg8[%c1_82, %c1_83, %c0_84] : memref<18x18x128xf32, #tpu.memory_space<vmem>>, vector<16x16x128xf32>
    %c1_85 = arith.constant 1 : index
    %c2_86 = arith.constant 2 : index
    %c0_87 = arith.constant 0 : index
    %46 = vector.load %arg8[%c1_85, %c2_86, %c0_87] : memref<18x18x128xf32, #tpu.memory_space<vmem>>, vector<16x16x128xf32>
    %c2_88 = arith.constant 2 : index
    %c0_89 = arith.constant 0 : index
    %c0_90 = arith.constant 0 : index
    %47 = vector.load %arg8[%c2_88, %c0_89, %c0_90] : memref<18x18x128xf32, #tpu.memory_space<vmem>>, vector<16x16x128xf32>
    %c2_91 = arith.constant 2 : index
    %c1_92 = arith.constant 1 : index
    %c0_93 = arith.constant 0 : index
    %48 = vector.load %arg8[%c2_91, %c1_92, %c0_93] : memref<18x18x128xf32, #tpu.memory_space<vmem>>, vector<16x16x128xf32>
    %c2_94 = arith.constant 2 : index
    %c2_95 = arith.constant 2 : index
    %c0_96 = arith.constant 0 : index
    %49 = vector.load %arg8[%c2_94, %c2_95, %c0_96] : memref<18x18x128xf32, #tpu.memory_space<vmem>>, vector<16x16x128xf32>
    %50 = tpu.concatenate %41, %42, %43, %44, %45, %46, %47, %48, %49 in 2 : vector<16x16x128xf32>, vector<16x16x128xf32>, vector<16x16x128xf32>, vector<16x16x128xf32>, vector<16x16x128xf32>, vector<16x16x128xf32>, vector<16x16x128xf32>, vector<16x16x128xf32>, vector<16x16x128xf32> -> vector<16x16x1152xf32>
    %51 = vector.shape_cast %50 : vector<16x16x1152xf32> to vector<256x1152xf32>
    %c0_97 = arith.constant 0 : index
    %c0_98 = arith.constant 0 : index
    %52 = vector.load %arg4[%c0_97, %c0_98] : memref<1152x128xf32, #tpu.memory_space<vmem>>, vector<1152x128xf32>
    %cst_99 = arith.constant dense<0.000000e+00> : vector<256x128xf32>
    %53 = tpu.matmul %51, %52, %cst_99 {dimension_numbers = #tpu.dot_dimension_numbers<[1], [0], [0], [1], [0, 0, 1, 1], [], []>} : vector<256x1152xf32>, vector<1152x128xf32>, vector<256x128xf32> -> vector<256x128xf32>
    %c0_100 = arith.constant 0 : index
    %c0_101 = arith.constant 0 : index
    %54 = vector.load %arg5[%c0_100, %c0_101] : memref<1x128xf32, #tpu.memory_space<vmem>>, vector<1x128xf32>
    %55 = vector.shape_cast %54 : vector<1x128xf32> to vector<128xf32>
    %56 = vector.shape_cast %55 : vector<128xf32> to vector<1x128xf32>
    %57 = vector.broadcast %56 : vector<1x128xf32> to vector<256x128xf32>
    %58 = arith.addf %53, %57 : vector<256x128xf32>
    %cst_102 = arith.constant 0.000000e+00 : f32
    %59 = vector.broadcast %cst_102 : f32 to vector<256x128xf32>
    %60 = arith.maximumf %58, %59 : vector<256x128xf32>
    %61 = vector.shape_cast %60 : vector<256x128xf32> to vector<16x16x128xf32>
    %c0_103 = arith.constant 0 : index
    %c0_104 = arith.constant 0 : index
    %c0_105 = arith.constant 0 : index
    %c0_106 = arith.constant 0 : index
    %62 = vector.load %arg6[%c0_103, %c0_104, %c0_105, %c0_106] : memref<1x16x16x128xf32, #tpu.memory_space<vmem>>, vector<1x16x16x128xf32>
    %63 = vector.shape_cast %62 : vector<1x16x16x128xf32> to vector<16x16x128xf32>
    %64 = vector.shape_cast %61 : vector<16x16x128xf32> to vector<1x16x16x128xf32>
    tpu.vector_store %arg6[%c0_103, %c0_104, %c0_105, %c0_106], %64 {strides = array<i32>} : memref<1x16x16x128xf32, #tpu.memory_space<vmem>>, vector<1x16x16x128xf32>,
    return
  }
  func.func @transform_0(%arg0: i32) -> (i32, i32, i32, i32) {
    %c0_i32 = arith.constant 0 : i32
    %c0_i32_0 = arith.constant 0 : i32
    %c0_i32_1 = arith.constant 0 : i32
    %c0_i32_2 = arith.constant 0 : i32
    return %arg0, %c0_i32, %c0_i32_0, %c0_i32_1 : i32, i32, i32, i32
  }
  func.func @transform_1(%arg0: i32) -> (i32, i32) {
    %c0_i32 = arith.constant 0 : i32
    %c0_i32_0 = arith.constant 0 : i32
    %c0_i32_1 = arith.constant 0 : i32
    return %c0_i32, %c0_i32_0 : i32, i32
  }
  func.func @transform_2(%arg0: i32) -> (i32, i32) {
    %c0_i32 = arith.constant 0 : i32
    %c0_i32_0 = arith.constant 0 : i32
    %c0_i32_1 = arith.constant 0 : i32
    return %c0_i32, %c0_i32_0 : i32, i32
  }
  func.func @transform_3(%arg0: i32) -> (i32, i32) {
    %c0_i32 = arith.constant 0 : i32
    %c0_i32_0 = arith.constant 0 : i32
    %c0_i32_1 = arith.constant 0 : i32
    return %c0_i32, %c0_i32_0 : i32, i32
  }
  func.func @transform_4(%arg0: i32) -> (i32, i32) {
    %c0_i32 = arith.constant 0 : i32
    %c0_i32_0 = arith.constant 0 : i32
    %c0_i32_1 = arith.constant 0 : i32
    return %c0_i32, %c0_i32_0 : i32, i32
  }
  func.func @transform_5(%arg0: i32) -> (i32, i32, i32, i32) {
    %c0_i32 = arith.constant 0 : i32
    %c0_i32_0 = arith.constant 0 : i32
    %c0_i32_1 = arith.constant 0 : i32
    %c0_i32_2 = arith.constant 0 : i32
    return %arg0, %c0_i32, %c0_i32_0, %c0_i32_1 : i32, i32, i32, i32
  }
}

</mosaic_0001>

<bundles_post_ra>
// kernel: tpu_custom_call.1
= control target key start
LH: loop header
LB: loop body
LE: loop exit
PB: predicated region body
PF: predicated region fallthrough
CT: control target
= control target key end

     0   :  { %10 = vsyncpa [#allocation5], 0  ;;  %s6522_s0 = inlined_call_operand.vmem [shape: f32[2,16,16,4], index: 0, kind: input, shape index: {}]   ;;  %s6523_s1 = inlined_call_operand.vmem [shape: f32[36,128], index: 1, kind: input, shape index: {}]   ;;  %s6524_s2 = inlined_call_operand.vmem [shape: f32[1,128], index: 2, kind: input, shape index: {}]   ;;  %s6525_s3 = inlined_call_operand.hbm [shape: f32[1152,128], index: 3, kind: input, shape index: {}]   ;;  %s6526_s4 = inlined_call_operand.vmem [shape: f32[1,128], index: 4, kind: input, shape index: {}]   ;;  %s6527_s5 = inlined_call_operand.hbm [shape: f32[2,16,16,128], index: 5, kind: output, shape index: {}]  }
   0x1   :  { %11 = vsyncpa [#allocation6], 0 }
   0x2   :  { %13 = vsyncpa [#allocation6 + $0x1], 0  ;;  %s4160_s18 = smov 0   ;;  %s4162_s19 = smov 0  }
   0x3   :  { %s4164_s20 = smov 0   ;;  %s4166_s21 = smov 0  }
   0x4 LB: > { %s4181_s22 = sadd.s32 4294967295, %s4115_s21   ;;  %s3866_s23 = sadd.s32 4294967294, %s4115_s21   ;;  %s4115_s21 = sphi %s4166_s21, %s6787_s21   ;;  %s4111_s20 = sphi %s4164_s20, %s6786_s20   ;;  %s4107_s19 = sphi %s4162_s19, %s6785_s19   ;;  %s4103_s18 = sphi %s4160_s18, %s6784_s18  }
   0x5   : > { %s4185_s24 = sadd.s32 1, %s4115_s21   ;;  %s136_s25 = sadd.s32 1, %s4111_s20 }
   0x6   : > { %s133_s26 = ssub.s32 %s4115_s21, %s4185_s24  ;;  %p146_p0 = scmp.ne.s32.totalorder %s4111_s20, %s4107_s19 }
   0x7   : > { %p134_p1 = scmp.eq.s32.totalorder %s133_s26, 0  ;;  %p147_p2 = scmp.eq.s32.totalorder %s4181_s22, 1 }
   0x8   : > { %p152_p3 = scmp.ne.s32.totalorder %s4107_s19, %s4103_s18  ;;  %p153_p4 = scmp.eq.s32.totalorder %s3866_s23, 1 }
   0x9   : > { %s4196_s27 = scalar_select %p134_p1, %s4111_s20, %s136_s25  }
   0xa   : > { %p4198_p5 = por %p147_p2, %p146_p0  ;;  %p4202_p6 = por %p153_p4, %p152_p3 }
   0xb   : > { %p3867_p7 = scmp.ge.s32.totalorder %s4115_s21, 1  ;;  %p160_p8 = scmp.lt.s32.totalorder %s4115_s21, 3 }
   0xc   : > { %p3966_p9 = scmp.eq.s32.totalorder %s4181_s22, 0  ;;  %s177_s7 = sshll.u32 %s6525_s3, 4  ;;  %s178_s7 = int_to_ptr.hbm [resolvable:$true] %s177_s7 }
   0xd   : > { %p161_p10 = pnand %p3867_p7, %p160_p8  ;;  %s4117_s8 = smov [#allocation4]  }
   0xe   : > { %s179_s9 = sshll.u32 %s4117_s8, 4  ;;  %s4118_s10 = smov 128   ;;  %s180_s9 = int_to_ptr.vmem [resolvable:$true] %s179_s9 }
   0xf   : > { %p3958_p11 = pneg %p161_p10  ;;  %s4119_s11 = smov 8  }
  0x10   : > { %206 = sbr.rel (%p161_p10) target bundleno = 1648 (0x670), region = 40 }
  0x11   : > { %p3959_p12 = pnand %p3966_p9, %p3958_p11 }
  0x13   : > { %3961 = dma.hbm_to_vmem [thread:$0]  (!%p3959_p12), %s178_s7, 18432, %s180_s9, [#allocation5], %s4118_s10, %s4118_s10, %s4119_s11  }
  0x15   : > { %4094 = dma.done.wait (%p3966_p9), [#allocation5], 18432  }
  0x16   : > { %4096 = vsyncadd (%p3966_p9), [#allocation5], 4294948864  ;;  %vm240_vm0 = vcmask 31744   ;;  %v4120_v0 = vmov 0.0   ;;  %s4121_s12 = smov 4   ;;  %s4122_s13 = smov 8  }
  0x17   : > { %241 = vst.msk [vmem:[#allocation2] sm:$0xff] %vm240_vm0, %v4120_v0  ;;  %p235_p13 = scmp.lt.s32.totalorder %s4181_s22, 1  ;;  %vm249_vm1 = vcmask 24576   ;;  %s4123_s25 = smov 12   ;;  %vm243_vm2 = vcmask 25600   ;;  %vm2076_vm3 = vcmask 1043456  }
  0x18   : > { %242 = vst.msk [vmem:[#allocation2 + $0x8] sm:$0xff] %vm240_vm0, %v4120_v0  ;;  %s4124_s26 = smov 16   ;;  %s4125_s30 = smov 28   ;;  %v1974_v32 = vld [vmem:[%s6523_s1 + $0x20] sm:$0xf]  ;;  %v1973_v33 = vld [vmem:[%s6523_s1 + $0x18] sm:$0xff] }
  0x19   : > { %246 = vst.msk [vmem:[#allocation2 + $0x198] sm:$0xff] %vm240_vm0, %v4120_v0  ;;  %s236_s14 = scalar_select %p235_p13, %s4181_s22, 1  ;;  %3875 = vmatpush.msk.msra.mxu0 %vm2076_vm3, %v1974_v32  ;;  %v1972_v34 = vld [vmem:[%s6523_s1 + $0x10] sm:$0xff]  ;;  %3915 = vmatpush.msk.msra.mxu3 %vm2076_vm3, %v1974_v32  ;;  %v1971_v35 = vld [vmem:[%s6523_s1 + $0x8] sm:$0xff]  ;;  %v1970_v38 = vld [vmem:[%s6523_s1] sm:$0xff]  ;;  %vm1739_vm4 = vcmask 64512  }
  0x1a   : > { %247 = vst.msk [vmem:[#allocation2 + $0x1a0] sm:$0xff] %vm240_vm0, %v4120_v0  ;;  %s4126_s6 = smov 32   ;;  %s4127_s7 = smov 20   ;;  %vm1772_vm5 = vcmask 97280   ;;  %vm1805_vm6 = vcmask 130048   ;;  %vm1838_vm7 = vcmask 162816  }
  0x1b   : > { %351 = vst [vmem:[#allocation3] sm:$0xff] %v4120_v0  ;;  %s3913_s15 = sshll.u32 %s236_s14, 8  ;;  %s4128_s8 = smov 24   ;;  %2092 = vmatpush.msra.mxu0 %v1973_v33  ;;  %3916 = vmatpush.msra.mxu3 %v1973_v33  ;;  %vm1871_vm8 = vcmask 195584   ;;  %vm1904_vm9 = vcmask 228352   ;;  %vm1937_vm10 = vcmask 261120  }
  0x1c   : > { %352 = vst [vmem:[#allocation3 + $0x8] sm:$0xff] %v4120_v0  ;;  %s4267_s23 = scalar_lea.vmem %s6522_s0, %s3913_s15  ;;  %vm1979_vm11 = vcmask 293888  }
  0x1d   : > { %353 = vst [vmem:[#allocation3 + $0x10] sm:$0x3] %v4120_v0  ;;  %v286_v3 = vld [vmem:[%s4267_s23] sm:$0xff]  ;;  %v288_v6 = vld [vmem:[%s4267_s23 + $0x10] sm:$0xff]  ;;  %v289_v7 = vld [vmem:[%s4267_s23 + $0x18] sm:$0xff]  ;;  %2093 = vmatpush.msra.mxu0 %v1972_v34  ;;  %3917 = vmatpush.msra.mxu3 %v1972_v34 }
  0x1e   : > { %355 = vst [vmem:[#allocation3 + $0x198] sm:$0xff] %v4120_v0  ;;  %v287_v8 = vld [vmem:[%s4267_s23 + $0x8] sm:$0xff]  ;;  %v290_v10 = vld [vmem:[%s4267_s23 + $0x20] sm:$0xff]  ;;  %v292_v25 = vld [vmem:[%s4267_s23 + $0x30] sm:$0xff] }
  0x1f   : > { %v426_v1 = vld [vmem:[#allocation2 + $0x1] sm:$0xff]  ;;  %356 = vst [vmem:[#allocation3 + $0x1a0] sm:$0xff] %v4120_v0  ;;  %v293_v26 = vld [vmem:[%s4267_s23 + $0x38] sm:$0xff]  ;;  %2094 = vmatpush.msra.mxu0 %v1971_v35  ;;  %3918 = vmatpush.msra.mxu3 %v1971_v35 }
  0x20   : > { %715 = vrot.lane.b32.xlu0 %v426_v1, %s4121_s12  ;;  %357 = vst [vmem:[#allocation3 + $0x1a8] sm:$0x3] %v4120_v0  ;;  %v458_v2 = vld [vmem:[#allocation2 + $0x2] sm:$0xff] }
  0x21   : > { %359 = vst [vmem:[#allocation3 + $0x18] sm:$0x1] %v4120_v0  ;;  %v291_v21 = vld [vmem:[%s4267_s23 + $0x28] sm:$0xff]  ;;  %v294_v37 = vld [vmem:[%s4267_s23 + $0x40] sm:$0xff]  ;;  %2095 = vmatpush.msra.mxu0 %v1970_v38  ;;  %3919 = vmatpush.msra.mxu3 %v1970_v38 }
  0x22   : > { %360 = vst [vmem:[#allocation3 + $0x30] sm:$0x1] %v4120_v0  ;;  %v295_v42 = vld [vmem:[%s4267_s23 + $0x48] sm:$0xff] }
  0x23   : > { %361 = vst [vmem:[#allocation3 + $0x48] sm:$0x1] %v4120_v0  ;;  %v395_v63 = vld [vmem:[#allocation2 + $0x8] sm:$0xff] }
  0x24   : > { %362 = vst [vmem:[#allocation3 + $0x60] sm:$0x1] %v4120_v0 }
  0x25   : > { %363 = vst [vmem:[#allocation3 + $0x78] sm:$0x1] %v4120_v0 }
  0x26   : > { %364 = vst [vmem:[#allocation3 + $0x90] sm:$0x1] %v4120_v0 }
  0x27   : > { %365 = vst [vmem:[#allocation3 + $0xa8] sm:$0x1] %v4120_v0 }
  0x28   : > { %366 = vst [vmem:[#allocation3 + $0xc0] sm:$0x1] %v4120_v0  ;;  %843 = vrot.lane.b32.xlu0 %v458_v2, %s4122_s13 }
  0x29   : > { %367 = vst [vmem:[#allocation3 + $0xd8] sm:$0x1] %v4120_v0 }
  0x2a   : > { %368 = vst [vmem:[#allocation3 + $0xf0] sm:$0x1] %v4120_v0 }
  0x2b   : > { %369 = vst [vmem:[#allocation3 + $0x108] sm:$0x1] %v4120_v0 }
  0x2c   : > { %370 = vst [vmem:[#allocation3 + $0x120] sm:$0x1] %v4120_v0 }
  0x2d   : > { %371 = vst [vmem:[#allocation3 + $0x138] sm:$0x1] %v4120_v0 }
  0x2e   : > { %372 = vst [vmem:[#allocation3 + $0x150] sm:$0x1] %v4120_v0 }
  0x2f   : > { %373 = vst [vmem:[#allocation3 + $0x168] sm:$0x1] %v4120_v0 }
  0x30   : > { %374 = vst [vmem:[#allocation3 + $0x180] sm:$0x1] %v4120_v0 }
  0x31   : > { %377 = vst [vmem:[#allocation3 + $0x29] sm:$0x1] %v4120_v0 }
  0x32   : > { %378 = vst [vmem:[#allocation3 + $0x41] sm:$0x1] %v4120_v0 }
  0x33   : > { %379 = vst [vmem:[#allocation3 + $0x59] sm:$0x1] %v4120_v0 }
  0x34   : > { %380 = vst [vmem:[#allocation3 + $0x71] sm:$0x1] %v4120_v0 }
  0x35   : > { %381 = vst [vmem:[#allocation3 + $0x89] sm:$0x1] %v4120_v0 }
  0x36   : > { %382 = vst [vmem:[#allocation3 + $0xa1] sm:$0x1] %v4120_v0 }
  0x37   : > { %383 = vst [vmem:[#allocation3 + $0xb9] sm:$0x1] %v4120_v0 }
  0x38   : > { %384 = vst [vmem:[#allocation3 + $0xd1] sm:$0x1] %v4120_v0 }
  0x39   : > { %385 = vst [vmem:[#allocation3 + $0xe9] sm:$0x1] %v4120_v0 }
  0x3a   : > { %386 = vst [vmem:[#allocation3 + $0x101] sm:$0x1] %v4120_v0 }
  0x3b   : > { %387 = vst [vmem:[#allocation3 + $0x119] sm:$0x1] %v4120_v0 }
  0x3c   : > { %388 = vst [vmem:[#allocation3 + $0x131] sm:$0x1] %v4120_v0 }
  0x3d   : > { %389 = vst [vmem:[#allocation3 + $0x149] sm:$0x1] %v4120_v0 }
  0x3e   : > { %390 = vst [vmem:[#allocation3 + $0x161] sm:$0x1] %v4120_v0 }
  0x3f   : > { %391 = vst [vmem:[#allocation3 + $0x179] sm:$0x1] %v4120_v0 }
  0x40   : > { %392 = vst [vmem:[#allocation3 + $0x191] sm:$0x1] %v4120_v0 }
  0x41   : > { %251 = vst.msk [vmem:[#allocation2 + $0x18] sm:$0x1] %vm249_vm1, %v4120_v0 }
  0x42   : > { %319 = vst.msk [vmem:[#allocation2 + $0x19] sm:$0xff] %vm240_vm0, %v286_v3 }
  0x43   : > { %250 = vst.msk [vmem:[#allocation2] sm:$0x1] %vm249_vm1, %v4120_v0 }
  0x44   : > { %252 = vst.msk [vmem:[#allocation2 + $0x30] sm:$0x1] %vm249_vm1, %v4120_v0 }
  0x45   : > { %253 = vst.msk [vmem:[#allocation2 + $0x48] sm:$0x1] %vm249_vm1, %v4120_v0 }
  0x46   : > { %254 = vst.msk [vmem:[#allocation2 + $0x60] sm:$0x1] %vm249_vm1, %v4120_v0 }
  0x47   : > { %255 = vst.msk [vmem:[#allocation2 + $0x78] sm:$0x1] %vm249_vm1, %v4120_v0 }
  0x48   : > { %256 = vst.msk [vmem:[#allocation2 + $0x90] sm:$0x1] %vm249_vm1, %v4120_v0 }
  0x49   : > { %v4289_v4 = vld [vmem:[#allocation2 + $0x18] sm:$0xff]  ;;  %257 = vst.msk [vmem:[#allocation2 + $0xa8] sm:$0x1] %vm249_vm1, %v4120_v0 }
  0x4a   : > { %971 = vrot.lane.b32.xlu1 %v4289_v4, %s4123_s25  ;;  %258 = vst.msk [vmem:[#allocation2 + $0xc0] sm:$0x1] %vm249_vm1, %v4120_v0  ;;  %v4307_v5 = vld [vmem:[#allocation2 + $0x19] sm:$0xff] }
  0x4b   : > { %259 = vst.msk [vmem:[#allocation2 + $0xd8] sm:$0x1] %vm249_vm1, %v4120_v0  ;;  %v394_v44 = vld [vmem:[#allocation2] sm:$0xff] }
  0x4c   : > { %260 = vst.msk [vmem:[#allocation2 + $0xf0] sm:$0x1] %vm249_vm1, %v4120_v0 }
  0x4d   : > { %261 = vst.msk [vmem:[#allocation2 + $0x108] sm:$0x1] %vm249_vm1, %v4120_v0 }
  0x4e   : > { %262 = vst.msk [vmem:[#allocation2 + $0x120] sm:$0x1] %vm249_vm1, %v4120_v0 }
  0x4f   : > { %263 = vst.msk [vmem:[#allocation2 + $0x138] sm:$0x1] %vm249_vm1, %v4120_v0 }
  0x50   : > { %264 = vst.msk [vmem:[#allocation2 + $0x150] sm:$0x1] %vm249_vm1, %v4120_v0 }
  0x51   : > { %265 = vst.msk [vmem:[#allocation2 + $0x168] sm:$0x1] %vm249_vm1, %v4120_v0 }
  0x52   : > { %266 = vst.msk [vmem:[#allocation2 + $0x180] sm:$0x1] %vm249_vm1, %v4120_v0  ;;  %1099 = vrot.lane.b32.xlu1 %v4307_v5, %s4124_s26 }
  0x53   : > { %267 = vst.msk [vmem:[#allocation2 + $0x198] sm:$0x1] %vm249_vm1, %v4120_v0 }
  0x54   : > { %269 = vst.msk [vmem:[#allocation2 + $0x29] sm:$0x1] %vm249_vm1, %v4120_v0 }
  0x55   : > { %270 = vst.msk [vmem:[#allocation2 + $0x41] sm:$0x1] %vm249_vm1, %v4120_v0 }
  0x56   : > { %271 = vst.msk [vmem:[#allocation2 + $0x59] sm:$0x1] %vm249_vm1, %v4120_v0 }
  0x57   : > { %272 = vst.msk [vmem:[#allocation2 + $0x71] sm:$0x1] %vm249_vm1, %v4120_v0 }
  0x58   : > { %273 = vst.msk [vmem:[#allocation2 + $0x89] sm:$0x1] %vm249_vm1, %v4120_v0 }
  0x59   : > { %274 = vst.msk [vmem:[#allocation2 + $0xa1] sm:$0x1] %vm249_vm1, %v4120_v0 }
  0x5a   : > { %275 = vst.msk [vmem:[#allocation2 + $0xb9] sm:$0x1] %vm249_vm1, %v4120_v0 }
  0x5b   : > { %276 = vst.msk [vmem:[#allocation2 + $0xd1] sm:$0x1] %vm249_vm1, %v4120_v0 }
  0x5c   : > { %277 = vst.msk [vmem:[#allocation2 + $0xe9] sm:$0x1] %vm249_vm1, %v4120_v0 }
  0x5d   : > { %278 = vst.msk [vmem:[#allocation2 + $0x101] sm:$0x1] %vm249_vm1, %v4120_v0 }
  0x5e   : > { %279 = vst.msk [vmem:[#allocation2 + $0x119] sm:$0x1] %vm249_vm1, %v4120_v0 }
  0x5f   : > { %280 = vst.msk [vmem:[#allocation2 + $0x131] sm:$0x1] %vm249_vm1, %v4120_v0 }
  0x60   : > { %281 = vst.msk [vmem:[#allocation2 + $0x149] sm:$0x1] %vm249_vm1, %v4120_v0 }
  0x61   : > { %282 = vst.msk [vmem:[#allocation2 + $0x161] sm:$0x1] %vm249_vm1, %v4120_v0 }
  0x62   : > { %283 = vst.msk [vmem:[#allocation2 + $0x179] sm:$0x1] %vm249_vm1, %v4120_v0 }
  0x63   : > { %284 = vst.msk [vmem:[#allocation2 + $0x191] sm:$0x1] %vm249_vm1, %v4120_v0 }
  0x64   : > { %358 = vst [vmem:[#allocation3] sm:$0x1] %v4120_v0 }
  0x65   : > { %375 = vst [vmem:[#allocation3 + $0x198] sm:$0x1] %v4120_v0 }
  0x66   : > { %376 = vst [vmem:[#allocation3 + $0x11] sm:$0x1] %v4120_v0 }
  0x67   : > { %393 = vst [vmem:[#allocation3 + $0x1a9] sm:$0x1] %v4120_v0 }
  0x68   : > { %321 = vst.msk [vmem:[#allocation2 + $0x31] sm:$0xff] %vm240_vm0, %v288_v6 }
  0x69   : > { %322 = vst.msk [vmem:[#allocation2 + $0x39] sm:$0xff] %vm240_vm0, %v289_v7 }
  0x6a   : > { %244 = vst.msk [vmem:[#allocation2 + $0x10] sm:$0x3] %vm243_vm2, %v4120_v0 }
  0x6b   : > { %268 = vst.msk [vmem:[#allocation2 + $0x11] sm:$0x1] %vm249_vm1, %v4120_v0 }
  0x6c   : > { %248 = vst.msk [vmem:[#allocation2 + $0x1a8] sm:$0x3] %vm243_vm2, %v4120_v0 }
  0x6d   : > { %285 = vst.msk [vmem:[#allocation2 + $0x1a9] sm:$0x1] %vm249_vm1, %v4120_v0 }
  0x6e   : > { %320 = vst.msk [vmem:[#allocation2 + $0x21] sm:$0xff] %vm240_vm0, %v287_v8 }
  0x6f   : > { %v4367_v9 = vld [vmem:[#allocation2 + $0x31] sm:$0xff]  ;;  %323 = vst.msk [vmem:[#allocation2 + $0x49] sm:$0xff] %vm240_vm0, %v290_v10 }
  0x70   : > { %1483 = vrot.lane.b32.xlu0 %v4367_v9, %s4125_s30  ;;  %v651_v11 = vld [vmem:[#allocation2 + $0x32] sm:$0xff]  ;;  %v4390_v19 = vld [vmem:[#allocation2 + $0x3a] sm:$0xff]  ;;  %324 = vst.msk [vmem:[#allocation2 + $0x51] sm:$0xff] %vm240_vm0, %v291_v21 }
  0x71   : > { %1611 = vrot.lane.b32.xlu1 %v651_v11, %s4126_s6  ;;  %v427_v12 = vld [vmem:[#allocation2 + $0x9] sm:$0xff]  ;;  %v4381_v17 = vld [vmem:[#allocation2 + $0x38] sm:$0xff]  ;;  %325 = vst.msk [vmem:[#allocation2 + $0x61] sm:$0xff] %vm240_vm0, %v292_v25 }
  0x72   : > { %717 = vrot.lane.b32.xlu2 %v427_v12, %s4121_s12  ;;  %v459_v13 = vld [vmem:[#allocation2 + $0xa] sm:$0xff]  ;;  %v620_v22 = vld [vmem:[#allocation2 + $0x39] sm:$0xff]  ;;  %326 = vst.msk [vmem:[#allocation2 + $0x69] sm:$0xff] %vm240_vm0, %v293_v26 }
  0x73   : > { %v4383_v18 = vld [vmem:[#allocation2 + $0x30] sm:$0xff]  ;;  %327 = vst.msk [vmem:[#allocation2 + $0x79] sm:$0xff] %vm240_vm0, %v294_v37 }
  0x74   : > { %328 = vst.msk [vmem:[#allocation2 + $0x81] sm:$0xff] %vm240_vm0, %v295_v42  ;;  %v296_v10 = vld [vmem:[%s4267_s23 + $0x50] sm:$0xff] }
  0x75   : > { %v4375_v14 = vld [vmem:[#allocation2 + $0x20] sm:$0xff]  ;;  %329 = vst.msk [vmem:[#allocation2 + $0x91] sm:$0xff] %vm240_vm0, %v296_v10 }
  0x76   : > { %v554_v15 = vld [vmem:[#allocation2 + $0x1a] sm:$0xff]  ;;  %v555_v16 = vld [vmem:[#allocation2 + $0x22] sm:$0xff] }
  0x77   : > { %v523_v20 = vld [vmem:[#allocation2 + $0x21] sm:$0xff]  ;;  %v4406_v24 = vld [vmem:[#allocation2 + $0x49] sm:$0xff]  ;;  %v4427_v28 = vld [vmem:[#allocation2 + $0x51] sm:$0xff] }
  0x78   : > { %845 = vrot.lane.b32.xlu0 %v459_v13, %s4122_s13  ;;  %v4404_v23 = vld [vmem:[#allocation2 + $0x48] sm:$0xff]  ;;  %v4429_v29 = vld [vmem:[#allocation2 + $0x52] sm:$0xff]  ;;  %v4444_v31 = vld [vmem:[#allocation2 + $0x60] sm:$0xff] }
  0x79   : > { %973 = vrot.lane.b32.xlu1 %v4375_v14, %s4123_s25  ;;  %v4420_v27 = vld [vmem:[#allocation2 + $0x4a] sm:$0xff]  ;;  %v4464_v36 = vld [vmem:[#allocation2 + $0x62] sm:$0xff] }
  0x7a   : > { %1227 = vrot.lane.b32.xlu2 %v554_v15, %s4127_s7  ;;  %v4437_v30 = vld [vmem:[#allocation2 + $0x50] sm:$0xff]  ;;  %v4477_v43 = vld [vmem:[#allocation2 + $0x61] sm:$0xff]  ;;  %v4521_v7 = vld [vmem:[#allocation2 + $0x79] sm:$0xff] }
  0x7b   : > { %v4487_v48 = vld [vmem:[#allocation2 + $0x68] sm:$0xff] }
  0x7c   : > { %v4490_v50 = vld [vmem:[#allocation2 + $0x69] sm:$0xff] }
  0x7d   : > { %v4511_v62 = vld [vmem:[#allocation2 + $0x6a] sm:$0xff]  ;;  %v4560_v38 = vld [vmem:[#allocation2 + $0x82] sm:$0xff] }
  0x80   : > { %1229 = vrot.lane.b32.xlu0 %v555_v16, %s4127_s7 }
  0x81   : > { %1357 = vrot.lane.b32.xlu1 %v4381_v17, %s4128_s8 }
  0x82   : > { %1355 = vrot.lane.b32.xlu2 %v4383_v18, %s4128_s8 }
  0x88   : > { %1613 = vrot.lane.b32.xlu0 %v4390_v19, %s4126_s6 }
  0x89   : > { %719 = vrot.lane.b32.xlu1 %v4307_v5, %s4121_s12 }
  0x8a   : > { %1101 = vrot.lane.b32.xlu2 %v523_v20, %s4124_s26 }
  0x90   : > { %975 = vrot.lane.b32.xlu0 %v4383_v18, %s4123_s25 }
  0x91   : > { %1103 = vrot.lane.b32.xlu1 %v4367_v9, %s4124_s26 }
  0x92   : > { %1485 = vrot.lane.b32.xlu2 %v620_v22, %s4125_s30  ;;  %v716_v39 = vpop.permute.xlu0 %715 }
  0x93   : > { %v1707_v45 = vsel %vm240_vm0, %v394_v44, %v716_v39  ;;  %v297_v39 = vld [vmem:[%s4267_s23 + $0x58] sm:$0xff] }
  0x94   : > { %330 = vst.msk [vmem:[#allocation2 + $0x99] sm:$0xff] %vm240_vm0, %v297_v39 }
  0x98   : > { %1359 = vrot.lane.b32.xlu0 %v4404_v23, %s4128_s8 }
  0x99   : > { %1487 = vrot.lane.b32.xlu1 %v4406_v24, %s4125_s30 }
  0x9a   : > { %847 = vrot.lane.b32.xlu2 %v554_v15, %s4122_s13  ;;  %v844_v46 = vpop.permute.xlu0 %843 }
  0x9b   : > { %v1740_v49 = vsel %vm1739_vm4, %v1707_v45, %v844_v46 }
  0xa0   : > { %721 = vrot.lane.b32.xlu0 %v523_v20, %s4121_s12  ;;  %v4537_v20 = vld [vmem:[#allocation2 + $0x78] sm:$0xff] }
  0xa1   : > { %849 = vrot.lane.b32.xlu1 %v555_v16, %s4122_s13 }
  0xa2   : > { %1231 = vrot.lane.b32.xlu2 %v651_v11, %s4127_s7 }
  0xa8   : > { %1105 = vrot.lane.b32.xlu0 %v620_v22, %s4124_s26 }
  0xa9   : > { %1233 = vrot.lane.b32.xlu1 %v4390_v19, %s4127_s7 }
  0xaa   : > { %1615 = vrot.lane.b32.xlu2 %v4420_v27, %s4126_s6 }
  0xb0   : > { %1489 = vrot.lane.b32.xlu0 %v4427_v28, %s4125_s30 }
  0xb1   : > { %1617 = vrot.lane.b32.xlu1 %v4429_v29, %s4126_s6 }
  0xb2   : > { %977 = vrot.lane.b32.xlu2 %v4381_v17, %s4123_s25 }
  0xb8   : > { %851 = vrot.lane.b32.xlu0 %v651_v11, %s4122_s13 }
  0xb9   : > { %979 = vrot.lane.b32.xlu1 %v4404_v23, %s4123_s25 }
  0xba   : > { %1361 = vrot.lane.b32.xlu2 %v4437_v30, %s4128_s8 }
  0xbc   : > { %v972_v41 = vpop.permute.xlu1 %971 }
  0xbd   : > { %v1773_v52 = vsel %vm1772_vm5, %v1740_v49, %v972_v41 }
  0xc0   : > { %1235 = vrot.lane.b32.xlu0 %v4420_v27, %s4127_s7 }
  0xc1   : > { %1363 = vrot.lane.b32.xlu1 %v4444_v31, %s4128_s8 }
  0xc2   : > { %723 = vrot.lane.b32.xlu2 %v4367_v9, %s4121_s12  ;;  %v4524_v9 = vld [vmem:[#allocation2 + $0x7a] sm:$0xff] }
  0xc4   : > { %v1100_v51 = vpop.permute.xlu1 %1099 }
  0xc5   : > { %v1806_v53 = vsel %vm1805_vm6, %v1773_v52, %v1100_v51 }
  0xc8   : > { %1619 = vrot.lane.b32.xlu0 %v4464_v36, %s4126_s6 }
  0xc9   : > { %725 = vrot.lane.b32.xlu1 %v620_v22, %s4121_s12 }
  0xca   : > { %1107 = vrot.lane.b32.xlu2 %v4406_v24, %s4124_s26 }
  0xcc   : > { %v718_v40 = vpop.permute.xlu2 %717 }
  0xcd   : > { %v1708_v3 = vsel %vm240_vm0, %v395_v63, %v718_v40  ;;  %v299_v63 = vld [vmem:[%s4267_s23 + $0x68] sm:$0xff] }
  0xce   : > { %332 = vst.msk [vmem:[#allocation2 + $0xb1] sm:$0xff] %vm240_vm0, %v299_v63 }
  0xd0   : > { %981 = vrot.lane.b32.xlu0 %v4437_v30, %s4123_s25 }
  0xd1   : > { %1109 = vrot.lane.b32.xlu1 %v4427_v28, %s4124_s26 }
  0xd2   : > { %1491 = vrot.lane.b32.xlu2 %v4477_v43, %s4125_s30 }
  0xd4   : > { %v1228_v47 = vpop.permute.xlu2 %1227 }
  0xd5   : > { %v1839_v55 = vsel %vm1838_vm7, %v1806_v53, %v1228_v47  ;;  %v4576_v47 = vld [vmem:[#allocation2 + $0x81] sm:$0xff]  ;;  %v4586_v53 = vld [vmem:[#allocation2 + $0x90] sm:$0xff] }
  0xd8   : > { %1365 = vrot.lane.b32.xlu0 %v4487_v48, %s4128_s8 }
  0xd9   : > { %1493 = vrot.lane.b32.xlu1 %v4490_v50, %s4125_s30 }
  0xda   : > { %853 = vrot.lane.b32.xlu2 %v4390_v19, %s4122_s13 }
  0xdc   : > { %v1356_v54 = vpop.permute.xlu2 %1355 }
  0xdd   : > { %v1872_v56 = vsel %vm1871_vm8, %v1839_v55, %v1356_v54  ;;  %v4589_v55 = vld [vmem:[#allocation2 + $0x91] sm:$0xff] }
  0xe0   : > { %727 = vrot.lane.b32.xlu0 %v4406_v24, %s4121_s12 }
  0xe1   : > { %855 = vrot.lane.b32.xlu1 %v4420_v27, %s4122_s13 }
  0xe2   : > { %v1484_v57 = vpop.permute.xlu0 %1483  ;;  %1237 = vrot.lane.b32.xlu2 %v4429_v29, %s4127_s7 }
  0xe3   : > { %v1612_v58 = vpop.permute.xlu1 %1611  ;;  %v1905_v59 = vsel %vm1904_vm9, %v1872_v56, %v1484_v57 }
  0xe4   : > { %v1102_v60 = vpop.permute.xlu2 %1101  ;;  %v1938_v61 = vsel %vm1937_vm10, %v1905_v59, %v1612_v58 }
  0xe5   : > { %3876 = vmatmul.msk.f32.vlgmr.msra.gmra.mxu0 %vm1979_vm11, %v1938_v61  ;;  %v298_v61 = vld [vmem:[%s4267_s23 + $0x60] sm:$0xff] }
  0xe6   : > { %331 = vst.msk [vmem:[#allocation2 + $0xa9] sm:$0xff] %vm240_vm0, %v298_v61 }
  0xe8   : > { %1111 = vrot.lane.b32.xlu0 %v4477_v43, %s4124_s26 }
  0xe9   : > { %1239 = vrot.lane.b32.xlu1 %v4464_v36, %s4127_s7 }
  0xea   : > { %v846_v1 = vpop.permute.xlu0 %845  ;;  %1621 = vrot.lane.b32.xlu2 %v4511_v62, %s4126_s6 }
  0xeb   : > { %v974_v2 = vpop.permute.xlu1 %973  ;;  %v1741_v6 = vsel %vm1739_vm4, %v1708_v3, %v846_v1 }
  0xec   : > { %v1486_v5 = vpop.permute.xlu2 %1485  ;;  %v1774_v8 = vsel %vm1772_vm5, %v1741_v6, %v974_v2  ;;  %v2561_v6 = vld [vmem:[#allocation4 + $0x70] sm:$0xff] }
  0xed   : > { %v1807_v11 = vsel %vm1805_vm6, %v1774_v8, %v1102_v60  ;;  %v4662_v63 = vld [vmem:[#allocation2 + $0xaa] sm:$0xff] }
  0xf0   : > { %1495 = vrot.lane.b32.xlu0 %v4521_v7, %s4125_s30 }
  0xf1   : > { %1623 = vrot.lane.b32.xlu1 %v4524_v9, %s4126_s6 }
  0xf2   : > { %v1230_v12 = vpop.permute.xlu0 %1229  ;;  %983 = vrot.lane.b32.xlu2 %v4444_v31, %s4123_s25 }
  0xf3   : > { %v1358_v13 = vpop.permute.xlu1 %1357  ;;  %v1840_v15 = vsel %vm1838_vm7, %v1807_v11, %v1230_v12 }
  0xf4   : > { %v848_v16 = vpop.permute.xlu2 %847  ;;  %v1873_v19 = vsel %vm1871_vm8, %v1840_v15, %v1358_v13  ;;  %v2559_v15 = vld [vmem:[#allocation4 + $0x60] sm:$0xff] }
  0xf5   : > { %v1906_v21 = vsel %vm1904_vm9, %v1873_v19, %v1486_v5  ;;  %v2562_v5 = vld [vmem:[#allocation4 + $0x78] sm:$0xff] }
  0xf6   : > { %2695 = vmatpush.msra.mxu1 %v2562_v5  ;;  %3920 = vmatpush.msra.mxu2 %v2562_v5 }
  0xf8   : > { %857 = vrot.lane.b32.xlu0 %v4429_v29, %s4122_s13  ;;  %v4550_v29 = vld [vmem:[#allocation2 + $0x80] sm:$0xff]  ;;  %2696 = vmatpush.msra.mxu1 %v2561_v6 }
  0xf9   : > { %985 = vrot.lane.b32.xlu1 %v4487_v48, %s4123_s25  ;;  %3921 = vmatpush.msra.mxu2 %v2561_v6 }
  0xfa   : > { %v1614_v22 = vpop.permute.xlu0 %1613  ;;  %1367 = vrot.lane.b32.xlu2 %v4537_v20, %s4128_s8 }
  0xfb   : > { %v1939_v24 = vsel %vm1937_vm10, %v1906_v21, %v1614_v22  ;;  %v720_v25 = vpop.permute.xlu1 %719  ;;  %v4625_v22 = vld [vmem:[#allocation2 + $0x99] sm:$0xff] }
  0xfc   : > { %3877 = vmatmul.msk.f32.gmra.mxu0 %vm1979_vm11, %v1939_v24  ;;  %v1232_v26 = vpop.permute.xlu2 %1231  ;;  %v1709_v27 = vsel %vm240_vm0, %v4289_v4, %v720_v25  ;;  %v2557_v24 = vld [vmem:[#allocation4 + $0x50] sm:$0xff] }
  0xfd   : > { %v1742_v32 = vsel %vm1739_vm4, %v1709_v27, %v848_v16  ;;  %v2558_v16 = vld [vmem:[#allocation4 + $0x58] sm:$0xff] }
 0x100   : > { %1241 = vrot.lane.b32.xlu0 %v4511_v62, %s4127_s7 }
 0x101   : > { %1369 = vrot.lane.b32.xlu1 %v4550_v29, %s4128_s8 }
 0x102   : > { %v976_v33 = vpop.permute.xlu0 %975  ;;  %729 = vrot.lane.b32.xlu2 %v4427_v28, %s4121_s12 }
 0x103   : > { %v1104_v34 = vpop.permute.xlu1 %1103  ;;  %v1775_v35 = vsel %vm1772_vm5, %v1742_v32, %v976_v33 }
 0x104   : > { %v1616_v37 = vpop.permute.xlu2 %1615  ;;  %v1808_v4 = vsel %vm1805_vm6, %v1775_v35, %v1104_v34  ;;  %v2555_v34 = vld [vmem:[#allocation4 + $0x40] sm:$0xff]  ;;  %v2554_v35 = vld [vmem:[#allocation4 + $0x38] sm:$0xff] }
 0x105   : > { %v1841_v40 = vsel %vm1838_vm7, %v1808_v4, %v1232_v26  ;;  %v4628_v26 = vld [vmem:[#allocation2 + $0x9a] sm:$0xff] }
 0x108   : > { %1625 = vrot.lane.b32.xlu0 %v4560_v38, %s4126_s6 }
 0x109   : > { %731 = vrot.lane.b32.xlu1 %v4477_v43, %s4121_s12 }
 0x10a   : > { %v1360_v28 = vpop.permute.xlu0 %1359  ;;  %1113 = vrot.lane.b32.xlu2 %v4490_v50, %s4124_s26 }
 0x10b   : > { %v1874_v41 = vsel %vm1871_vm8, %v1841_v40, %v1360_v28  ;;  %v1488_v42 = vpop.permute.xlu1 %1487  ;;  %v2553_v40 = vld [vmem:[#allocation4 + $0x30] sm:$0xff]  ;;  %v4639_v28 = vld [vmem:[#allocation2 + $0x98] sm:$0xff] }
 0x10c   : > { %v1907_v44 = vsel %vm1904_vm9, %v1874_v41, %v1488_v42  ;;  %v978_v45 = vpop.permute.xlu2 %977  ;;  %v2552_v42 = vld [vmem:[#allocation4 + $0x28] sm:$0xff] }
 0x10d   : > { %v1940_v46 = vsel %vm1937_vm10, %v1907_v44, %v1616_v37 }
 0x10e   : > { %3878 = vmatmul.msk.f32.gmra.mxu0 %vm1979_vm11, %v1940_v46 }
 0x110   : > { %987 = vrot.lane.b32.xlu0 %v4537_v20, %s4123_s25 }
 0x111   : > { %1115 = vrot.lane.b32.xlu1 %v4521_v7, %s4124_s26 }
 0x112   : > { %v722_v43 = vpop.permute.xlu0 %721  ;;  %1497 = vrot.lane.b32.xlu2 %v4576_v47, %s4125_s30 }
 0x113   : > { %v1710_v49 = vsel %vm240_vm0, %v4375_v14, %v722_v43  ;;  %v850_v51 = vpop.permute.xlu1 %849  ;;  %v2551_v43 = vld [vmem:[#allocation4 + $0x20] sm:$0xff] }
 0x114   : > { %v1362_v52 = vpop.permute.xlu2 %1361  ;;  %v1743_v54 = vsel %vm1739_vm4, %v1710_v49, %v850_v51  ;;  %v2550_v49 = vld [vmem:[#allocation4 + $0x18] sm:$0xff]  ;;  %v2549_v51 = vld [vmem:[#allocation4 + $0x10] sm:$0xff] }
 0x115   : > { %v1776_v56 = vsel %vm1772_vm5, %v1743_v54, %v978_v45  ;;  %v4652_v54 = vld [vmem:[#allocation2 + $0xa8] sm:$0xff] }
 0x118   : > { %1371 = vrot.lane.b32.xlu0 %v4586_v53, %s4128_s8 }
 0x119   : > { %1499 = vrot.lane.b32.xlu1 %v4589_v55, %s4125_s30 }
 0x11a   : > { %v1106_v57 = vpop.permute.xlu0 %1105  ;;  %859 = vrot.lane.b32.xlu2 %v4464_v36, %s4122_s13 }
 0x11b   : > { %v1234_v14 = vpop.permute.xlu1 %1233  ;;  %v1809_v58 = vsel %vm1805_vm6, %v1776_v56, %v1106_v57  ;;  %v2548_v56 = vld [vmem:[#allocation4 + $0x8] sm:$0xff] }
 0x11c   : > { %v724_v59 = vpop.permute.xlu2 %723  ;;  %v1842_v60 = vsel %vm1838_vm7, %v1809_v58, %v1234_v14  ;;  %v2547_v58 = vld [vmem:[#allocation4] sm:$0xff] }
 0x11d   : > { %v1875_v1 = vsel %vm1871_vm8, %v1842_v60, %v1362_v52  ;;  %v1711_v11 = vsel %vm240_vm0, %v4383_v18, %v724_v59  ;;  %v2556_v18 = vld [vmem:[#allocation4 + $0x48] sm:$0xff]  ;;  %v2258_v59 = vld [vmem:[#allocation3] sm:$0xff] }
 0x120   : > { %733 = vrot.lane.b32.xlu0 %v4490_v50, %s4121_s12  ;;  %v4614_v50 = vld [vmem:[#allocation2 + $0x92] sm:$0xff] }
 0x121   : > { %861 = vrot.lane.b32.xlu1 %v4511_v62, %s4122_s13  ;;  %v2560_v62 = vld [vmem:[#allocation4 + $0x68] sm:$0xff] }
 0x122   : > { %v1490_v36 = vpop.permute.xlu0 %1489  ;;  %1243 = vrot.lane.b32.xlu2 %v4524_v9, %s4127_s7  ;;  %2697 = vmatpush.msra.mxu1 %v2560_v62 }
 0x123   : > { %v1908_v2 = vsel %vm1904_vm9, %v1875_v1, %v1490_v36  ;;  %v1618_v3 = vpop.permute.xlu1 %1617  ;;  %3922 = vmatpush.msra.mxu2 %v2560_v62  ;;  %v300_v36 = vld [vmem:[%s4267_s23 + $0x70] sm:$0xff]  ;;  %v301_v62 = vld [vmem:[%s4267_s23 + $0x78] sm:$0xff] }
 0x124   : > { %v1108_v8 = vpop.permute.xlu2 %1107  ;;  %v1941_v10 = vsel %vm1937_vm10, %v1908_v2, %v1618_v3  ;;  %2698 = vmatpush.msra.mxu1 %v2559_v15  ;;  %333 = vst.msk [vmem:[#allocation2 + $0xc1] sm:$0xff] %vm240_vm0, %v300_v36 }
 0x125   : > { %3879 = vmatmul.msk.f32.gmra.mxu0 %vm1979_vm11, %v1941_v10  ;;  %3923 = vmatpush.msra.mxu2 %v2559_v15  ;;  %334 = vst.msk [vmem:[#allocation2 + $0xc9] sm:$0xff] %vm240_vm0, %v301_v62  ;;  %v4691_v15 = vld [vmem:[#allocation2 + $0xb0] sm:$0xff] }
 0x126   : > { %2699 = vmatpush.msra.mxu1 %v2558_v16 }
 0x127   : > { %3924 = vmatpush.msra.mxu2 %v2558_v16 }
 0x128   : > { %1117 = vrot.lane.b32.xlu0 %v4576_v47, %s4124_s26  ;;  %2700 = vmatpush.msra.mxu1 %v2557_v24 }
 0x129   : > { %1245 = vrot.lane.b32.xlu1 %v4560_v38, %s4127_s7  ;;  %3925 = vmatpush.msra.mxu2 %v2557_v24 }
 0x12a   : > { %v852_v12 = vpop.permute.xlu0 %851  ;;  %1627 = vrot.lane.b32.xlu2 %v4614_v50, %s4126_s6  ;;  %2701 = vmatpush.msra.mxu1 %v2556_v18 }
 0x12b   : > { %v980_v13 = vpop.permute.xlu1 %979  ;;  %v1744_v21 = vsel %vm1739_vm4, %v1711_v11, %v852_v12  ;;  %3926 = vmatpush.msra.mxu2 %v2556_v18  ;;  %v4680_v11 = vld [vmem:[#allocation2 + $0xa9] sm:$0xff] }
 0x12c   : > { %v1492_v19 = vpop.permute.xlu2 %1491  ;;  %v1777_v25 = vsel %vm1772_vm5, %v1744_v21, %v980_v13  ;;  %2702 = vmatpush.msra.mxu1 %v2555_v34 }
 0x12d   : > { %v1810_v27 = vsel %vm1805_vm6, %v1777_v25, %v1108_v8  ;;  %3927 = vmatpush.msra.mxu2 %v2555_v34 }
 0x12e   : > { %2703 = vmatpush.msra.mxu1 %v2554_v35 }
 0x12f   : > { %3928 = vmatpush.msra.mxu2 %v2554_v35 }
 0x130   : > { %1501 = vrot.lane.b32.xlu0 %v4625_v22, %s4125_s30  ;;  %2704 = vmatpush.msra.mxu1 %v2553_v40 }
 0x131   : > { %1629 = vrot.lane.b32.xlu1 %v4628_v26, %s4126_s6  ;;  %3929 = vmatpush.msra.mxu2 %v2553_v40 }
 0x132   : > { %v1236_v32 = vpop.permute.xlu0 %1235  ;;  %989 = vrot.lane.b32.xlu2 %v4550_v29, %s4123_s25  ;;  %2705 = vmatpush.msra.mxu1 %v2552_v42 }
 0x133   : > { %v1364_v33 = vpop.permute.xlu1 %1363  ;;  %v1843_v37 = vsel %vm1838_vm7, %v1810_v27, %v1236_v32  ;;  %3930 = vmatpush.msra.mxu2 %v2552_v42  ;;  %v4708_v32 = vld [vmem:[%s6524_s2] ss:$0 sm:$0xff] }
 0x134   : > { %v854_v4 = vpop.permute.xlu2 %853  ;;  %v1876_v39 = vsel %vm1871_vm8, %v1843_v37, %v1364_v33  ;;  %2706 = vmatpush.msra.mxu1 %v2551_v43 }
 0x135   : > { %v1909_v41 = vsel %vm1904_vm9, %v1876_v39, %v1492_v19  ;;  %3931 = vmatpush.msra.mxu2 %v2551_v43  ;;  %v4694_v19 = vld [vmem:[#allocation2 + $0xb1] sm:$0xff]  ;;  %v4732_v43 = vld [vmem:[#allocation2 + $0xc1] sm:$0xff] }
 0x136   : > { %2707 = vmatpush.msra.mxu1 %v2550_v49 }
 0x137   : > { %3932 = vmatpush.msra.mxu2 %v2550_v49 }
 0x138   : > { %863 = vrot.lane.b32.xlu0 %v4524_v9, %s4122_s13  ;;  %2708 = vmatpush.msra.mxu1 %v2549_v51 }
 0x139   : > { %991 = vrot.lane.b32.xlu1 %v4586_v53, %s4123_s25  ;;  %3933 = vmatpush.msra.mxu2 %v2549_v51  ;;  %v4735_v51 = vld [vmem:[#allocation2 + $0xc2] sm:$0xff] }
 0x13a   : > { %v1620_v44 = vpop.permute.xlu0 %1619  ;;  %1373 = vrot.lane.b32.xlu2 %v4639_v28, %s4128_s8  ;;  %2709 = vmatpush.msra.mxu1 %v2548_v56 }
 0x13b   : > { %v1942_v45 = vsel %vm1937_vm10, %v1909_v41, %v1620_v44  ;;  %v726_v46 = vpop.permute.xlu1 %725  ;;  %3934 = vmatpush.msra.mxu2 %v2548_v56 }
 0x13c   : > { %3880 = vmatmul.msk.f32.gmra.mxu0 %vm1979_vm11, %v1942_v45  ;;  %v1238_v9 = vpop.permute.xlu2 %1237  ;;  %v1712_v52 = vsel %vm240_vm0, %v4381_v17, %v726_v46  ;;  %2710 = vmatpush.msra.mxu1 %v2547_v58 }
 0x13d   : > { %v1745_v57 = vsel %vm1739_vm4, %v1712_v52, %v854_v4  ;;  %2711 = vmatmul.f32.vlgmr.msra.gmra.mxu1 %v2258_v59  ;;  %3935 = vmatpush.msra.mxu2 %v2547_v58  ;;  %v302_v52 = vld [vmem:[%s4267_s23 + $0x80] sm:$0xff] }
 0x13e   : > { %335 = vst.msk [vmem:[#allocation2 + $0xd9] sm:$0xff] %vm240_vm0, %v302_v52  ;;  %v4748_v59 = vld [vmem:[#allocation2 + $0xc0] sm:$0xff]  ;;  %v304_v52 = vld [vmem:[%s4267_s23 + $0x90] sm:$0xff] }
 0x13f   : > { %337 = vst.msk [vmem:[#allocation2 + $0xf1] sm:$0xff] %vm240_vm0, %v304_v52 }
 0x140   : > { %1247 = vrot.lane.b32.xlu0 %v4614_v50, %s4127_s7 }
 0x141   : > { %1375 = vrot.lane.b32.xlu1 %v4652_v54, %s4128_s8 }
 0x142   : > { %v982_v14 = vpop.permute.xlu0 %981  ;;  %735 = vrot.lane.b32.xlu2 %v4521_v7, %s4121_s12 }
 0x143   : > { %v1110_v17 = vpop.permute.xlu1 %1109  ;;  %v1778_v60 = vsel %vm1772_vm5, %v1745_v57, %v982_v14 }
 0x144   : > { %v1622_v61 = vpop.permute.xlu2 %1621  ;;  %v1811_v1 = vsel %vm1805_vm6, %v1778_v60, %v1110_v17 }
 0x145   : > { %v1844_v7 = vsel %vm1838_vm7, %v1811_v1, %v1238_v9  ;;  %2714 = vmatmul.f32.gmra.mxu1 %v4120_v0 }
 0x148   : > { %1631 = vrot.lane.b32.xlu0 %v4662_v63, %s4126_s6 }
 0x149   : > { %737 = vrot.lane.b32.xlu1 %v4576_v47, %s4121_s12 }
 0x14a   : > { %v1366_v2 = vpop.permute.xlu0 %1365  ;;  %1119 = vrot.lane.b32.xlu2 %v4589_v55, %s4124_s26 }
 0x14b   : > { %v1877_v3 = vsel %vm1871_vm8, %v1844_v7, %v1366_v2  ;;  %v1494_v5 = vpop.permute.xlu1 %1493 }
 0x14c   : > { %v1910_v6 = vsel %vm1904_vm9, %v1877_v3, %v1494_v5  ;;  %v984_v8 = vpop.permute.xlu2 %983 }
 0x14d   : > { %v1943_v10 = vsel %vm1937_vm10, %v1910_v6, %v1622_v61  ;;  %v4762_v6 = vld [vmem:[#allocation2 + $0xc8] sm:$0xff] }
 0x14e   : > { %3881 = vmatmul.msk.f32.gmra.mxu0 %vm1979_vm11, %v1943_v10 }
 0x150   : > { %993 = vrot.lane.b32.xlu0 %v4639_v28, %s4123_s25 }
 0x151   : > { %1121 = vrot.lane.b32.xlu1 %v4625_v22, %s4124_s26 }
 0x152   : > { %v728_v47 = vpop.permute.xlu0 %727  ;;  %1503 = vrot.lane.b32.xlu2 %v4680_v11, %s4125_s30 }
 0x153   : > { %v1713_v0 = vsel %vm240_vm0, %v4404_v23, %v728_v47  ;;  %v856_v12 = vpop.permute.xlu1 %855 }
 0x154   : > { %v1368_v13 = vpop.permute.xlu2 %1367  ;;  %v1746_v16 = vsel %vm1739_vm4, %v1713_v0, %v856_v12 }
 0x155   : > { %v1779_v21 = vsel %vm1772_vm5, %v1746_v16, %v984_v8  ;;  %v303_v16 = vld [vmem:[%s4267_s23 + $0x88] sm:$0xff] }
 0x156   : > { %336 = vst.msk [vmem:[#allocation2 + $0xe1] sm:$0xff] %vm240_vm0, %v303_v16 }
 0x158   : > { %1377 = vrot.lane.b32.xlu0 %v4691_v15, %s4128_s8 }
 0x159   : > { %1505 = vrot.lane.b32.xlu1 %v4694_v19, %s4125_s30 }
 0x15a   : > { %v1112_v24 = vpop.permute.xlu0 %1111  ;;  %865 = vrot.lane.b32.xlu2 %v4560_v38, %s4122_s13 }
 0x15b   : > { %v1240_v23 = vpop.permute.xlu1 %1239  ;;  %v1812_v25 = vsel %vm1805_vm6, %v1779_v21, %v1112_v24 }
 0x15c   : > { %v730_v18 = vpop.permute.xlu2 %729  ;;  %v1845_v27 = vsel %vm1838_vm7, %v1812_v25, %v1240_v23 }
 0x15d   : > { %v1878_v33 = vsel %vm1871_vm8, %v1845_v27, %v1368_v13 }
 0x160   : > { %739 = vrot.lane.b32.xlu0 %v4589_v55, %s4121_s12  ;;  %v4721_v55 = vld [vmem:[#allocation2 + $0xb2] sm:$0xff] }
 0x161   : > { %867 = vrot.lane.b32.xlu1 %v4614_v50, %s4122_s13  ;;  %v1714_v50 = vsel %vm240_vm0, %v4437_v30, %v730_v18 }
 0x162   : > { %v1496_v38 = vpop.permute.xlu0 %1495  ;;  %v2097_v34 = vpop.f32.mrf.mxu0  ;;  %1249 = vrot.lane.b32.xlu2 %v4628_v26, %s4127_s7 }
 0x163   : > { %v1911_v35 = vsel %vm1904_vm9, %v1878_v33, %v1496_v38  ;;  %v2098_v37 = vadd.f32 %v4708_v32, %v2097_v34  ;;  %v1624_v4 = vpop.permute.xlu1 %1623 }
 0x164   : > { %v1114_v39 = vpop.permute.xlu2 %1113  ;;  %v1944_v40 = vsel %vm1937_vm10, %v1911_v35, %v1624_v4  ;;  %v4792_v35 = vld [vmem:[#allocation2 + $0xc9] sm:$0xff] }
 0x165   : > { %v2193_v41 = vmax.f32 %v2098_v37, 0.0  ;;  %3882 = vmatmul.msk.f32.gmra.mxu0 %vm1979_vm11, %v1944_v40  ;;  %v4802_v40 = vld [vmem:[#allocation2 + $0xd8] sm:$0xff] }
 0x167   : > { %2226 = vst [vmem:[#allocation3 + $0x19] sm:$0xff] %v2193_v41 }
 0x168   : > { %1123 = vrot.lane.b32.xlu0 %v4680_v11, %s4124_s26 }
 0x169   : > { %1251 = vrot.lane.b32.xlu1 %v4662_v63, %s4127_s7 }
 0x16a   : > { %v858_v42 = vpop.permute.xlu0 %857  ;;  %1633 = vrot.lane.b32.xlu2 %v4721_v55, %s4126_s6 }
 0x16b   : > { %v986_v44 = vpop.permute.xlu1 %985  ;;  %v1747_v46 = vsel %vm1739_vm4, %v1714_v50, %v858_v42  ;;  %v4805_v50 = vld [vmem:[#allocation2 + $0xd9] sm:$0xff] }
 0x16c   : > { %v1498_v45 = vpop.permute.xlu2 %1497  ;;  %v1780_v49 = vsel %vm1772_vm5, %v1747_v46, %v986_v44 }
 0x16d   : > { %v1813_v30 = vsel %vm1805_vm6, %v1780_v49, %v1114_v39 }
 0x16e   : > { %v2260_v9 = vld [vmem:[#allocation3 + $0x18] sm:$0xff] }
 0x16f   : > { %2717 = vmatmul.f32.gmra.mxu1 %v2260_v9 }
 0x170   : > { %1507 = vrot.lane.b32.xlu0 %v4732_v43, %s4125_s30 }
 0x171   : > { %1635 = vrot.lane.b32.xlu1 %v4735_v51, %s4126_s6 }
 0x172   : > { %v1242_v56 = vpop.permute.xlu0 %1241  ;;  %995 = vrot.lane.b32.xlu2 %v4652_v54, %s4123_s25 }
 0x173   : > { %v1370_v57 = vpop.permute.xlu1 %1369  ;;  %v1846_v14 = vsel %vm1838_vm7, %v1813_v30, %v1242_v56  ;;  %v305_v30 = vld [vmem:[%s4267_s23 + $0x98] sm:$0xff] }
 0x174   : > { %v860_v17 = vpop.permute.xlu2 %859  ;;  %v1879_v58 = vsel %vm1871_vm8, %v1846_v14, %v1370_v57  ;;  %338 = vst.msk [vmem:[#allocation2 + $0xf9] sm:$0xff] %vm240_vm0, %v305_v30 }
 0x175   : > { %v1912_v60 = vsel %vm1904_vm9, %v1879_v58, %v1498_v45 }
 0x178   : > { %869 = vrot.lane.b32.xlu0 %v4628_v26, %s4122_s13 }
 0x179   : > { %v2100_v61 = vpop.f32.mrf.mxu0  ;;  %997 = vrot.lane.b32.xlu1 %v4691_v15, %s4123_s25 }
 0x17a   : > { %v1626_v1 = vpop.permute.xlu0 %1625  ;;  %v2101_v36 = vadd.f32 %v4708_v32, %v2100_v61  ;;  %1379 = vrot.lane.b32.xlu2 %v4748_v59, %s4128_s8 }
 0x17b   : > { %v1945_v7 = vsel %vm1937_vm10, %v1912_v60, %v1626_v1  ;;  %v732_v2 = vpop.permute.xlu1 %731  ;;  %v4834_v1 = vld [vmem:[#allocation2 + $0xda] sm:$0xff] }
 0x17c   : > { %v2194_v3 = vmax.f32 %v2101_v36, 0.0  ;;  %3883 = vmatmul.msk.f32.gmra.mxu0 %vm1979_vm11, %v1945_v7  ;;  %v1244_v5 = vpop.permute.xlu2 %1243  ;;  %v1715_v26 = vsel %vm240_vm0, %v4444_v31, %v732_v2  ;;  %v4774_v31 = vld [vmem:[#allocation2 + $0xca] sm:$0xff] }
 0x17d   : > { %v1748_v8 = vsel %vm1739_vm4, %v1715_v26, %v860_v17 }
 0x17e   : > { %2227 = vst [vmem:[#allocation3 + $0x21] sm:$0xff] %v2194_v3 }
 0x180   : > { %1253 = vrot.lane.b32.xlu0 %v4721_v55, %s4127_s7 }
 0x181   : > { %1381 = vrot.lane.b32.xlu1 %v4762_v6, %s4128_s8 }
 0x182   : > { %v988_v10 = vpop.permute.xlu0 %987  ;;  %741 = vrot.lane.b32.xlu2 %v4625_v22, %s4121_s12 }
 0x183   : > { %v1116_v62 = vpop.permute.xlu1 %1115  ;;  %v1781_v47 = vsel %vm1772_vm5, %v1748_v8, %v988_v10  ;;  %v4850_v10 = vld [vmem:[#allocation2 + $0xe2] sm:$0xff] }
 0x184   : > { %v1628_v0 = vpop.permute.xlu2 %1627  ;;  %v1814_v13 = vsel %vm1805_vm6, %v1781_v47, %v1116_v62 }
 0x185   : > { %v4772_v12 = vld [vmem:[#allocation3 + $0x20] sm:$0xff]  ;;  %v1847_v21 = vsel %vm1838_vm7, %v1814_v13, %v1244_v5  ;;  %v4845_v5 = vld [vmem:[#allocation2 + $0xe1] sm:$0xff] }
 0x186   : > { %2720 = vmatmul.f32.gmra.mxu1 %v4772_v12 }
 0x188   : > { %1637 = vrot.lane.b32.xlu0 %v4774_v31, %s4126_s6 }
 0x189   : > { %743 = vrot.lane.b32.xlu1 %v4680_v11, %s4121_s12 }
 0x18a   : > { %v1372_v22 = vpop.permute.xlu0 %1371  ;;  %1125 = vrot.lane.b32.xlu2 %v4694_v19, %s4124_s26 }
 0x18b   : > { %v1880_v24 = vsel %vm1871_vm8, %v1847_v21, %v1372_v22  ;;  %v1500_v23 = vpop.permute.xlu1 %1499  ;;  %v2103_v25 = vpop.f32.mrf.mxu0  ;;  %v4862_v21 = vld [vmem:[#allocation2 + $0xe0] sm:$0xff] }
 0x18c   : > { %v1913_v18 = vsel %vm1904_vm9, %v1880_v24, %v1500_v23  ;;  %v2104_v27 = vadd.f32 %v4708_v32, %v2103_v25  ;;  %v990_v33 = vpop.permute.xlu2 %989 }
 0x18d   : > { %v1946_v38 = vsel %vm1937_vm10, %v1913_v18, %v1628_v0 }
 0x18e   : > { %v2195_v34 = vmax.f32 %v2104_v27, 0.0  ;;  %3884 = vmatmul.msk.f32.gmra.mxu0 %vm1979_vm11, %v1946_v38 }
 0x190   : > { %999 = vrot.lane.b32.xlu0 %v4748_v59, %s4123_s25  ;;  %2228 = vst [vmem:[#allocation3 + $0x31] sm:$0xff] %v2195_v34  ;;  %v4876_v34 = vld [vmem:[#allocation2 + $0xf0] sm:$0xff] }
 0x191   : > { %1127 = vrot.lane.b32.xlu1 %v4732_v43, %s4124_s26 }
 0x192   : > { %v734_v11 = vpop.permute.xlu0 %733  ;;  %1509 = vrot.lane.b32.xlu2 %v4792_v35, %s4125_s30 }
 0x193   : > { %v1716_v37 = vsel %vm240_vm0, %v4487_v48, %v734_v11  ;;  %v862_v4 = vpop.permute.xlu1 %861 }
 0x194   : > { %v1374_v39 = vpop.permute.xlu2 %1373  ;;  %v1749_v41 = vsel %vm1739_vm4, %v1716_v37, %v862_v4 }
 0x195   : > { %v1782_v44 = vsel %vm1772_vm5, %v1749_v41, %v990_v33 }
 0x197   : > { %v4807_v42 = vld [vmem:[#allocation3 + $0x30] sm:$0xff] }
 0x198   : > { %1383 = vrot.lane.b32.xlu0 %v4802_v40, %s4128_s8  ;;  %2723 = vmatmul.f32.gmra.mxu1 %v4807_v42 }
 0x199   : > { %1511 = vrot.lane.b32.xlu1 %v4805_v50, %s4125_s30 }
 0x19a   : > { %v1118_v48 = vpop.permute.xlu0 %1117  ;;  %871 = vrot.lane.b32.xlu2 %v4662_v63, %s4122_s13 }
 0x19b   : > { %v1246_v45 = vpop.permute.xlu1 %1245  ;;  %v1815_v46 = vsel %vm1805_vm6, %v1782_v44, %v1118_v48 }
 0x19c   : > { %v736_v49 = vpop.permute.xlu2 %735  ;;  %v1848_v9 = vsel %vm1838_vm7, %v1815_v46, %v1246_v45  ;;  %v306_v45 = vld [vmem:[%s4267_s23 + $0xa0] sm:$0xff] }
 0x19d   : > { %v1881_v56 = vsel %vm1871_vm8, %v1848_v9, %v1374_v39  ;;  %339 = vst.msk [vmem:[#allocation2 + $0x109] sm:$0xff] %vm240_vm0, %v306_v45 }
 0x1a0   : > { %745 = vrot.lane.b32.xlu0 %v4694_v19, %s4121_s12 }
 0x1a1   : > { %873 = vrot.lane.b32.xlu1 %v4721_v55, %s4122_s13  ;;  %v1717_v55 = vsel %vm240_vm0, %v4537_v20, %v736_v49 }
 0x1a2   : > { %v1502_v63 = vpop.permute.xlu0 %1501  ;;  %v2106_v57 = vpop.f32.mrf.mxu0  ;;  %1255 = vrot.lane.b32.xlu2 %v4735_v51, %s4127_s7 }
 0x1a3   : > { %v1914_v14 = vsel %vm1904_vm9, %v1881_v56, %v1502_v63  ;;  %v2107_v17 = vadd.f32 %v4708_v32, %v2106_v57  ;;  %v1630_v58 = vpop.permute.xlu1 %1629 }
 0x1a4   : > { %v1120_v60 = vpop.permute.xlu2 %1119  ;;  %v1947_v19 = vsel %vm1937_vm10, %v1914_v14, %v1630_v58 }
 0x1a5   : > { %v2196_v61 = vmax.f32 %v2107_v17, 0.0  ;;  %3885 = vmatmul.msk.f32.gmra.mxu0 %vm1979_vm11, %v1947_v19  ;;  %v307_v17 = vld [vmem:[%s4267_s23 + $0xa8] sm:$0xff] }
 0x1a6   : > { %340 = vst.msk [vmem:[#allocation2 + $0x111] sm:$0xff] %vm240_vm0, %v307_v17 }
 0x1a7   : > { %2229 = vst [vmem:[#allocation3 + $0x39] sm:$0xff] %v2196_v61 }
 0x1a8   : > { %1129 = vrot.lane.b32.xlu0 %v4792_v35, %s4124_s26 }
 0x1a9   : > { %1257 = vrot.lane.b32.xlu1 %v4774_v31, %s4127_s7 }
 0x1aa   : > { %v864_v36 = vpop.permute.xlu0 %863  ;;  %1639 = vrot.lane.b32.xlu2 %v4834_v1, %s4126_s6 }
 0x1ab   : > { %v992_v7 = vpop.permute.xlu1 %991  ;;  %v1750_v3 = vsel %vm1739_vm4, %v1717_v55, %v864_v36 }
 0x1ac   : > { %v1504_v2 = vpop.permute.xlu2 %1503  ;;  %v1783_v26 = vsel %vm1772_vm5, %v1750_v3, %v992_v7 }
 0x1ad   : > { %v1816_v20 = vsel %vm1805_vm6, %v1783_v26, %v1120_v60 }
 0x1ae   : > { %v4848_v8 = vld [vmem:[#allocation3 + $0x38] sm:$0xff] }
 0x1af   : > { %2726 = vmatmul.f32.gmra.mxu1 %v4848_v8 }
 0x1b0   : > { %1513 = vrot.lane.b32.xlu0 %v4845_v5, %s4125_s30 }
 0x1b1   : > { %1641 = vrot.lane.b32.xlu1 %v4850_v10, %s4126_s6 }
 0x1b2   : > { %v1248_v62 = vpop.permute.xlu0 %1247  ;;  %1001 = vrot.lane.b32.xlu2 %v4762_v6, %s4123_s25 }
 0x1b3   : > { %v1376_v47 = vpop.permute.xlu1 %1375  ;;  %v1849_v0 = vsel %vm1838_vm7, %v1816_v20, %v1248_v62  ;;  %v4931_v20 = vld [vmem:[#allocation2 + $0xf8] sm:$0xff] }
 0x1b4   : > { %v866_v13 = vpop.permute.xlu2 %865  ;;  %v1882_v16 = vsel %vm1871_vm8, %v1849_v0, %v1376_v47 }
 0x1b5   : > { %v1915_v22 = vsel %vm1904_vm9, %v1882_v16, %v1504_v2 }
 0x1b8   : > { %875 = vrot.lane.b32.xlu0 %v4735_v51, %s4122_s13 }
 0x1b9   : > { %v2109_v24 = vpop.f32.mrf.mxu0  ;;  %1003 = vrot.lane.b32.xlu1 %v4802_v40, %s4123_s25 }
 0x1ba   : > { %v1632_v23 = vpop.permute.xlu0 %1631  ;;  %v2110_v25 = vadd.f32 %v4708_v32, %v2109_v24  ;;  %1385 = vrot.lane.b32.xlu2 %v4862_v21, %s4128_s8 }
 0x1bb   : > { %v1948_v18 = vsel %vm1937_vm10, %v1915_v22, %v1632_v23  ;;  %v738_v27 = vpop.permute.xlu1 %737  ;;  %v4943_v23 = vld [vmem:[#allocation2 + $0xf9] sm:$0xff] }
 0x1bc   : > { %v2197_v33 = vmax.f32 %v2110_v25, 0.0  ;;  %3886 = vmatmul.msk.f32.gmra.mxu0 %vm1979_vm11, %v1948_v18  ;;  %v1250_v38 = vpop.permute.xlu2 %1249  ;;  %v1718_v51 = vsel %vm240_vm0, %v4550_v29, %v738_v27  ;;  %v4888_v29 = vld [vmem:[#allocation2 + $0xf2] sm:$0xff]  ;;  %v4946_v18 = vld [vmem:[#allocation2 + $0x108] sm:$0xff] }
 0x1bd   : > { %v1751_v11 = vsel %vm1739_vm4, %v1718_v51, %v866_v13 }
 0x1be   : > { %2230 = vst [vmem:[#allocation3 + $0x49] sm:$0xff] %v2197_v33 }
 0x1c0   : > { %1259 = vrot.lane.b32.xlu0 %v4834_v1, %s4127_s7 }
 0x1c1   : > { %1387 = vrot.lane.b32.xlu1 %v4876_v34, %s4128_s8 }
 0x1c2   : > { %v994_v37 = vpop.permute.xlu0 %993  ;;  %747 = vrot.lane.b32.xlu2 %v4732_v43, %s4121_s12 }
 0x1c3   : > { %v1122_v4 = vpop.permute.xlu1 %1121  ;;  %v1784_v39 = vsel %vm1772_vm5, %v1751_v11, %v994_v37  ;;  %v4957_v11 = vld [vmem:[#allocation2 + $0x109] sm:$0xff] }
 0x1c4   : > { %v1634_v41 = vpop.permute.xlu2 %1633  ;;  %v1817_v48 = vsel %vm1805_vm6, %v1784_v39, %v1122_v4  ;;  %v4962_v39 = vld [vmem:[#allocation2 + $0x10a] sm:$0xff] }
 0x1c5   : > { %v4886_v44 = vld [vmem:[#allocation3 + $0x48] sm:$0xff]  ;;  %v1850_v43 = vsel %vm1838_vm7, %v1817_v48, %v1250_v38 }
 0x1c6   : > { %2729 = vmatmul.f32.gmra.mxu1 %v4886_v44 }
 0x1c8   : > { %1643 = vrot.lane.b32.xlu0 %v4888_v29, %s4126_s6 }
 0x1c9   : > { %749 = vrot.lane.b32.xlu1 %v4792_v35, %s4121_s12  ;;  %v4907_v35 = vld [vmem:[#allocation2 + $0xf1] sm:$0xff] }
 0x1ca   : > { %v1378_v46 = vpop.permute.xlu0 %1377  ;;  %1131 = vrot.lane.b32.xlu2 %v4805_v50, %s4124_s26 }
 0x1cb   : > { %v1883_v49 = vsel %vm1871_vm8, %v1850_v43, %v1378_v46  ;;  %v1506_v9 = vpop.permute.xlu1 %1505  ;;  %v2112_v52 = vpop.f32.mrf.mxu0 }
 0x1cc   : > { %v1916_v30 = vsel %vm1904_vm9, %v1883_v49, %v1506_v9  ;;  %v2113_v56 = vadd.f32 %v4708_v32, %v2112_v52  ;;  %v996_v63 = vpop.permute.xlu2 %995  ;;  %v4976_v9 = vld [vmem:[#allocation2 + $0xfa] sm:$0xff] }
 0x1cd   : > { %v1949_v57 = vsel %vm1937_vm10, %v1916_v30, %v1634_v41 }
 0x1ce   : > { %v2198_v14 = vmax.f32 %v2113_v56, 0.0  ;;  %3887 = vmatmul.msk.f32.gmra.mxu0 %vm1979_vm11, %v1949_v57 }
 0x1d0   : > { %751 = vrot.lane.b32.xlu0 %v4805_v50, %s4121_s12  ;;  %2231 = vst [vmem:[#allocation3 + $0x51] sm:$0xff] %v2198_v14 }
 0x1d1   : > { %1005 = vrot.lane.b32.xlu1 %v4862_v21, %s4123_s25 }
 0x1d2   : > { %v740_v58 = vpop.permute.xlu0 %739  ;;  %1515 = vrot.lane.b32.xlu2 %v4907_v35, %s4125_s30 }
 0x1d3   : > { %v1719_v60 = vsel %vm240_vm0, %v4586_v53, %v740_v58  ;;  %v868_v19 = vpop.permute.xlu1 %867 }
 0x1d4   : > { %v1380_v61 = vpop.permute.xlu2 %1379  ;;  %v1752_v55 = vsel %vm1739_vm4, %v1719_v60, %v868_v19  ;;  %v4990_v60 = vld [vmem:[#allocation2 + $0x110] sm:$0xff] }
 0x1d5   : > { %v1785_v50 = vsel %vm1772_vm5, %v1752_v55, %v996_v63 }
 0x1d7   : > { %v4919_v36 = vld [vmem:[#allocation3 + $0x50] sm:$0xff] }
 0x1d8   : > { %1133 = vrot.lane.b32.xlu0 %v4845_v5, %s4124_s26  ;;  %2732 = vmatmul.f32.gmra.mxu1 %v4919_v36 }
 0x1d9   : > { %1007 = vrot.lane.b32.xlu1 %v4876_v34, %s4123_s25 }
 0x1da   : > { %v1124_v7 = vpop.permute.xlu0 %1123  ;;  %877 = vrot.lane.b32.xlu2 %v4774_v31, %s4122_s13 }
 0x1db   : > { %v1252_v53 = vpop.permute.xlu1 %1251  ;;  %v1818_v2 = vsel %vm1805_vm6, %v1785_v50, %v1124_v7 }
 0x1dc   : > { %v742_v3 = vpop.permute.xlu2 %741  ;;  %v1851_v26 = vsel %vm1838_vm7, %v1818_v2, %v1252_v53  ;;  %v5003_v2 = vld [vmem:[#allocation2 + $0x112] sm:$0xff] }
 0x1dd   : > { %v1884_v62 = vsel %vm1871_vm8, %v1851_v26, %v1380_v61  ;;  %v309_v26 = vld [vmem:[%s4267_s23 + $0xb8] sm:$0xff] }
 0x1de   : > { %342 = vst.msk [vmem:[#allocation2 + $0x129] sm:$0xff] %vm240_vm0, %v309_v26  ;;  %v2606_v26 = vld [vmem:[#allocation4 + $0x1d8] sm:$0xff] }
 0x1e0   : > { %1135 = vrot.lane.b32.xlu0 %v4907_v35, %s4124_s26 }
 0x1e1   : > { %1389 = vrot.lane.b32.xlu1 %v4931_v20, %s4128_s8 }
 0x1e2   : > { %v1508_v47 = vpop.permute.xlu0 %1507  ;;  %v2115_v0 = vpop.f32.mrf.mxu0  ;;  %879 = vrot.lane.b32.xlu2 %v4834_v1, %s4122_s13  ;;  %v1720_v1 = vsel %vm240_vm0, %v4639_v28, %v742_v3  ;;  %v308_v28 = vld [vmem:[%s4267_s23 + $0xb0] sm:$0xff] }
 0x1e3   : > { %v1917_v31 = vsel %vm1904_vm9, %v1884_v62, %v1508_v47  ;;  %v2116_v13 = vadd.f32 %v4708_v32, %v2115_v0  ;;  %v1636_v16 = vpop.permute.xlu1 %1635  ;;  %341 = vst.msk [vmem:[#allocation2 + $0x121] sm:$0xff] %vm240_vm0, %v308_v28 }
 0x1e4   : > { %v1126_v22 = vpop.permute.xlu2 %1125  ;;  %v1950_v24 = vsel %vm1937_vm10, %v1917_v31, %v1636_v16 }
 0x1e5   : > { %v2199_v25 = vmax.f32 %v2116_v13, 0.0  ;;  %3888 = vmatmul.msk.f32.gmra.mxu0 %vm1979_vm11, %v1950_v24 }
 0x1e7   : > { %2232 = vst [vmem:[#allocation3 + $0x61] sm:$0xff] %v2199_v25 }
 0x1e8   : > { %1517 = vrot.lane.b32.xlu0 %v4943_v23, %s4125_s30 }
 0x1e9   : > { %1391 = vrot.lane.b32.xlu1 %v4946_v18, %s4128_s8 }
 0x1ea   : > { %v870_v27 = vpop.permute.xlu0 %869  ;;  %1261 = vrot.lane.b32.xlu2 %v4850_v10, %s4127_s7 }
 0x1eb   : > { %v998_v33 = vpop.permute.xlu1 %997  ;;  %v1753_v51 = vsel %vm1739_vm4, %v1720_v1, %v870_v27 }
 0x1ec   : > { %v1510_v38 = vpop.permute.xlu2 %1509  ;;  %v1786_v37 = vsel %vm1772_vm5, %v1753_v51, %v998_v33 }
 0x1ed   : > { %v1819_v41 = vsel %vm1805_vm6, %v1786_v37, %v1126_v22  ;;  %v5033_v37 = vld [vmem:[#allocation2 + $0x121] sm:$0xff] }
 0x1ee   : > { %v4960_v4 = vld [vmem:[#allocation3 + $0x60] sm:$0xff] }
 0x1ef   : > { %2735 = vmatmul.f32.gmra.mxu1 %v4960_v4 }
 0x1f0   : > { %1519 = vrot.lane.b32.xlu0 %v4957_v11, %s4125_s30 }
 0x1f1   : > { %1647 = vrot.lane.b32.xlu1 %v4962_v39, %s4126_s6 }
 0x1f2   : > { %v1254_v48 = vpop.permute.xlu0 %1253  ;;  %1263 = vrot.lane.b32.xlu2 %v4888_v29, %s4127_s7 }
 0x1f3   : > { %v1382_v45 = vpop.permute.xlu1 %1381  ;;  %v1852_v43 = vsel %vm1838_vm7, %v1819_v41, %v1254_v48 }
 0x1f4   : > { %v872_v46 = vpop.permute.xlu2 %871  ;;  %v1885_v49 = vsel %vm1871_vm8, %v1852_v43, %v1382_v45 }
 0x1f5   : > { %v1918_v52 = vsel %vm1904_vm9, %v1885_v49, %v1510_v38  ;;  %v5030_v38 = vld [vmem:[#allocation2 + $0x120] sm:$0xff] }
 0x1f6   : > { %v310_v49 = vld [vmem:[%s4267_s23 + $0xc0] sm:$0xff] }
 0x1f7   : > { %343 = vst.msk [vmem:[#allocation2 + $0x139] sm:$0xff] %vm240_vm0, %v310_v49 }
 0x1f8   : > { %881 = vrot.lane.b32.xlu0 %v4850_v10, %s4122_s13 }
 0x1f9   : > { %v2118_v30 = vpop.f32.mrf.mxu0  ;;  %1009 = vrot.lane.b32.xlu1 %v4931_v20, %s4123_s25 }
 0x1fa   : > { %v1638_v56 = vpop.permute.xlu0 %1637  ;;  %v2119_v63 = vadd.f32 %v4708_v32, %v2118_v30  ;;  %1645 = vrot.lane.b32.xlu2 %v4976_v9, %s4126_s6  ;;  %v311_v30 = vld [vmem:[%s4267_s23 + $0xc8] sm:$0xff] }
 0x1fb   : > { %v1951_v57 = vsel %vm1937_vm10, %v1918_v52, %v1638_v56  ;;  %v744_v14 = vpop.permute.xlu1 %743  ;;  %344 = vst.msk [vmem:[#allocation2 + $0x141] sm:$0xff] %vm240_vm0, %v311_v30 }
 0x1fc   : > { %v2200_v17 = vmax.f32 %v2119_v63, 0.0  ;;  %3889 = vmatmul.msk.f32.gmra.mxu0 %vm1979_vm11, %v1951_v57  ;;  %v1256_v58 = vpop.permute.xlu2 %1255  ;;  %v1721_v10 = vsel %vm240_vm0, %v4652_v54, %v744_v14 }
 0x1fd   : > { %v1754_v19 = vsel %vm1739_vm4, %v1721_v10, %v872_v46 }
 0x1fe   : > { %2233 = vst [vmem:[#allocation3 + $0x69] sm:$0xff] %v2200_v17 }
 0x200   : > { %1265 = vrot.lane.b32.xlu0 %v4976_v9, %s4127_s7 }
 0x201   : > { %1393 = vrot.lane.b32.xlu1 %v4990_v60, %s4128_s8 }
 0x202   : > { %v1000_v61 = vpop.permute.xlu0 %999  ;;  %753 = vrot.lane.b32.xlu2 %v4845_v5, %s4121_s12 }
 0x203   : > { %v1128_v55 = vpop.permute.xlu1 %1127  ;;  %v1787_v50 = vsel %vm1772_vm5, %v1754_v19, %v1000_v61  ;;  %v5067_v19 = vld [vmem:[#allocation2 + $0x122] sm:$0xff] }
 0x204   : > { %v1640_v7 = vpop.permute.xlu2 %1639  ;;  %v1820_v53 = vsel %vm1805_vm6, %v1787_v50, %v1128_v55  ;;  %v2608_v61 = vld [vmem:[#allocation4 + $0x1e8] sm:$0xff] }
 0x205   : > { %v5000_v54 = vld [vmem:[#allocation3 + $0x68] sm:$0xff]  ;;  %v1853_v3 = vsel %vm1838_vm7, %v1820_v53, %v1256_v58  ;;  %v2607_v53 = vld [vmem:[#allocation4 + $0x1e0] sm:$0xff] }
 0x206   : > { %2738 = vmatmul.f32.gmra.mxu1 %v5000_v54  ;;  %v2610_v58 = vld [vmem:[#allocation4 + $0x1f8] sm:$0xff] }
 0x207   : > { %3034 = vmatpush.msrb.mxu0 %v2610_v58 }
 0x208   : > { %1649 = vrot.lane.b32.xlu0 %v5003_v2, %s4126_s6 }
 0x209   : > { %755 = vrot.lane.b32.xlu1 %v4907_v35, %s4121_s12  ;;  %v5020_v35 = vld [vmem:[#allocation2 + $0x111] sm:$0xff] }
 0x20a   : > { %v1384_v5 = vpop.permute.xlu0 %1383  ;;  %1137 = vrot.lane.b32.xlu2 %v4943_v23, %s4124_s26 }
 0x20b   : > { %v1886_v62 = vsel %vm1871_vm8, %v1853_v3, %v1384_v5  ;;  %v1512_v47 = vpop.permute.xlu1 %1511  ;;  %v2121_v0 = vpop.f32.mrf.mxu0 }
 0x20c   : > { %v1919_v31 = vsel %vm1904_vm9, %v1886_v62, %v1512_v47  ;;  %v2122_v13 = vadd.f32 %v4708_v32, %v2121_v0  ;;  %v1002_v16 = vpop.permute.xlu2 %1001  ;;  %v5078_v62 = vld [vmem:[#allocation2 + $0x129] sm:$0xff] }
 0x20d   : > { %v1952_v22 = vsel %vm1937_vm10, %v1919_v31, %v1640_v7  ;;  %v2605_v47 = vld [vmem:[#allocation4 + $0x1d0] sm:$0xff] }
 0x20e   : > { %v2201_v24 = vmax.f32 %v2122_v13, 0.0  ;;  %3890 = vmatmul.msk.f32.gmra.mxu0 %vm1979_vm11, %v1952_v22  ;;  %v2604_v13 = vld [vmem:[#allocation4 + $0x1c8] sm:$0xff] }
 0x210   : > { %1011 = vrot.lane.b32.xlu0 %v4946_v18, %s4123_s25  ;;  %2234 = vst [vmem:[#allocation3 + $0x79] sm:$0xff] %v2201_v24 }
 0x211   : > { %1139 = vrot.lane.b32.xlu1 %v4957_v11, %s4124_s26 }
 0x212   : > { %v746_v25 = vpop.permute.xlu0 %745  ;;  %1521 = vrot.lane.b32.xlu2 %v5020_v35, %s4125_s30 }
 0x213   : > { %v1722_v1 = vsel %vm240_vm0, %v4691_v15, %v746_v25  ;;  %v874_v27 = vpop.permute.xlu1 %873  ;;  %v2603_v25 = vld [vmem:[#allocation4 + $0x1c0] sm:$0xff] }
 0x214   : > { %v1386_v33 = vpop.permute.xlu2 %1385  ;;  %v1755_v51 = vsel %vm1739_vm4, %v1722_v1, %v874_v27 }
 0x215   : > { %v1788_v41 = vsel %vm1772_vm5, %v1755_v51, %v1002_v16 }
 0x217   : > { %v5035_v28 = vld [vmem:[#allocation3 + $0x78] sm:$0xff] }
 0x218   : > { %1395 = vrot.lane.b32.xlu0 %v5030_v38, %s4128_s8  ;;  %2741 = vmatmul.f32.gmra.mxu1 %v5035_v28 }
 0x219   : > { %1523 = vrot.lane.b32.xlu1 %v5033_v37, %s4125_s30 }
 0x21a   : > { %v1130_v15 = vpop.permute.xlu0 %1129  ;;  %883 = vrot.lane.b32.xlu2 %v4888_v29, %s4122_s13 }
 0x21b   : > { %v1258_v48 = vpop.permute.xlu1 %1257  ;;  %v1821_v45 = vsel %vm1805_vm6, %v1788_v41, %v1130_v15  ;;  %v2601_v41 = vld [vmem:[#allocation4 + $0x1b0] sm:$0xff]  ;;  %v5095_v15 = vld [vmem:[#allocation2 + $0x128] sm:$0xff] }
 0x21c   : > { %v748_v43 = vpop.permute.xlu2 %747  ;;  %v1854_v46 = vsel %vm1838_vm7, %v1821_v45, %v1258_v48  ;;  %v2600_v45 = vld [vmem:[#allocation4 + $0x1a8] sm:$0xff] }
 0x21d   : > { %v1887_v52 = vsel %vm1871_vm8, %v1854_v46, %v1386_v33  ;;  %v1723_v55 = vsel %vm240_vm0, %v4748_v59, %v748_v43  ;;  %v5083_v59 = vld [vmem:[#allocation2 + $0x12a] sm:$0xff]  ;;  %v2602_v33 = vld [vmem:[#allocation4 + $0x1b8] sm:$0xff] }
 0x220   : > { %757 = vrot.lane.b32.xlu0 %v4943_v23, %s4121_s12 }
 0x221   : > { %885 = vrot.lane.b32.xlu1 %v4976_v9, %s4122_s13  ;;  %v2609_v9 = vld [vmem:[#allocation4 + $0x1f0] sm:$0xff] }
 0x222   : > { %v1514_v29 = vpop.permute.xlu0 %1513  ;;  %v2124_v56 = vpop.f32.mrf.mxu0  ;;  %1267 = vrot.lane.b32.xlu2 %v4962_v39, %s4127_s7  ;;  %3035 = vmatpush.msrb.mxu0 %v2609_v9 }
 0x223   : > { %v1920_v63 = vsel %vm1904_vm9, %v1887_v52, %v1514_v29  ;;  %v5060_v57 = vadd.f32 %v4708_v32, %v2124_v56  ;;  %v1642_v14 = vpop.permute.xlu1 %1641 }
 0x224   : > { %v1132_v23 = vpop.permute.xlu2 %1131  ;;  %v1953_v17 = vsel %vm1937_vm10, %v1920_v63, %v1642_v14  ;;  %3036 = vmatpush.msrb.mxu0 %v2608_v61  ;;  %v2598_v63 = vld [vmem:[#allocation4 + $0x198] sm:$0xff]  ;;  %v2595_v61 = vld [vmem:[#allocation4 + $0x180] sm:$0xff] }
 0x225   : > { %v2202_v10 = vmax.f32 %v5060_v57, 0.0  ;;  %3891 = vmatmul.msk.f32.gmra.mxu0 %vm1979_vm11, %v1953_v17  ;;  %v5112_v14 = vld [vmem:[#allocation2 + $0x138] sm:$0xff]  ;;  %v2596_v17 = vld [vmem:[#allocation4 + $0x188] sm:$0xff] }
 0x226   : > { %3037 = vmatpush.msrb.mxu0 %v2607_v53  ;;  %v312_v53 = vld [vmem:[%s4267_s23 + $0xd0] sm:$0xff] }
 0x227   : > { %2235 = vst [vmem:[#allocation3 + $0x81] sm:$0xff] %v2202_v10 }
 0x228   : > { %1141 = vrot.lane.b32.xlu0 %v5020_v35, %s4124_s26  ;;  %3038 = vmatpush.msrb.mxu0 %v2606_v26  ;;  %345 = vst.msk [vmem:[#allocation2 + $0x151] sm:$0xff] %vm240_vm0, %v312_v53 }
 0x229   : > { %1269 = vrot.lane.b32.xlu1 %v5003_v2, %s4127_s7 }
 0x22a   : > { %v876_v50 = vpop.permute.xlu0 %875  ;;  %1651 = vrot.lane.b32.xlu2 %v5067_v19, %s4126_s6  ;;  %3039 = vmatpush.msrb.mxu0 %v2605_v47 }
 0x22b   : > { %v1004_v7 = vpop.permute.xlu1 %1003  ;;  %v1756_v5 = vsel %vm1739_vm4, %v1723_v55, %v876_v50 }
 0x22c   : > { %v1516_v3 = vpop.permute.xlu2 %1515  ;;  %v1789_v0 = vsel %vm1772_vm5, %v1756_v5, %v1004_v7  ;;  %3040 = vmatpush.msrb.mxu0 %v2604_v13  ;;  %v5122_v7 = vld [vmem:[#allocation2 + $0x13a] sm:$0xff] }
 0x22d   : > { %v1822_v16 = vsel %vm1805_vm6, %v1789_v0, %v1132_v23  ;;  %v2597_v23 = vld [vmem:[#allocation4 + $0x190] sm:$0xff]  ;;  %v2626_v13 = vld [vmem:[#allocation4 + $0x278] sm:$0xff] }
 0x22e   : > { %v5081_v31 = vld [vmem:[#allocation3 + $0x80] sm:$0xff]  ;;  %3041 = vmatpush.msrb.mxu0 %v2603_v25  ;;  %3147 = vmatpush.msrb.mxu1 %v2626_v13 }
 0x22f   : > { %2744 = vmatmul.f32.gmra.mxu1 %v5081_v31  ;;  %v2625_v25 = vld [vmem:[#allocation4 + $0x270] sm:$0xff] }
 0x230   : > { %1525 = vrot.lane.b32.xlu0 %v5078_v62, %s4125_s30  ;;  %3042 = vmatpush.msrb.mxu0 %v2602_v33  ;;  %v2617_v13 = vld [vmem:[#allocation4 + $0x230] sm:$0xff] }
 0x231   : > { %1653 = vrot.lane.b32.xlu1 %v5083_v59, %s4126_s6  ;;  %3148 = vmatpush.msrb.mxu1 %v2625_v25 }
 0x232   : > { %v1260_v22 = vpop.permute.xlu0 %1259  ;;  %1013 = vrot.lane.b32.xlu2 %v4990_v60, %s4123_s25  ;;  %3043 = vmatpush.msrb.mxu0 %v2601_v41 }
 0x233   : > { %v1388_v24 = vpop.permute.xlu1 %1387  ;;  %v1855_v1 = vsel %vm1838_vm7, %v1822_v16, %v1260_v22  ;;  %v5140_v22 = vld [vmem:[#allocation2 + $0x139] sm:$0xff] }
 0x234   : > { %v878_v27 = vpop.permute.xlu2 %877  ;;  %v1888_v51 = vsel %vm1871_vm8, %v1855_v1, %v1388_v24  ;;  %3044 = vmatpush.msrb.mxu0 %v2600_v45  ;;  %v5156_v45 = vld [vmem:[#allocation2 + $0x140] sm:$0xff] }
 0x235   : > { %v1921_v48 = vsel %vm1904_vm9, %v1888_v51, %v1516_v3  ;;  %v2624_v51 = vld [vmem:[#allocation4 + $0x268] sm:$0xff] }
 0x236   : > { %3149 = vmatpush.msrb.mxu1 %v2624_v51 }
 0x238   : > { %887 = vrot.lane.b32.xlu0 %v4962_v39, %s4122_s13  ;;  %v2599_v39 = vld [vmem:[#allocation4 + $0x1a0] sm:$0xff] }
 0x239   : > { %v2127_v43 = vpop.f32.mrf.mxu0  ;;  %1015 = vrot.lane.b32.xlu1 %v5030_v38, %s4123_s25  ;;  %3045 = vmatpush.msrb.mxu0 %v2599_v39 }
 0x23a   : > { %v1644_v46 = vpop.permute.xlu0 %1643  ;;  %v5103_v49 = vadd.f32 %v4708_v32, %v2127_v43  ;;  %1397 = vrot.lane.b32.xlu2 %v5095_v15, %s4128_s8  ;;  %v2623_v43 = vld [vmem:[#allocation4 + $0x260] sm:$0xff] }
 0x23b   : > { %v1954_v52 = vsel %vm1937_vm10, %v1921_v48, %v1644_v46  ;;  %v750_v30 = vpop.permute.xlu1 %749  ;;  %3046 = vmatpush.msrb.mxu0 %v2598_v63  ;;  %v5158_v46 = vld [vmem:[#allocation2 + $0x141] sm:$0xff]  ;;  %3150 = vmatpush.msrb.mxu1 %v2623_v43 }
 0x23c   : > { %v2203_v29 = vmax.f32 %v5103_v49, 0.0  ;;  %3892 = vmatmul.msk.f32.gmra.mxu0 %vm1979_vm11, %v1954_v52  ;;  %v880_v56 = vpop.permute.xlu2 %879  ;;  %v1724_v0 = vsel %vm240_vm0, %v4762_v6, %v750_v30  ;;  %v2622_v52 = vld [vmem:[#allocation4 + $0x258] sm:$0xff] }
 0x23d   : > { %3047 = vmatpush.msrb.mxu0 %v2597_v23  ;;  %v1757_v24 = vsel %vm1739_vm4, %v1724_v0, %v878_v27  ;;  %3151 = vmatpush.msrb.mxu1 %v2622_v52 }
 0x23e   : > { %2236 = vst [vmem:[#allocation3 + $0x91] sm:$0xff] %v2203_v29 }
 0x23f   : > { %3048 = vmatpush.msrb.mxu0 %v2596_v17 }
 0x240   : > { %1271 = vrot.lane.b32.xlu0 %v5067_v19, %s4127_s7 }
 0x241   : > { %1399 = vrot.lane.b32.xlu1 %v5112_v14, %s4128_s8  ;;  %3049 = vmatpush.msrb.mxu0 %v2595_v61  ;;  %v2620_v61 = vld [vmem:[#allocation4 + $0x248] sm:$0xff] }
 0x242   : > { %v752_v58 = vpop.permute.xlu0 %751  ;;  %759 = vrot.lane.b32.xlu2 %v4957_v11, %s4121_s12 }
 0x243   : > { %v1006_v9 = vpop.permute.xlu1 %1005  ;;  %v1725_v48 = vsel %vm240_vm0, %v4802_v40, %v752_v58  ;;  %v2621_v40 = vld [vmem:[#allocation4 + $0x250] sm:$0xff] }
 0x244   : > { %v1262_v55 = vpop.permute.xlu2 %1261  ;;  %v1790_v6 = vsel %vm1772_vm5, %v1757_v24, %v1006_v9  ;;  %v1758_v63 = vsel %vm1739_vm4, %v1725_v48, %v880_v56  ;;  %3152 = vmatpush.msrb.mxu1 %v2621_v40  ;;  %v2613_v48 = vld [vmem:[#allocation4 + $0x210] sm:$0xff] }
 0x245   : > { %v5120_v50 = vld [vmem:[#allocation3 + $0x90] sm:$0xff] }
 0x246   : > { %2747 = vmatmul.f32.gmra.mxu1 %v5120_v50 }
 0x247   : > { %3153 = vmatpush.msrb.mxu1 %v2620_v61  ;;  %v314_v61 = vld [vmem:[%s4267_s23 + $0xe0] sm:$0xff] }
 0x248   : > { %1655 = vrot.lane.b32.xlu0 %v5122_v7, %s4126_s6  ;;  %347 = vst.msk [vmem:[#allocation2 + $0x169] sm:$0xff] %vm240_vm0, %v314_v61 }
 0x249   : > { %761 = vrot.lane.b32.xlu1 %v5020_v35, %s4121_s12  ;;  %v313_v35 = vld [vmem:[%s4267_s23 + $0xd8] sm:$0xff] }
 0x24a   : > { %v1134_v11 = vpop.permute.xlu0 %1133  ;;  %1143 = vrot.lane.b32.xlu2 %v5033_v37, %s4124_s26  ;;  %346 = vst.msk [vmem:[#allocation2 + $0x159] sm:$0xff] %vm240_vm0, %v313_v35 }
 0x24b   : > { %v1008_v3 = vpop.permute.xlu1 %1007  ;;  %v2130_v26 = vpop.f32.mrf.mxu0  ;;  %v1823_v27 = vsel %vm1805_vm6, %v1790_v6, %v1134_v11 }
 0x24c   : > { %v5134_v5 = vadd.f32 %v4708_v32, %v2130_v26  ;;  %v1264_v47 = vpop.permute.xlu2 %1263  ;;  %v1856_v30 = vsel %vm1838_vm7, %v1823_v27, %v1262_v55  ;;  %v1791_v17 = vsel %vm1772_vm5, %v1758_v63, %v1008_v3  ;;  %v2619_v3 = vld [vmem:[#allocation4 + $0x240] sm:$0xff]  ;;  %v2618_v26 = vld [vmem:[#allocation4 + $0x238] sm:$0xff]  ;;  %v2612_v63 = vld [vmem:[#allocation4 + $0x208] sm:$0xff] }
 0x24d   : > { %3154 = vmatpush.msrb.mxu1 %v2619_v3  ;;  %v2615_v27 = vld [vmem:[#allocation4 + $0x220] sm:$0xff] }
 0x24e   : > { %v2204_v16 = vmax.f32 %v5134_v5, 0.0 }
 0x24f   : > { %3155 = vmatpush.msrb.mxu1 %v2618_v26 }
 0x250   : > { %1017 = vrot.lane.b32.xlu0 %v5095_v15, %s4123_s25  ;;  %2237 = vst [vmem:[#allocation3 + $0x99] sm:$0xff] %v2204_v16 }
 0x251   : > { %1145 = vrot.lane.b32.xlu1 %v5078_v62, %s4124_s26  ;;  %3156 = vmatpush.msrb.mxu1 %v2617_v13 }
 0x252   : > { %v1136_v1 = vpop.permute.xlu0 %1135  ;;  %1527 = vrot.lane.b32.xlu2 %v5140_v22, %s4125_s30 }
 0x253   : > { %v1390_v33 = vpop.permute.xlu1 %1389  ;;  %v1824_v55 = vsel %vm1805_vm6, %v1791_v17, %v1136_v1  ;;  %v2616_v1 = vld [vmem:[#allocation4 + $0x228] sm:$0xff]  ;;  %v5206_v17 = vld [vmem:[#allocation2 + $0x151] sm:$0xff] }
 0x254   : > { %v1646_v41 = vpop.permute.xlu2 %1645  ;;  %v1889_v23 = vsel %vm1871_vm8, %v1856_v30, %v1390_v33  ;;  %v1857_v0 = vsel %vm1838_vm7, %v1824_v55, %v1264_v47  ;;  %v2354_v33 = vld [vmem:[#allocation3 + $0x18] sm:$0xff]  ;;  %3157 = vmatpush.msrb.mxu1 %v2616_v1  ;;  %v5251_v1 = vld [vmem:[#allocation2 + $0x158] sm:$0xff] }
 0x256   : > { %3158 = vmatpush.msrb.mxu1 %v2615_v27 }
 0x257   : > { %v5161_v39 = vld [vmem:[#allocation3 + $0x98] sm:$0xff] }
 0x258   : > { %1401 = vrot.lane.b32.xlu0 %v5156_v45, %s4128_s8  ;;  %2750 = vmatmul.f32.gmra.mxu1 %v5161_v39 }
 0x259   : > { %1529 = vrot.lane.b32.xlu1 %v5158_v46, %s4125_s30 }
 0x25a   : > { %v1518_v58 = vpop.permute.xlu0 %1517  ;;  %889 = vrot.lane.b32.xlu2 %v5003_v2, %s4122_s13 }
 0x25b   : > { %v1922_v56 = vsel %vm1904_vm9, %v1889_v23, %v1518_v58  ;;  %v1392_v9 = vpop.permute.xlu1 %1391  ;;  %v2611_v58 = vld [vmem:[#allocation4 + $0x200] sm:$0xff] }
 0x25c   : > { %v1955_v53 = vsel %vm1937_vm10, %v1922_v56, %v1646_v41  ;;  %v754_v11 = vpop.permute.xlu2 %753  ;;  %v1890_v2 = vsel %vm1871_vm8, %v1857_v0, %v1392_v9  ;;  %v5194_v41 = vld [vmem:[#allocation2 + $0x142] sm:$0xff]  ;;  %v5211_v9 = vld [vmem:[#allocation2 + $0x152] sm:$0xff] }
 0x25d   : > { %3893 = vmatmul.msk.f32.gmra.mxu0 %vm1979_vm11, %v1955_v53  ;;  %v1726_v43 = vsel %vm240_vm0, %v4862_v21, %v754_v11  ;;  %v5226_v0 = vld [vmem:[#allocation2 + $0x150] sm:$0xff] }
 0x260   : > { %763 = vrot.lane.b32.xlu0 %v5033_v37, %s4121_s12 }
 0x261   : > { %891 = vrot.lane.b32.xlu1 %v5067_v19, %s4122_s13 }
 0x262   : > { %v1520_v35 = vpop.permute.xlu0 %1519  ;;  %v2133_v24 = vpop.f32.mrf.mxu0  ;;  %1273 = vrot.lane.b32.xlu2 %v5083_v59, %s4127_s7 }
 0x263   : > { %v1923_v25 = vsel %vm1904_vm9, %v1890_v2, %v1520_v35  ;;  %v5187_v47 = vadd.f32 %v4708_v32, %v2133_v24  ;;  %v1648_v6 = vpop.permute.xlu1 %1647  ;;  %v2614_v32 = vld [vmem:[#allocation4 + $0x218] sm:$0xff] }
 0x264   : > { %v1956_v37 = vsel %vm1937_vm10, %v1923_v25, %v1648_v6  ;;  %v1138_v51 = vpop.permute.xlu2 %1137  ;;  %3159 = vmatpush.msrb.mxu1 %v2614_v32 }
 0x265   : > { %3050 = vmatmul.f32.vlgmr.msrb.gmra.mxu0 %v2354_v33  ;;  %v2205_v19 = vmax.f32 %v5187_v47, 0.0  ;;  %3894 = vmatmul.msk.f32.vlgmr.msra.gmra.mxu3 %vm1979_vm11, %v1956_v37 }
 0x266   : > { %3160 = vmatpush.msrb.mxu1 %v2613_v48  ;;  %v5265_v48 = vld [vmem:[#allocation2 + $0x15a] sm:$0xff] }
 0x267   : > { %2238 = vst [vmem:[#allocation3 + $0xa9] sm:$0xff] %v2205_v19 }
 0x268   : > { %1147 = vrot.lane.b32.xlu0 %v5140_v22, %s4124_s26  ;;  %3161 = vmatpush.msrb.mxu1 %v2612_v63 }
 0x269   : > { %1275 = vrot.lane.b32.xlu1 %v5122_v7, %s4127_s7 }
 0x26a   : > { %v882_v52 = vpop.permute.xlu0 %881  ;;  %1657 = vrot.lane.b32.xlu2 %v5194_v41, %s4126_s6  ;;  %3162 = vmatpush.msrb.mxu1 %v2611_v58 }
 0x26b   : > { %v1010_v30 = vpop.permute.xlu1 %1009  ;;  %v1759_v40 = vsel %vm1739_vm4, %v1726_v43, %v882_v52 }
 0x26c   : > { %v1522_v23 = vpop.permute.xlu2 %1521  ;;  %v1792_v56 = vsel %vm1772_vm5, %v1759_v40, %v1010_v30 }
 0x26d   : > { %3053 = vmatmul.f32.gmra.mxu0 %v4772_v12  ;;  %v1825_v55 = vsel %vm1805_vm6, %v1792_v56, %v1138_v51  ;;  %v2386_v56 = vld [vmem:[#allocation3 + $0x19] sm:$0xff] }
 0x26e   : > { %v5209_v21 = vld [vmem:[#allocation3 + $0xa8] sm:$0xff] }
 0x26f   : > { %2753 = vmatmul.f32.gmra.mxu1 %v5209_v21 }
 0x270   : > { %1531 = vrot.lane.b32.xlu0 %v5206_v17, %s4125_s30 }
 0x271   : > { %1659 = vrot.lane.b32.xlu1 %v5211_v9, %s4126_s6 }
 0x272   : > { %v1266_v12 = vpop.permute.xlu0 %1265  ;;  %1019 = vrot.lane.b32.xlu2 %v5112_v14, %s4123_s25  ;;  %v5236_v14 = vld [vmem:[%s6524_s2] ss:$0 sm:$0xff] }
 0x273   : > { %v1394_v53 = vpop.permute.xlu1 %1393  ;;  %v1858_v11 = vsel %vm1838_vm7, %v1825_v55, %v1266_v12  ;;  %v5286_v55 = vld [vmem:[#allocation2 + $0x159] sm:$0xff] }
 0x274   : > { %v884_v3 = vpop.permute.xlu2 %883  ;;  %v1891_v26 = vsel %vm1871_vm8, %v1858_v11, %v1394_v53 }
 0x275   : > { %3056 = vmatmul.f32.gmra.mxu0 %v4807_v42  ;;  %v1924_v2 = vsel %vm1904_vm9, %v1891_v26, %v1522_v23  ;;  %v5299_v26 = vld [vmem:[#allocation2 + $0x168] sm:$0xff] }
 0x278   : > { %893 = vrot.lane.b32.xlu0 %v5083_v59, %s4122_s13 }
 0x279   : > { %v2136_v13 = vpop.f32.mrf.mxu0  ;;  %1021 = vrot.lane.b32.xlu1 %v5156_v45, %s4123_s25 }
 0x27a   : > { %v5239_v42 = vadd.f32 %v5236_v14, %v2136_v13  ;;  %v1650_v35 = vpop.permute.xlu0 %1649  ;;  %1403 = vrot.lane.b32.xlu2 %v5226_v0, %s4128_s8  ;;  %v5302_v13 = vld [vmem:[#allocation2 + $0x169] sm:$0xff] }
 0x27b   : > { %v1957_v59 = vsel %vm1937_vm10, %v1924_v2, %v1650_v35  ;;  %v756_v24 = vpop.permute.xlu1 %755 }
 0x27c   : > { %v2206_v25 = vmax.f32 %v5239_v42, 0.0  ;;  %3895 = vmatmul.msk.f32.gmra.mxu3 %vm1979_vm11, %v1957_v59  ;;  %v1268_v45 = vpop.permute.xlu2 %1267  ;;  %v1727_v6 = vsel %vm240_vm0, %v4876_v34, %v756_v24 }
 0x27d   : > { %3059 = vmatmul.f32.gmra.mxu0 %v4848_v8  ;;  %v1760_v33 = vsel %vm1739_vm4, %v1727_v6, %v884_v3  ;;  %v2387_v3 = vld [vmem:[#allocation3 + $0x21] sm:$0xff]  ;;  %v2388_v6 = vld [vmem:[#allocation3 + $0x31] sm:$0xff] }
 0x27e   : > { %2239 = vst [vmem:[#allocation3 + $0xb1] sm:$0xff] %v2206_v25 }
 0x280   : > { %1277 = vrot.lane.b32.xlu0 %v5194_v41, %s4127_s7 }
 0x281   : > { %1405 = vrot.lane.b32.xlu1 %v5251_v1, %s4128_s8 }
 0x282   : > { %v1012_v37 = vpop.permute.xlu0 %1011  ;;  %765 = vrot.lane.b32.xlu2 %v5078_v62, %s4121_s12  ;;  %v315_v62 = vld [vmem:[%s4267_s23 + $0xe8] sm:$0xff] }
 0x283   : > { %v1140_v8 = vpop.permute.xlu1 %1139  ;;  %v1793_v51 = vsel %vm1772_vm5, %v1760_v33, %v1012_v37  ;;  %348 = vst.msk [vmem:[#allocation2 + $0x171] sm:$0xff] %vm240_vm0, %v315_v62  ;;  %v316_v37 = vld [vmem:[%s4267_s23 + $0xf0] sm:$0xff] }
 0x284   : > { %v1652_v27 = vpop.permute.xlu2 %1651  ;;  %v1826_v32 = vsel %vm1805_vm6, %v1793_v51, %v1140_v8  ;;  %349 = vst.msk [vmem:[#allocation2 + $0x181] sm:$0xff] %vm240_vm0, %v316_v37  ;;  %v317_v51 = vld [vmem:[%s4267_s23 + $0xf8] sm:$0xff] }
 0x285   : > { %3062 = vmatmul.f32.gmra.mxu0 %v4886_v44  ;;  %v5262_v34 = vld [vmem:[#allocation3 + $0xb0] sm:$0xff]  ;;  %v1859_v43 = vsel %vm1838_vm7, %v1826_v32, %v1268_v45  ;;  %350 = vst.msk [vmem:[#allocation2 + $0x189] sm:$0xff] %vm240_vm0, %v317_v51  ;;  %v2392_v51 = vld [vmem:[#allocation3 + $0x61] sm:$0xff] }
 0x286   : > { %2756 = vmatmul.f32.gmra.mxu1 %v5262_v34 }
 0x288   : > { %1661 = vrot.lane.b32.xlu0 %v5265_v48, %s4126_s6 }
 0x289   : > { %767 = vrot.lane.b32.xlu1 %v5140_v22, %s4121_s12 }
 0x28a   : > { %v1396_v44 = vpop.permute.xlu0 %1395  ;;  %1149 = vrot.lane.b32.xlu2 %v5158_v46, %s4124_s26 }
 0x28b   : > { %v1892_v52 = vsel %vm1871_vm8, %v1859_v43, %v1396_v44  ;;  %v1524_v30 = vpop.permute.xlu1 %1523  ;;  %v2139_v63 = vpop.f32.mrf.mxu0  ;;  %v2389_v44 = vld [vmem:[#allocation3 + $0x39] sm:$0xff] }
 0x28c   : > { %v1925_v23 = vsel %vm1904_vm9, %v1892_v52, %v1524_v30  ;;  %v5280_v40 = vadd.f32 %v5236_v14, %v2139_v63  ;;  %v1014_v58 = vpop.permute.xlu2 %1013  ;;  %v5338_v52 = vld [vmem:[#allocation2 + $0x16a] sm:$0xff] }
 0x28d   : > { %3065 = vmatmul.f32.gmra.mxu0 %v4919_v36  ;;  %v1958_v22 = vsel %vm1937_vm10, %v1925_v23, %v1652_v27 }
 0x28e   : > { %3163 = vmatmul.f32.vlgmr.msrb.gmra.mxu1 %v2386_v56  ;;  %v2207_v61 = vmax.f32 %v5280_v40, 0.0  ;;  %3896 = vmatmul.msk.f32.gmra.mxu3 %vm1979_vm11, %v1958_v22  ;;  %v2390_v56 = vld [vmem:[#allocation3 + $0x49] sm:$0xff]  ;;  %v5350_v22 = vld [vmem:[#allocation2 + $0x171] sm:$0xff] }
 0x290   : > { %1023 = vrot.lane.b32.xlu0 %v5226_v0, %s4123_s25  ;;  %2240 = vst [vmem:[#allocation3 + $0xc1] sm:$0xff] %v2207_v61 }
 0x291   : > { %1151 = vrot.lane.b32.xlu1 %v5206_v17, %s4124_s26 }
 0x292   : > { %v758_v36 = vpop.permute.xlu0 %757  ;;  %1533 = vrot.lane.b32.xlu2 %v5286_v55, %s4125_s30 }
 0x293   : > { %v1728_v12 = vsel %vm240_vm0, %v4931_v20, %v758_v36  ;;  %v886_v53 = vpop.permute.xlu1 %885 }
 0x294   : > { %v1398_v11 = vpop.permute.xlu2 %1397  ;;  %v1761_v2 = vsel %vm1739_vm4, %v1728_v12, %v886_v53  ;;  %v5355_v53 = vld [vmem:[#allocation2 + $0x172] sm:$0xff] }
 0x295   : > { %3068 = vmatmul.f32.gmra.mxu0 %v4960_v4  ;;  %v1794_v20 = vsel %vm1772_vm5, %v1761_v2, %v1014_v58 }
 0x296   : > { %3166 = vmatmul.f32.gmra.mxu1 %v2387_v3 }
 0x297   : > { %v5304_v35 = vld [vmem:[#allocation3 + $0xc0] sm:$0xff] }
 0x298   : > { %1407 = vrot.lane.b32.xlu0 %v5299_v26, %s4128_s8  ;;  %2759 = vmatmul.f32.vlgmr.msra.gmra.mxu2 %v5304_v35 }
 0x299   : > { %1535 = vrot.lane.b32.xlu1 %v5302_v13, %s4125_s30 }
 0x29a   : > { %v1142_v4 = vpop.permute.xlu0 %1141  ;;  %895 = vrot.lane.b32.xlu2 %v5122_v7, %s4122_s13 }
 0x29b   : > { %v1270_v59 = vpop.permute.xlu1 %1269  ;;  %v1827_v24 = vsel %vm1805_vm6, %v1794_v20, %v1142_v4  ;;  %v2391_v20 = vld [vmem:[#allocation3 + $0x51] sm:$0xff] }
 0x29c   : > { %v760_v45 = vpop.permute.xlu2 %759  ;;  %v1860_v33 = vsel %vm1838_vm7, %v1827_v24, %v1270_v59  ;;  %v5368_v59 = vld [vmem:[#allocation2 + $0x170] sm:$0xff] }
 0x29d   : > { %3071 = vmatmul.f32.gmra.mxu0 %v5000_v54  ;;  %v1893_v8 = vsel %vm1871_vm8, %v1860_v33, %v1398_v11 }
 0x29e   : > { %3169 = vmatmul.f32.gmra.mxu1 %v2388_v6 }
 0x2a0   : > { %769 = vrot.lane.b32.xlu0 %v5158_v46, %s4121_s12 }
 0x2a1   : > { %897 = vrot.lane.b32.xlu1 %v5194_v41, %s4122_s13 }
 0x2a2   : > { %v1526_v7 = vpop.permute.xlu0 %1525  ;;  %v2142_v54 = vpop.f32.mrf.mxu0  ;;  %1279 = vrot.lane.b32.xlu2 %v5211_v9, %s4127_s7 }
 0x2a3   : > { %v1926_v27 = vsel %vm1904_vm9, %v1893_v8, %v1526_v7  ;;  %v5330_v32 = vadd.f32 %v5236_v14, %v2142_v54  ;;  %v1654_v43 = vpop.permute.xlu1 %1653  ;;  %v5388_v54 = vld [vmem:[#allocation2 + $0x180] sm:$0xff] }
 0x2a4   : > { %v1959_v46 = vsel %vm1937_vm10, %v1926_v27, %v1654_v43  ;;  %v1144_v62 = vpop.permute.xlu2 %1143 }
 0x2a5   : > { %3074 = vmatmul.f32.gmra.mxu0 %v5035_v28  ;;  %v2208_v41 = vmax.f32 %v5330_v32, 0.0  ;;  %3897 = vmatmul.msk.f32.gmra.mxu3 %vm1979_vm11, %v1959_v46  ;;  %v1729_v28 = vsel %vm240_vm0, %v4946_v18, %v760_v45 }
 0x2a6   : > { %3172 = vmatmul.f32.gmra.mxu1 %v2389_v44  ;;  %v2393_v44 = vld [vmem:[#allocation3 + $0x69] sm:$0xff] }
 0x2a7   : > { %2241 = vst [vmem:[#allocation3 + $0xc9] sm:$0xff] %v2208_v41 }
 0x2a8   : > { %1153 = vrot.lane.b32.xlu0 %v5286_v55, %s4124_s26 }
 0x2a9   : > { %1281 = vrot.lane.b32.xlu1 %v5265_v48, %s4127_s7 }
 0x2aa   : > { %v888_v30 = vpop.permute.xlu0 %887  ;;  %1663 = vrot.lane.b32.xlu2 %v5338_v52, %s4126_s6 }
 0x2ab   : > { %v1016_v63 = vpop.permute.xlu1 %1015  ;;  %v1762_v58 = vsel %vm1739_vm4, %v1729_v28, %v888_v30  ;;  %v5400_v30 = vld [vmem:[#allocation2 + $0x182] sm:$0xff] }
 0x2ac   : > { %v1528_v23 = vpop.permute.xlu2 %1527  ;;  %v1795_v36 = vsel %vm1772_vm5, %v1762_v58, %v1016_v63 }
 0x2ad   : > { %3077 = vmatmul.f32.gmra.mxu0 %v5081_v31  ;;  %v1828_v18 = vsel %vm1805_vm6, %v1795_v36, %v1144_v62 }
 0x2ae   : > { %3175 = vmatmul.f32.gmra.mxu1 %v2390_v56  ;;  %v5353_v12 = vld [vmem:[#allocation3 + $0xc8] sm:$0xff] }
 0x2af   : > { %2762 = vmatmul.f32.gmra.mxu2 %v5353_v12 }
 0x2b0   : > { %1537 = vrot.lane.b32.xlu0 %v5350_v22, %s4125_s30 }
 0x2b1   : > { %1665 = vrot.lane.b32.xlu1 %v5355_v53, %s4126_s6 }
 0x2b2   : > { %v1272_v31 = vpop.permute.xlu0 %1271  ;;  %1025 = vrot.lane.b32.xlu2 %v5251_v1, %s4123_s25 }
 0x2b3   : > { %v1400_v11 = vpop.permute.xlu1 %1399  ;;  %v1861_v3 = vsel %vm1838_vm7, %v1828_v18, %v1272_v31  ;;  %v2394_v18 = vld [vmem:[#allocation3 + $0x79] sm:$0xff] }
 0x2b4   : > { %v890_v2 = vpop.permute.xlu2 %889  ;;  %v1894_v4 = vsel %vm1871_vm8, %v1861_v3, %v1400_v11 }
 0x2b5   : > { %3080 = vmatmul.f32.gmra.mxu0 %v5120_v50  ;;  %v1927_v24 = vsel %vm1904_vm9, %v1894_v4, %v1528_v23  ;;  %v5426_v4 = vld [vmem:[#allocation2 + $0x188] sm:$0xff] }
 0x2b6   : > { %3178 = vmatmul.f32.gmra.mxu1 %v2391_v20 }
 0x2b8   : > { %899 = vrot.lane.b32.xlu0 %v5211_v9, %s4122_s13 }
 0x2b9   : > { %v2145_v45 = vpop.f32.mrf.mxu0  ;;  %1027 = vrot.lane.b32.xlu1 %v5299_v26, %s4123_s25 }
 0x2ba   : > { %v5376_v6 = vadd.f32 %v5236_v14, %v2145_v45  ;;  %v1656_v33 = vpop.permute.xlu0 %1655  ;;  %1409 = vrot.lane.b32.xlu2 %v5368_v59, %s4128_s8  ;;  %v5431_v45 = vld [vmem:[#allocation2 + $0x189] sm:$0xff] }
 0x2bb   : > { %v1960_v50 = vsel %vm1937_vm10, %v1927_v24, %v1656_v33  ;;  %v762_v37 = vpop.permute.xlu1 %761 }
 0x2bc   : > { %v2209_v8 = vmax.f32 %v5376_v6, 0.0  ;;  %3898 = vmatmul.msk.f32.gmra.mxu3 %vm1979_vm11, %v1960_v50  ;;  %v1274_v9 = vpop.permute.xlu2 %1273  ;;  %v1730_v7 = vsel %vm240_vm0, %v4990_v60, %v762_v37 }
 0x2bd   : > { %3083 = vmatmul.f32.gmra.mxu0 %v5161_v39  ;;  %v1763_v27 = vsel %vm1739_vm4, %v1730_v7, %v890_v2 }
 0x2be   : > { %2242 = vst [vmem:[#allocation3 + $0xd9] sm:$0xff] %v2209_v8  ;;  %3181 = vmatmul.f32.gmra.mxu1 %v2392_v51 }
 0x2c0   : > { %1283 = vrot.lane.b32.xlu0 %v5338_v52, %s4127_s7 }
 0x2c1   : > { %1411 = vrot.lane.b32.xlu1 %v5388_v54, %s4128_s8 }
 0x2c2   : > { %v1018_v43 = vpop.permute.xlu0 %1017  ;;  %771 = vrot.lane.b32.xlu2 %v5206_v17, %s4121_s12  ;;  %v5407_v17 = vpop.f32.mrf.mxu1 }
 0x2c3   : > { %v1146_v39 = vpop.permute.xlu1 %1145  ;;  %v1796_v46 = vsel %vm1772_vm5, %v1763_v27, %v1018_v43 }
 0x2c4   : > { %v1658_v62 = vpop.permute.xlu2 %1657  ;;  %v1829_v28 = vsel %vm1805_vm6, %v1796_v46, %v1146_v39 }
 0x2c5   : > { %3086 = vmatmul.f32.gmra.mxu0 %v5209_v21  ;;  %v2276_v60 = vld [vmem:[#allocation3 + $0xd8] sm:$0xff]  ;;  %v1862_v63 = vsel %vm1838_vm7, %v1829_v28, %v1274_v9 }
 0x2c6   : > { %2765 = vmatmul.f32.gmra.mxu2 %v2276_v60  ;;  %3184 = vmatmul.f32.gmra.mxu1 %v2393_v44 }
 0x2c8   : > { %1667 = vrot.lane.b32.xlu0 %v5400_v30, %s4126_s6 }
 0x2c9   : > { %773 = vrot.lane.b32.xlu1 %v5286_v55, %s4121_s12  ;;  %v647_v55 = vld [vmem:[#allocation2 + $0x181] sm:$0xff] }
 0x2ca   : > { %v1402_v23 = vpop.permute.xlu0 %1401  ;;  %1155 = vrot.lane.b32.xlu2 %v5302_v13, %s4124_s26  ;;  %v5423_v2 = vpop.f32.mrf.mxu1 }
 0x2cb   : > { %v1895_v21 = vsel %vm1871_vm8, %v1862_v63, %v1402_v23  ;;  %v1530_v58 = vpop.permute.xlu1 %1529  ;;  %v649_v23 = vld [vmem:[#allocation2 + $0x199] sm:$0xff] }
 0x2cc   : > { %v1928_v56 = vsel %vm1904_vm9, %v1895_v21, %v1530_v58  ;;  %v1020_v36 = vpop.permute.xlu2 %1019 }
 0x2cd   : > { %3089 = vmatmul.f32.gmra.mxu0 %v5262_v34  ;;  %v1961_v31 = vsel %vm1937_vm10, %v1928_v56, %v1658_v62 }
 0x2ce   : > { %3187 = vmatmul.f32.gmra.mxu1 %v2394_v18  ;;  %3899 = vmatmul.msk.f32.gmra.mxu3 %vm1979_vm11, %v1961_v31 }
 0x2d0   : > { %1029 = vrot.lane.b32.xlu0 %v5368_v59, %s4123_s25 }
 0x2d1   : > { %1157 = vrot.lane.b32.xlu1 %v5350_v22, %s4124_s26 }
 0x2d2   : > { %v764_v11 = vpop.permute.xlu0 %763  ;;  %1539 = vrot.lane.b32.xlu2 %v647_v55, %s4125_s30  ;;  %v5447_v7 = vpop.f32.mrf.mxu1 }
 0x2d3   : > { %v1731_v3 = vsel %vm240_vm0, %v5030_v38, %v764_v11  ;;  %v892_v34 = vpop.permute.xlu1 %891  ;;  %v617_v11 = vld [vmem:[#allocation2 + $0x198] sm:$0xff] }
 0x2d4   : > { %v1404_v20 = vpop.permute.xlu2 %1403  ;;  %v1764_v24 = vsel %vm1739_vm4, %v1731_v3, %v892_v34 }
 0x2d5   : > { %3092 = vmatmul.f32.gmra.mxu0 %v5304_v35  ;;  %v1797_v38 = vsel %vm1772_vm5, %v1764_v24, %v1020_v36 }
 0x2d6   : > { %3190 = vmatmul.f32.gmra.mxu1 %v2202_v10 }
 0x2d8   : > { %1413 = vrot.lane.b32.xlu0 %v5426_v4, %s4128_s8 }
 0x2d9   : > { %1541 = vrot.lane.b32.xlu1 %v5431_v45, %s4125_s30 }
 0x2da   : > { %v2148_v33 = vpop.f32.mrf.mxu0  ;;  %v1148_v50 = vpop.permute.xlu0 %1147  ;;  %901 = vrot.lane.b32.xlu2 %v5265_v48, %s4122_s13 }
 0x2db   : > { %v5441_v57 = vadd.f32 %v5236_v14, %v2148_v33  ;;  %v1276_v10 = vpop.permute.xlu1 %1275  ;;  %v1830_v35 = vsel %vm1805_vm6, %v1797_v38, %v1148_v50  ;;  %v5463_v39 = vpop.f32.mrf.mxu1  ;;  %v618_v38 = vld [vmem:[#allocation2 + $0x1a0] sm:$0xff] }
 0x2dc   : > { %v766_v37 = vpop.permute.xlu2 %765  ;;  %v1863_v51 = vsel %vm1838_vm7, %v1830_v35, %v1276_v10 }
 0x2dd   : > { %v2210_v9 = vmax.f32 %v5441_v57, 0.0  ;;  %3095 = vmatmul.f32.gmra.mxu0 %v5353_v12  ;;  %v1896_v48 = vsel %vm1871_vm8, %v1863_v51, %v1404_v20  ;;  %v420_v20 = vld [vmem:[#allocation2 + $0x138] sm:$0xff] }
 0x2de   : > { %3193 = vmatmul.f32.gmra.mxu1 %v2203_v29 }
 0x2df   : > { %2243 = vst [vmem:[#allocation3 + $0xe1] sm:$0xff] %v2210_v9 }
 0x2e0   : > { %775 = vrot.lane.b32.xlu0 %v5302_v13, %s4121_s12 }
 0x2e1   : > { %903 = vrot.lane.b32.xlu1 %v5338_v52, %s4122_s13  ;;  %v680_v52 = vld [vmem:[#allocation2 + $0x18a] sm:$0xff] }
 0x2e2   : > { %v1532_v27 = vpop.permute.xlu0 %1531  ;;  %1285 = vrot.lane.b32.xlu2 %v5355_v53, %s4127_s7 }
 0x2e3   : > { %v1929_v12 = vsel %vm1904_vm9, %v1896_v48, %v1532_v27  ;;  %v1660_v43 = vpop.permute.xlu1 %1659  ;;  %v5480_v21 = vpop.f32.mrf.mxu1  ;;  %v682_v48 = vld [vmem:[#allocation2 + $0x1a2] sm:$0xff] }
 0x2e4   : > { %v1962_v49 = vsel %vm1937_vm10, %v1929_v12, %v1660_v43  ;;  %v1150_v29 = vpop.permute.xlu2 %1149 }
 0x2e5   : > { %3098 = vmatmul.f32.gmra.mxu0 %v2276_v60  ;;  %3900 = vmatmul.msk.f32.gmra.mxu3 %vm1979_vm11, %v1962_v49  ;;  %v1732_v60 = vsel %vm240_vm0, %v5095_v15, %v766_v37 }
 0x2e6   : > { %v2277_v13 = vld [vmem:[#allocation3 + $0xe0] sm:$0xff]  ;;  %3196 = vmatmul.f32.gmra.mxu1 %v2204_v16 }
 0x2e7   : > { %2768 = vmatmul.f32.gmra.mxu2 %v2277_v13 }
 0x2e8   : > { %1159 = vrot.lane.b32.xlu0 %v647_v55, %s4124_s26  ;;  %v2151_v46 = vpop.f32.mrf.mxu3 }
 0x2e9   : > { %v5469_v62 = vadd.f32 %v5236_v14, %v2151_v46  ;;  %1287 = vrot.lane.b32.xlu1 %v5400_v30, %s4127_s7  ;;  %v681_v30 = vld [vmem:[#allocation2 + $0x19a] sm:$0xff] }
 0x2ea   : > { %v894_v44 = vpop.permute.xlu0 %893  ;;  %1669 = vrot.lane.b32.xlu2 %v680_v52, %s4126_s6  ;;  %v650_v46 = vld [vmem:[#allocation2 + $0x1a1] sm:$0xff] }
 0x2eb   : > { %v2211_v5 = vmax.f32 %v5469_v62, 0.0  ;;  %v1022_v16 = vpop.permute.xlu1 %1021  ;;  %v1765_v63 = vsel %vm1739_vm4, %v1732_v60, %v894_v44 }
 0x2ec   : > { %v1534_v28 = vpop.permute.xlu2 %1533  ;;  %v1798_v15 = vsel %vm1772_vm5, %v1765_v63, %v1022_v16 }
 0x2ed   : > { %3101 = vmatmul.f32.gmra.mxu0 %v2277_v13  ;;  %2244 = vst [vmem:[#allocation3 + $0xf1] sm:$0xff] %v2211_v5  ;;  %v1831_v58 = vsel %vm1805_vm6, %v1798_v15, %v1150_v29 }
 0x2ee   : > { %3199 = vmatmul.f32.gmra.mxu1 %v2205_v19  ;;  %v5492_v19 = vpop.f32.mrf.mxu1 }
 0x2f0   : > { %1543 = vrot.lane.b32.xlu0 %v649_v23, %s4125_s30 }
 0x2f1   : > { %1671 = vrot.lane.b32.xlu1 %v681_v30, %s4126_s6 }
 0x2f2   : > { %v1278_v56 = vpop.permute.xlu0 %1277  ;;  %1031 = vrot.lane.b32.xlu2 %v5388_v54, %s4123_s25 }
 0x2f3   : > { %v1406_v36 = vpop.permute.xlu1 %1405  ;;  %v1864_v18 = vsel %vm1838_vm7, %v1831_v58, %v1278_v56 }
 0x2f4   : > { %v2278_v31 = vld [vmem:[#allocation3 + $0xf0] sm:$0xff]  ;;  %v896_v55 = vpop.permute.xlu2 %895  ;;  %v1897_v47 = vsel %vm1871_vm8, %v1864_v18, %v1406_v36 }
 0x2f5   : > { %2771 = vmatmul.f32.gmra.mxu2 %v2278_v31  ;;  %3104 = vmatmul.f32.gmra.mxu0 %v2278_v31  ;;  %v1930_v54 = vsel %vm1904_vm9, %v1897_v47, %v1534_v28 }
 0x2f6   : > { %3202 = vmatmul.f32.gmra.mxu1 %v2206_v25  ;;  %v5504_v25 = vpop.f32.mrf.mxu1 }
 0x2f7   : > { %6532 = vst [vmem:[#allocation10_spill] sm:$0xff] %v5504_v25 }
 0x2f8   : > { %905 = vrot.lane.b32.xlu0 %v5355_v53, %s4122_s13 }
 0x2f9   : > { %1033 = vrot.lane.b32.xlu1 %v5426_v4, %s4123_s25  ;;  %s4069_s25 = scalar_lea.hbm %s6527_s5, 512 }
 0x2fa   : > { %v1662_v3 = vpop.permute.xlu0 %1661  ;;  %1415 = vrot.lane.b32.xlu2 %v617_v11, %s4128_s8 }
 0x2fb   : > { %v1963_v34 = vsel %vm1937_vm10, %v1930_v54, %v1662_v3  ;;  %v768_v24 = vpop.permute.xlu1 %767 }
 0x2fc   : > { %3901 = vmatmul.msk.f32.gmra.mxu3 %vm1979_vm11, %v1963_v34  ;;  %v1280_v42 = vpop.permute.xlu2 %1279  ;;  %v1733_v53 = vsel %vm240_vm0, %v420_v20, %v768_v24 }
 0x2fd   : > { %v1766_v50 = vsel %vm1739_vm4, %v1733_v53, %v896_v55 }
 0x2fe   : > { %3205 = vmatmul.f32.gmra.mxu1 %v2207_v61  ;;  %v5520_v27 = vpop.f32.mrf.mxu1 }
 0x2ff   : > { %v2154_v33 = vpop.f32.mrf.mxu3  ;;  %6533 = vst [vmem:[#allocation11_spill] sm:$0xff] %v5520_v27 }
 0x300   : > { %v5510_v4 = vadd.f32 %v5236_v14, %v2154_v33  ;;  %1289 = vrot.lane.b32.xlu0 %v680_v52, %s4127_s7 }
 0x301   : > { %1417 = vrot.lane.b32.xlu1 %v618_v38, %s4128_s8  ;;  %s3914_s8 = sshll.u32 %s4181_s22, 8 }
 0x302   : > { %v2212_v10 = vmax.f32 %v5510_v4, 0.0  ;;  %v1024_v35 = vpop.permute.xlu0 %1023  ;;  %777 = vrot.lane.b32.xlu2 %v5350_v22, %s4121_s12  ;;  %s3788_s11 = scalar_lea.hbm %s6527_s5, %s3914_s8 }
 0x303   : > { %v1152_v40 = vpop.permute.xlu1 %1151  ;;  %v1799_v61 = vsel %vm1772_vm5, %v1766_v50, %v1024_v35  ;;  %s3791_s15 = sshll.u32 %s3788_s11, 4  ;;  %s3792_s15 = int_to_ptr.hbm [resolvable:$true] %s3791_s15 }
 0x304   : > { %2245 = vst [vmem:[#allocation3 + $0xf9] sm:$0xff] %v2212_v10  ;;  %v1664_v37 = vpop.permute.xlu2 %1663  ;;  %v1832_v51 = vsel %vm1805_vm6, %v1799_v61, %v1152_v40  ;;  %s4063_s16 = sshra.s32 %s3792_s15, 4  ;;  %s4064_s16 = int_to_ptr.hbm [resolvable:$true] %s4063_s16 }
 0x305   : > { %v1865_v12 = vsel %vm1838_vm7, %v1832_v51, %v1280_v42  ;;  %s4065_s17 = scalar_lea.hbm %s4064_s16, 256  ;;  %p4070_p3 = scmp.lt.s32.totalorder %s4064_s16, %s6527_s5 }
 0x306   : > { %3208 = vmatmul.f32.gmra.mxu1 %v2208_v41  ;;  %v5531_v41 = vpop.f32.mrf.mxu1  ;;  %p4066_p0 = scmp.ne.s32.totalorder %s4064_s16, %s4065_s17  ;;  %p4071_p4 = scmp.lt.s32.totalorder %s4069_s25, %s4065_s17 }
 0x307   : > { %6534 = vst [vmem:[#allocation12_spill] sm:$0xff] %v5531_v41 }
 0x308   : > { %1673 = vrot.lane.b32.xlu0 %v682_v48, %s4126_s6  ;;  %p4067_p1 = pnand %p4066_p0, %p4198_p5  ;;  %p4072_p7 = por %p4071_p4, %p4070_p3 }
 0x30a   : > { %v1408_v43 = vpop.permute.xlu0 %1407  ;;  %1161 = vrot.lane.b32.xlu2 %v5431_v45, %s4124_s26  ;;  %v421_v45 = vld [vmem:[#allocation2 + $0x140] sm:$0xff]  ;;  %p4068_p2 = pneg %p4067_p1 }
 0x30b   : > { %v1898_v22 = vsel %vm1871_vm8, %v1865_v12, %v1408_v43  ;;  %v2279_v49 = vld [vmem:[#allocation3 + $0xf8] sm:$0xff]  ;;  %v1536_v29 = vpop.permute.xlu1 %1535 }
 0x30c   : > { %2774 = vmatmul.f32.gmra.mxu2 %v2279_v49  ;;  %3107 = vmatmul.f32.gmra.mxu0 %v2279_v49  ;;  %v1931_v13 = vsel %vm1904_vm9, %v1898_v22, %v1536_v29  ;;  %v1026_v52 = vpop.permute.xlu2 %1025  ;;  %p4073_p8 = pnand %p4072_p7, %p4068_p2 }
 0x30d   : > { %v1964_v32 = vsel %vm1937_vm10, %v1931_v13, %v1664_v37 }
 0x30e   : > { %3211 = vmatmul.f32.gmra.mxu1 %v2209_v8  ;;  %3902 = vmatmul.msk.f32.gmra.mxu3 %vm1979_vm11, %v1964_v32  ;;  %v5539_v30 = vpop.f32.mrf.mxu1 }
 0x30f   : > { %6535 = vst [vmem:[#allocation13_spill] sm:$0xff] %v5539_v30 }
 0x311   : > { %v2157_v60 = vpop.f32.mrf.mxu3 }
 0x312   : > { %v770_v44 = vpop.permute.xlu0 %769  ;;  %v2158_v16 = vadd.f32 %v5236_v14, %v2157_v60  ;;  %1545 = vrot.lane.b32.xlu2 %v650_v46, %s4125_s30  ;;  %s232_s30 = sand.u32 1, %s4107_s19  }
 0x313   : > { %v1734_v28 = vsel %vm240_vm0, %v421_v45, %v770_v44  ;;  %v898_v63 = vpop.permute.xlu1 %897  ;;  %s3872_s6 = sshll.u32 %s232_s30, 8  ;;  %s3777_s22 = scalar_lea.sflag [#allocation6], %s232_s30 }
 0x314   : > { %v2213_v23 = vmax.f32 %v2158_v16, 0.0  ;;  %v1410_v15 = vpop.permute.xlu2 %1409  ;;  %v1767_v6 = vsel %vm1739_vm4, %v1734_v28, %v898_v63  ;;  %v2594_v28 = vld [vmem:[#allocation4 + $0x178] sm:$0xff]  ;;  %v2593_v63 = vld [vmem:[#allocation4 + $0x170] sm:$0xff]  ;;  %s6179_s7 = scalar_lea.vmem [#allocation7], %s3872_s6 }
 0x315   : > { %v1800_v8 = vsel %vm1772_vm5, %v1767_v6, %v1026_v52  ;;  %2921 = vmatpush.msrb.mxu3 %v2594_v28  ;;  %v2580_v28 = vld [vmem:[#allocation4 + $0x108] sm:$0xff]  ;;  %s3789_s14 = sshll.u32 %s6179_s7, 4  ;;  %s3790_s14 = int_to_ptr.vmem [resolvable:$true] %s3789_s14 }
 0x316   : > { %2246 = vst [vmem:[#allocation3 + $0x109] sm:$0xff] %v2213_v23  ;;  %3214 = vmatmul.f32.gmra.mxu1 %v2210_v9  ;;  %v5547_v47 = vpop.f32.mrf.mxu1 }
 0x317   : > { %6536 = vst [vmem:[#allocation14_spill] sm:$0xff] %v5547_v47  ;;  %2922 = vmatpush.msrb.mxu3 %v2593_v63  ;;  %v2655_v47 = vld [vmem:[#allocation4 + $0x360] sm:$0xff] }
 0x31a   : > { %v1154_v58 = vpop.permute.xlu0 %1153 }
 0x31b   : > { %v1282_v56 = vpop.permute.xlu1 %1281  ;;  %v1833_v36 = vsel %vm1805_vm6, %v1800_v8, %v1154_v58  ;;  %v2592_v8 = vld [vmem:[#allocation4 + $0x168] sm:$0xff] }
 0x31c   : > { %v772_v18 = vpop.permute.xlu2 %771  ;;  %v1866_v31 = vsel %vm1838_vm7, %v1833_v36, %v1282_v56  ;;  %2923 = vmatpush.msrb.mxu3 %v2592_v8 }
 0x31d   : > { %v2280_v55 = vld [vmem:[#allocation3 + $0x108] sm:$0xff]  ;;  %v1899_v57 = vsel %vm1871_vm8, %v1866_v31, %v1410_v15 }
 0x31e   : > { %3217 = vmatmul.f32.gmra.mxu1 %v2211_v5  ;;  %2777 = vmatmul.f32.gmra.mxu2 %v2280_v55  ;;  %v5555_v20 = vpop.f32.mrf.mxu1  ;;  %v1735_v5 = vsel %vm240_vm0, %v5226_v0, %v772_v18  ;;  %v2591_v18 = vld [vmem:[#allocation4 + $0x160] sm:$0xff] }
 0x31f   : > { %3110 = vmatmul.f32.gmra.mxu0 %v2280_v55  ;;  %6537 = vst [vmem:[#allocation15_spill] sm:$0xff] %v5555_v20  ;;  %2924 = vmatpush.msrb.mxu3 %v2591_v18  ;;  %v5742_v20 = vld [vmem:[#allocation3 + $0xaa] sm:$0xff] }
 0x322   : > { %v1538_v9 = vpop.permute.xlu0 %1537 }
 0x323   : > { %v1932_v11 = vsel %vm1904_vm9, %v1899_v57, %v1538_v9  ;;  %v1666_v54 = vpop.permute.xlu1 %1665  ;;  %v2578_v57 = vld [vmem:[#allocation4 + $0xf8] sm:$0xff] }
 0x324   : > { %v1965_v3 = vsel %vm1937_vm10, %v1932_v11, %v1666_v54  ;;  %v1156_v34 = vpop.permute.xlu2 %1155  ;;  %2808 = vmatpush.msrb.mxu2 %v2578_v57  ;;  %v2590_v11 = vld [vmem:[#allocation4 + $0x158] sm:$0xff] }
 0x325   : > { %3903 = vmatmul.msk.f32.gmra.mxu3 %vm1979_vm11, %v1965_v3 }
 0x326   : > { %3220 = vmatmul.f32.gmra.mxu1 %v2212_v10  ;;  %v5561_v50 = vpop.f32.mrf.mxu1  ;;  %2925 = vmatpush.msrb.mxu3 %v2590_v11 }
 0x327   : > { %6538 = vst [vmem:[#allocation16_spill] sm:$0xff] %v5561_v50  ;;  %v5728_v50 = vld [vmem:[#allocation4 + $0x408] sm:$0xff] }
 0x328   : > { %v2160_v24 = vpop.f32.mrf.mxu3 }
 0x329   : > { %v2161_v62 = vadd.f32 %v5236_v14, %v2160_v24 }
 0x32a   : > { %v900_v42 = vpop.permute.xlu0 %899 }
 0x32b   : > { %v2214_v53 = vmax.f32 %v2161_v62, 0.0  ;;  %v1028_v38 = vpop.permute.xlu1 %1027  ;;  %v1768_v4 = vsel %vm1739_vm4, %v1735_v5, %v900_v42  ;;  %v2588_v62 = vld [vmem:[#allocation4 + $0x148] sm:$0xff] }
 0x32c   : > { %v1540_v33 = vpop.permute.xlu2 %1539  ;;  %v1801_v35 = vsel %vm1772_vm5, %v1768_v4, %v1028_v38  ;;  %v2587_v38 = vld [vmem:[#allocation4 + $0x140] sm:$0xff] }
 0x32d   : > { %2247 = vst [vmem:[#allocation3 + $0x111] sm:$0xff] %v2214_v53  ;;  %v1834_v10 = vsel %vm1805_vm6, %v1801_v35, %v1156_v34  ;;  %v2589_v34 = vld [vmem:[#allocation4 + $0x150] sm:$0xff] }
 0x32e   : > { %3223 = vmatmul.f32.gmra.mxu1 %v2213_v23  ;;  %v5567_v12 = vpop.f32.mrf.mxu1  ;;  %2926 = vmatpush.msrb.mxu3 %v2589_v34  ;;  %v2577_v35 = vld [vmem:[#allocation4 + $0xf0] sm:$0xff] }
 0x32f   : > { %6539 = vst [vmem:[#allocation17_spill] sm:$0xff] %v5567_v12  ;;  %2809 = vmatpush.msrb.mxu2 %v2577_v35 }
 0x330   : > { %2927 = vmatpush.msrb.mxu3 %v2588_v62 }
 0x332   : > { %v1284_v40 = vpop.permute.xlu0 %1283  ;;  %2928 = vmatpush.msrb.mxu3 %v2587_v38 }
 0x333   : > { %v1867_v61 = vsel %vm1838_vm7, %v1834_v10, %v1284_v40  ;;  %v1412_v37 = vpop.permute.xlu1 %1411  ;;  %v2586_v40 = vld [vmem:[#allocation4 + $0x138] sm:$0xff] }
 0x334   : > { %v2281_v51 = vld [vmem:[#allocation3 + $0x110] sm:$0xff]  ;;  %v902_v0 = vpop.permute.xlu2 %901  ;;  %v1900_v48 = vsel %vm1871_vm8, %v1867_v61, %v1412_v37  ;;  %v2585_v37 = vld [vmem:[#allocation4 + $0x130] sm:$0xff]  ;;  %2929 = vmatpush.msrb.mxu3 %v2586_v40 }
 0x335   : > { %2780 = vmatmul.f32.gmra.mxu2 %v2281_v51  ;;  %3113 = vmatmul.f32.gmra.mxu0 %v2281_v51  ;;  %v1933_v43 = vsel %vm1904_vm9, %v1900_v48, %v1540_v33  ;;  %v2571_v40 = vld [vmem:[#allocation4 + $0xc0] sm:$0xff] }
 0x336   : > { %3226 = vmatmul.f32.gmra.mxu1 %v2214_v53  ;;  %v5576_v16 = vpop.f32.mrf.mxu1  ;;  %2930 = vmatpush.msrb.mxu3 %v2585_v37  ;;  %v5842_v25 = vld [vmem:[#allocation3 + $0x112] sm:$0xff] }
 0x337   : > { %6540 = vst [vmem:[#allocation18_spill] sm:$0xff] %v5576_v16  ;;  %v2291_v16 = vld [vmem:[#allocation3 + $0x9] sm:$0xff] }
 0x33a   : > { %v1668_v22 = vpop.permute.xlu0 %1667 }
 0x33b   : > { %v1966_v49 = vsel %vm1937_vm10, %v1933_v43, %v1668_v22  ;;  %v774_v29 = vpop.permute.xlu1 %773  ;;  %v2576_v22 = vld [vmem:[#allocation4 + $0xe8] sm:$0xff] }
 0x33c   : > { %3904 = vmatmul.msk.f32.gmra.mxu3 %vm1979_vm11, %v1966_v49  ;;  %v1286_v13 = vpop.permute.xlu2 %1285  ;;  %v1736_v32 = vsel %vm240_vm0, %v5251_v1, %v774_v29  ;;  %2810 = vmatpush.msrb.mxu2 %v2576_v22  ;;  %v2583_v29 = vld [vmem:[#allocation4 + $0x120] sm:$0xff] }
 0x33d   : > { %v1769_v60 = vsel %vm1739_vm4, %v1736_v32, %v902_v0  ;;  %v2582_v32 = vld [vmem:[#allocation4 + $0x118] sm:$0xff] }
 0x33e   : > { %v5589_v61 = vpop.f32.mrf.mxu1  ;;  %v2323_v22 = vld [vmem:[#allocation3 + $0xa] sm:$0xff] }
 0x33f   : > { %v2163_v52 = vpop.f32.mrf.mxu3  ;;  %6541 = vst [vmem:[#allocation19_spill] sm:$0xff] %v5589_v61  ;;  %v5719_v61 = vld [vmem:[#allocation4 + $0x410] sm:$0xff] }
 0x340   : > { %v2164_v46 = vadd.f32 %v5236_v14, %v2163_v52 }
 0x342   : > { %v2215_v45 = vmax.f32 %v2164_v46, 0.0  ;;  %v1030_v44 = vpop.permute.xlu0 %1029 }
 0x343   : > { %v1158_v23 = vpop.permute.xlu1 %1157  ;;  %v1802_v6 = vsel %vm1772_vm5, %v1769_v60, %v1030_v44 }
 0x344   : > { %2248 = vst [vmem:[#allocation3 + $0x121] sm:$0xff] %v2215_v45  ;;  %3229 = vmatmul.f32.gmra.mxu1 %v2215_v45  ;;  %v1670_v15 = vpop.permute.xlu2 %1669  ;;  %v1835_v1 = vsel %vm1805_vm6, %v1802_v6, %v1158_v23  ;;  %v2581_v45 = vld [vmem:[#allocation4 + $0x110] sm:$0xff]  ;;  %v2579_v6 = vld [vmem:[#allocation4 + $0x100] sm:$0xff] }
 0x345   : > { %v1868_v58 = vsel %vm1838_vm7, %v1835_v1, %v1286_v13 }
 0x346   : > { %v5602_v11 = vpop.f32.mrf.mxu1 }
 0x34a   : > { %v1414_v56 = vpop.permute.xlu0 %1413 }
 0x34b   : > { %v2282_v36 = vld [vmem:[#allocation3 + $0x120] sm:$0xff]  ;;  %v1901_v31 = vsel %vm1871_vm8, %v1868_v58, %v1414_v56  ;;  %v1542_v55 = vpop.permute.xlu1 %1541 }
 0x34c   : > { %2783 = vmatmul.f32.gmra.mxu2 %v2282_v36  ;;  %3116 = vmatmul.f32.gmra.mxu0 %v2282_v36  ;;  %v1934_v9 = vsel %vm1904_vm9, %v1901_v31, %v1542_v55  ;;  %v1032_v3 = vpop.permute.xlu2 %1031  ;;  %v2574_v36 = vld [vmem:[#allocation4 + $0xd8] sm:$0xff] }
 0x34d   : > { %v1967_v54 = vsel %vm1937_vm10, %v1934_v9, %v1670_v15  ;;  %v2575_v15 = vld [vmem:[#allocation4 + $0xe0] sm:$0xff] }
 0x34e   : > { %3905 = vmatmul.msk.f32.gmra.mxu3 %vm1979_vm11, %v1967_v54  ;;  %2811 = vmatpush.msrb.mxu2 %v2575_v15  ;;  %v5623_v15 = vld [vmem:[#allocation3 + $0x32] sm:$0xff] }
 0x350   : > { %2812 = vmatpush.msrb.mxu2 %v2574_v36  ;;  %v5632_v36 = vld [vmem:[#allocation3 + $0x3a] sm:$0xff] }
 0x351   : > { %v2166_v24 = vpop.f32.mrf.mxu3 }
 0x352   : > { %v776_v5 = vpop.permute.xlu0 %775  ;;  %v2167_v42 = vadd.f32 %v5236_v14, %v2166_v24 }
 0x353   : > { %v1737_v53 = vsel %vm240_vm0, %v5299_v26, %v776_v5  ;;  %v904_v4 = vpop.permute.xlu1 %903  ;;  %v2584_v26 = vld [vmem:[#allocation4 + $0x128] sm:$0xff] }
 0x354   : > { %v2216_v33 = vmax.f32 %v2167_v42, 0.0  ;;  %v1770_v10 = vsel %vm1739_vm4, %v1737_v53, %v904_v4  ;;  %v1416_v0 = vpop.permute.xlu2 %1415  ;;  %2931 = vmatpush.msrb.mxu3 %v2584_v26  ;;  %v5607_v42 = vpop.f32.mrf.mxu0  ;;  %v2322_v26 = vld [vmem:[#allocation3 + $0x2] sm:$0xff] }
 0x355   : > { %v1803_v51 = vsel %vm1772_vm5, %v1770_v10, %v1032_v3  ;;  %v2573_v3 = vld [vmem:[#allocation4 + $0xd0] sm:$0xff] }
 0x356   : > { %2249 = vst [vmem:[#allocation3 + $0x129] sm:$0xff] %v2216_v33  ;;  %3232 = vmatmul.f32.gmra.mxu1 %v2216_v33  ;;  %2932 = vmatpush.msrb.mxu3 %v2583_v29  ;;  %v2572_v33 = vld [vmem:[#allocation4 + $0xc8] sm:$0xff] }
 0x357   : > { %2813 = vmatpush.msrb.mxu2 %v2573_v3  ;;  %v5642_v3 = vld [vmem:[#allocation3 + $0x52] sm:$0xff] }
 0x358   : > { %2933 = vmatpush.msrb.mxu3 %v2582_v32 }
 0x359   : > { %2814 = vmatpush.msrb.mxu2 %v2572_v33 }
 0x35a   : > { %v1160_v48 = vpop.permute.xlu0 %1159  ;;  %2934 = vmatpush.msrb.mxu3 %v2581_v45 }
 0x35b   : > { %v1836_v43 = vsel %vm1805_vm6, %v1803_v51, %v1160_v48  ;;  %v1288_v49 = vpop.permute.xlu1 %1287  ;;  %2815 = vmatpush.msrb.mxu2 %v2571_v40  ;;  %v5614_v48 = vpop.f32.mrf.mxu1  ;;  %v5655_v40 = vld [vmem:[#allocation3 + $0x6a] sm:$0xff] }
 0x35c   : > { %v1869_v13 = vsel %vm1838_vm7, %v1836_v43, %v1288_v49  ;;  %v778_v44 = vpop.permute.xlu2 %777  ;;  %2935 = vmatpush.msrb.mxu3 %v2580_v28  ;;  %v2570_v43 = vld [vmem:[#allocation4 + $0xb8] sm:$0xff]  ;;  %v5616_v29 = vpop.f32.mrf.mxu0 }
 0x35d   : > { %v2283_v52 = vld [vmem:[#allocation3 + $0x128] sm:$0xff]  ;;  %v1902_v46 = vsel %vm1871_vm8, %v1869_v13, %v1416_v0  ;;  %v1738_v58 = vsel %vm240_vm0, %v5368_v59, %v778_v44  ;;  %2816 = vmatpush.msrb.mxu2 %v2570_v43  ;;  %v2569_v13 = vld [vmem:[#allocation4 + $0xb0] sm:$0xff]  ;;  %v2568_v44 = vld [vmem:[#allocation4 + $0xa8] sm:$0xff] }
 0x35e   : > { %2786 = vmatmul.f32.gmra.mxu2 %v2283_v52  ;;  %3119 = vmatmul.f32.gmra.mxu0 %v2283_v52  ;;  %v2325_v28 = vld [vmem:[#allocation3 + $0x22] sm:$0xff] }
 0x35f   : > { %2936 = vmatpush.msrb.mxu3 %v2579_v6  ;;  %2817 = vmatpush.msrb.mxu2 %v2569_v13  ;;  %v2567_v6 = vld [vmem:[#allocation4 + $0xa0] sm:$0xff]  ;;  %v5672_v13 = vld [vmem:[#allocation3 + $0x7a] sm:$0xff] }
 0x361   : > { %2818 = vmatpush.msrb.mxu2 %v2568_v44  ;;  %v5676_v44 = vld [vmem:[#allocation4 + $0x458] sm:$0xff] }
 0x362   : > { %v1544_v60 = vpop.permute.xlu0 %1543 }
 0x363   : > { %v1935_v63 = vsel %vm1904_vm9, %v1902_v46, %v1544_v60  ;;  %v1672_v23 = vpop.permute.xlu1 %1671  ;;  %v2324_v46 = vld [vmem:[#allocation3 + $0x1a] sm:$0xff]  ;;  %v5619_v60 = vpop.f32.mrf.mxu1  ;;  %2819 = vmatpush.msrb.mxu2 %v2567_v6 }
 0x364   : > { %v1968_v8 = vsel %vm1937_vm10, %v1935_v63, %v1672_v23  ;;  %v1162_v9 = vpop.permute.xlu2 %1161  ;;  %v5621_v23 = vpop.f32.mrf.mxu0  ;;  %v2641_v6 = vld [vmem:[#allocation4 + $0x2f0] sm:$0xff] }
 0x365   : > { %3906 = vmatmul.msk.f32.gmra.mxu3 %vm1979_vm11, %v1968_v8  ;;  %v5629_v8 = vld [vmem:[%s6524_s2] ss:$0 sm:$0xff] }
 0x368   : > { %v2169_v1 = vpop.f32.mrf.mxu3 }
 0x369   : > { %v2170_v56 = vadd.f32 %v5236_v14, %v2169_v1 }
 0x36a   : > { %v906_v18 = vpop.permute.xlu0 %905 }
 0x36b   : > { %v2217_v31 = vmax.f32 %v2170_v56, 0.0  ;;  %v1771_v55 = vsel %vm1739_vm4, %v1738_v58, %v906_v18  ;;  %v1034_v57 = vpop.permute.xlu1 %1033  ;;  %v2566_v58 = vld [vmem:[#allocation4 + $0x98] sm:$0xff]  ;;  %v5634_v18 = vpop.f32.mrf.mxu1 }
 0x36c   : > { %v1804_v54 = vsel %vm1772_vm5, %v1771_v55, %v1034_v57  ;;  %v1546_v38 = vpop.permute.xlu2 %1545  ;;  %2820 = vmatpush.msrb.mxu2 %v2566_v58  ;;  %v5637_v55 = vld [vmem:[#allocation3 + $0x4a] sm:$0xff]  ;;  %v5683_v58 = vld [vmem:[#allocation4 + $0x448] sm:$0xff] }
 0x36d   : > { %2250 = vst [vmem:[#allocation3 + $0x139] sm:$0xff] %v2217_v31  ;;  %3235 = vmatmul.f32.gmra.mxu1 %v2217_v31  ;;  %v1837_v34 = vsel %vm1805_vm6, %v1804_v54, %v1162_v9  ;;  %v2565_v31 = vld [vmem:[#allocation4 + $0x90] sm:$0xff]  ;;  %v5640_v9 = vpop.f32.mrf.mxu0  ;;  %v2564_v54 = vld [vmem:[#allocation4 + $0x88] sm:$0xff] }
 0x36e   : > { %2821 = vmatpush.msrb.mxu2 %v2565_v31  ;;  %v5688_v31 = vld [vmem:[#allocation3 + $0x82] sm:$0xff] }
 0x370   : > { %2822 = vmatpush.msrb.mxu2 %v2564_v54  ;;  %v5692_v54 = vld [vmem:[#allocation4 + $0x440] sm:$0xff] }
 0x372   : > { %v1290_v59 = vpop.permute.xlu0 %1289 }
 0x373   : > { %v1870_v24 = vsel %vm1838_vm7, %v1837_v34, %v1290_v59  ;;  %v1418_v62 = vpop.permute.xlu1 %1417  ;;  %v5644_v34 = vpop.f32.mrf.mxu1 }
 0x374   : > { %v2284_v5 = vld [vmem:[#allocation3 + $0x138] sm:$0xff]  ;;  %v1903_v53 = vsel %vm1871_vm8, %v1870_v24, %v1418_v62  ;;  %6542 = vst [vmem:[#allocation20_spill] sm:$0xff] %v5644_v34  ;;  %v2563_v24 = vld [vmem:[#allocation4 + $0x80] sm:$0xff] }
 0x375   : > { %2789 = vmatmul.f32.gmra.mxu2 %v2284_v5  ;;  %3122 = vmatmul.f32.gmra.mxu0 %v2284_v5  ;;  %v1936_v4 = vsel %vm1904_vm9, %v1903_v53, %v1546_v38  ;;  %v5648_v53 = vld [vmem:[#allocation3 + $0x62] sm:$0xff] }
 0x376   : > { %2823 = vmatpush.msrb.mxu2 %v2563_v24  ;;  %v2658_v38 = vld [vmem:[#allocation4 + $0x378] sm:$0xff]  ;;  %v2669_v24 = vld [vmem:[#allocation4 + $0x3d0] sm:$0xff] }
 0x377   : > { %3373 = vmatpush.msra.mxu3 %v2658_v38  ;;  %v2668_v38 = vld [vmem:[#allocation4 + $0x3c8] sm:$0xff] }
 0x37a   : > { %v1674_v35 = vpop.permute.xlu0 %1673 }
 0x37b   : > { %v1969_v10 = vsel %vm1937_vm10, %v1936_v4, %v1674_v35  ;;  %v5651_v33 = vpop.f32.mrf.mxu1  ;;  %v2642_v4 = vld [vmem:[#allocation4 + $0x2f8] sm:$0xff] }
 0x37c   : > { %3907 = vmatmul.msk.f32.gmra.mxu3 %vm1979_vm11, %v1969_v10  ;;  %6543 = vst [vmem:[#allocation21_spill] sm:$0xff] %v5651_v33  ;;  %3260 = vmatpush.msra.mxu2 %v2642_v4  ;;  %v5653_v10 = vpop.f32.mrf.mxu0  ;;  %v5699_v4 = vld [vmem:[#allocation4 + $0x430] sm:$0xff] }
 0x37e   : > { %3261 = vmatpush.msra.mxu2 %v2641_v6  ;;  %v5714_v6 = vld [vmem:[#allocation4 + $0x418] sm:$0xff] }
 0x37f   : > { %v2172_v37 = vpop.f32.mrf.mxu3 }
 0x380   : > { %v2173_v51 = vadd.f32 %v5236_v14, %v2172_v37  ;;  %v5658_v37 = vld [vmem:[#allocation4 + $0x478] sm:$0xff] }
 0x381   : > { %3599 = vmatpush.msra.mxu1 %v5658_v37 }
 0x382   : > { %v2218_v0 = vmax.f32 %v2173_v51, 0.0  ;;  %v5661_v51 = vld [vmem:[#allocation4 + $0x470] sm:$0xff] }
 0x383   : > { %3600 = vmatpush.msra.mxu1 %v5661_v51 }
 0x384   : > { %2251 = vst [vmem:[#allocation3 + $0x141] sm:$0xff] %v2218_v0  ;;  %3238 = vmatmul.f32.gmra.mxu1 %v2218_v0  ;;  %2937 = vmatmul.f32.vlgmr.msrb.gmra.mxu3 %v2322_v26  ;;  %v5664_v0 = vpop.f32.mrf.mxu1  ;;  %v5666_v26 = vld [vmem:[#allocation4 + $0x468] sm:$0xff] }
 0x385   : > { %6544 = vst [vmem:[#allocation22_spill] sm:$0xff] %v5664_v0  ;;  %3601 = vmatpush.msra.mxu1 %v5666_v26 }
 0x38b   : > { %v2285_v49 = vld [vmem:[#allocation3 + $0x140] sm:$0xff] }
 0x38c   : > { %2792 = vmatmul.f32.gmra.mxu2 %v2285_v49  ;;  %3125 = vmatmul.f32.gmra.mxu0 %v2285_v49  ;;  %v5670_v49 = vld [vmem:[#allocation4 + $0x460] sm:$0xff]  ;;  %v5886_v34 = vld [vmem:[#allocation3 + $0x142] sm:$0xff] }
 0x38d   : > { %2940 = vmatmul.f32.gmra.mxu3 %v2323_v22  ;;  %3602 = vmatpush.msra.mxu1 %v5670_v49 }
 0x38f   : > { %3603 = vmatpush.msra.mxu1 %v5676_v44 }
 0x391   : > { %v2175_v52 = vpop.f32.mrf.mxu3 }
 0x392   : > { %v2176_v32 = vadd.f32 %v5236_v14, %v2175_v52 }
 0x394   : > { %v2219_v45 = vmax.f32 %v2176_v32, 0.0  ;;  %v2674_v32 = vld [vmem:[#allocation4 + $0x3f8] sm:$0xff] }
 0x395   : > { %2943 = vmatmul.f32.gmra.mxu3 %v2324_v46  ;;  %v2673_v46 = vld [vmem:[#allocation4 + $0x3f0] sm:$0xff]  ;;  %3486 = vmatpush.msra.mxu0 %v2674_v32 }
 0x396   : > { %2252 = vst [vmem:[#allocation3 + $0x151] sm:$0xff] %v2219_v45  ;;  %3241 = vmatmul.f32.gmra.mxu1 %v2219_v45  ;;  %v2657_v45 = vld [vmem:[#allocation4 + $0x370] sm:$0xff] }
 0x397   : > { %3374 = vmatpush.msra.mxu3 %v2657_v45  ;;  %3487 = vmatpush.msra.mxu0 %v2673_v46  ;;  %v2666_v46 = vld [vmem:[#allocation4 + $0x3b8] sm:$0xff]  ;;  %v5710_v45 = vld [vmem:[#allocation4 + $0x420] sm:$0xff] }
 0x39d   : > { %2946 = vmatmul.f32.gmra.mxu3 %v2325_v28  ;;  %v2286_v63 = vld [vmem:[#allocation3 + $0x150] sm:$0xff]  ;;  %v5678_v28 = vpop.f32.mrf.mxu0 }
 0x39e   : > { %2795 = vmatmul.f32.gmra.mxu2 %v2286_v63  ;;  %3128 = vmatmul.f32.gmra.mxu0 %v2286_v63  ;;  %6545 = vst [vmem:[#allocation23_spill] sm:$0xff] %v5678_v28  ;;  %v2672_v63 = vld [vmem:[#allocation4 + $0x3e8] sm:$0xff] }
 0x39f   : > { %3488 = vmatpush.msra.mxu0 %v2672_v63  ;;  %v2665_v63 = vld [vmem:[#allocation4 + $0x3b0] sm:$0xff] }
 0x3a5   : > { %2949 = vmatmul.f32.gmra.mxu3 %v5623_v15 }
 0x3a8   : > { %v2178_v14 = vpop.f32.mrf.mxu3 }
 0x3a9   : > { %v2179_v1 = vadd.f32 %v5629_v8, %v2178_v14  ;;  %v5680_v14 = vld [vmem:[#allocation4 + $0x450] sm:$0xff] }
 0x3aa   : > { %3604 = vmatpush.msra.mxu1 %v5680_v14 }
 0x3ab   : > { %v2220_v56 = vmax.f32 %v2179_v1, 0.0  ;;  %v2671_v1 = vld [vmem:[#allocation4 + $0x3e0] sm:$0xff] }
 0x3ac   : > { %3489 = vmatpush.msra.mxu0 %v2671_v1  ;;  %3605 = vmatpush.msra.mxu1 %v5683_v58 }
 0x3ad   : > { %2952 = vmatmul.f32.gmra.mxu3 %v5632_v36  ;;  %2253 = vst [vmem:[#allocation3 + $0x159] sm:$0xff] %v2220_v56  ;;  %3244 = vmatmul.f32.gmra.mxu1 %v2220_v56  ;;  %v5685_v56 = vpop.f32.mrf.mxu1 }
 0x3ae   : > { %6546 = vst [vmem:[#allocation24_spill] sm:$0xff] %v5685_v56  ;;  %3606 = vmatpush.msra.mxu1 %v5692_v54 }
 0x3b4   : > { %v2287_v57 = vld [vmem:[#allocation3 + $0x158] sm:$0xff] }
 0x3b5   : > { %2955 = vmatmul.f32.gmra.mxu3 %v5637_v55  ;;  %2798 = vmatmul.f32.gmra.mxu2 %v2287_v57  ;;  %v5707_v32 = vpop.f32.mrf.mxu1 }
 0x3b6   : > { %3131 = vmatmul.f32.gmra.mxu0 %v2287_v57  ;;  %v2670_v57 = vld [vmem:[#allocation4 + $0x3d8] sm:$0xff]  ;;  %6548 = vst [vmem:[#allocation26_spill] sm:$0xff] %v5707_v32 }
 0x3b7   : > { %3490 = vmatpush.msra.mxu0 %v2670_v57  ;;  %v2656_v57 = vld [vmem:[#allocation4 + $0x368] sm:$0xff] }
 0x3b8   : > { %3375 = vmatpush.msra.mxu3 %v2656_v57  ;;  %v5734_v57 = vld [vmem:[#allocation4 + $0x400] sm:$0xff] }
 0x3b9   : > { %3491 = vmatpush.msra.mxu0 %v2669_v24  ;;  %v2640_v24 = vld [vmem:[#allocation4 + $0x2e8] sm:$0xff] }
 0x3ba   : > { %3262 = vmatpush.msra.mxu2 %v2640_v24  ;;  %v2661_v24 = vld [vmem:[#allocation4 + $0x390] sm:$0xff]  ;;  %3376 = vmatpush.msra.mxu3 %v2655_v47 }
 0x3bb   : > { %3492 = vmatpush.msra.mxu0 %v2668_v38  ;;  %v5716_v38 = vpop.f32.mrf.mxu2  ;;  %v5763_v47 = vld [vmem:[#allocation3 + $0xc2] sm:$0xff] }
 0x3bc   : > { %6549 = vst [vmem:[#allocation27_spill] sm:$0xff] %v5716_v38 }
 0x3bd   : > { %2958 = vmatmul.f32.gmra.mxu3 %v5642_v3 }
 0x3bf   : > { %v2181_v59 = vpop.f32.mrf.mxu3 }
 0x3c0   : > { %v2182_v62 = vadd.f32 %v5629_v8, %v2181_v59 }
 0x3c2   : > { %v2221_v5 = vmax.f32 %v2182_v62, 0.0  ;;  %v5694_v62 = vld [vmem:[#allocation4 + $0x438] sm:$0xff] }
 0x3c3   : > { %3607 = vmatpush.msra.mxu1 %v5694_v62  ;;  %v5740_v38 = vpop.f32.mrf.mxu2 }
 0x3c4   : > { %2254 = vst [vmem:[#allocation3 + $0x169] sm:$0xff] %v2221_v5  ;;  %3247 = vmatmul.f32.gmra.mxu1 %v2221_v5  ;;  %v5697_v5 = vpop.f32.mrf.mxu0 }
 0x3c5   : > { %2961 = vmatmul.f32.gmra.mxu3 %v5648_v53  ;;  %6547 = vst [vmem:[#allocation25_spill] sm:$0xff] %v5697_v5  ;;  %3608 = vmatpush.msra.mxu1 %v5699_v4 }
 0x3c6   : > { %6552 = vst [vmem:[#allocation30_spill] sm:$0xff] %v5740_v38 }
 0x3cb   : > { %v2288_v35 = vld [vmem:[#allocation3 + $0x168] sm:$0xff]  ;;  %v5749_v30 = vpop.f32.mrf.mxu2 }
 0x3cc   : > { %2801 = vmatmul.f32.gmra.mxu2 %v2288_v35  ;;  %3134 = vmatmul.f32.gmra.mxu0 %v2288_v35  ;;  %v2667_v35 = vld [vmem:[#allocation4 + $0x3c0] sm:$0xff]  ;;  %6555 = vst [vmem:[#allocation33_spill] sm:$0xff] %v5749_v30  ;;  %v2654_v30 = vld [vmem:[#allocation4 + $0x358] sm:$0xff] }
 0x3cd   : > { %2964 = vmatmul.f32.gmra.mxu3 %v5655_v40  ;;  %3493 = vmatpush.msra.mxu0 %v2667_v35 }
 0x3ce   : > { %3377 = vmatpush.msra.mxu3 %v2654_v30 }
 0x3cf   : > { %3494 = vmatpush.msra.mxu0 %v2666_v46  ;;  %v2663_v46 = vld [vmem:[#allocation4 + $0x3a0] sm:$0xff] }
 0x3d1   : > { %v2184_v43 = vpop.f32.mrf.mxu3  ;;  %3495 = vmatpush.msra.mxu0 %v2665_v63  ;;  %v5724_v63 = vld [vmem:[#allocation3 + $0x9a] sm:$0xff] }
 0x3d2   : > { %v2185_v22 = vadd.f32 %v5629_v8, %v2184_v43  ;;  %v5702_v43 = vld [vmem:[#allocation4 + $0x428] sm:$0xff] }
 0x3d3   : > { %3609 = vmatpush.msra.mxu1 %v5702_v43 }
 0x3d4   : > { %v2222_v52 = vmax.f32 %v2185_v22, 0.0  ;;  %v5704_v22 = vld [vmem:[#allocation3 + $0x92] sm:$0xff] }
 0x3d5   : > { %2967 = vmatmul.f32.gmra.mxu3 %v5672_v13  ;;  %3610 = vmatpush.msra.mxu1 %v5710_v45 }
 0x3d6   : > { %2255 = vst [vmem:[#allocation3 + $0x171] sm:$0xff] %v2222_v52  ;;  %3250 = vmatmul.f32.gmra.mxu1 %v2222_v52  ;;  %v2290_v52 = vld [vmem:[#allocation3 + $0x1] sm:$0xff] }
 0x3d7   : > { %3611 = vmatpush.msra.mxu1 %v5714_v6 }
 0x3d9   : > { %3612 = vmatpush.msra.mxu1 %v5719_v61 }
 0x3db   : > { %3613 = vmatpush.msra.mxu1 %v5728_v50 }
 0x3dd   : > { %2970 = vmatmul.f32.gmra.mxu3 %v5688_v31  ;;  %v2289_v59 = vld [vmem:[#allocation3 + $0x170] sm:$0xff]  ;;  %3614 = vmatpush.msra.mxu1 %v5734_v57 }
 0x3de   : > { %2804 = vmatmul.f32.gmra.mxu2 %v2289_v59  ;;  %3137 = vmatmul.f32.gmra.mxu0 %v2289_v59  ;;  %v2664_v59 = vld [vmem:[#allocation4 + $0x3a8] sm:$0xff] }
 0x3df   : > { %3496 = vmatpush.msra.mxu0 %v2664_v59  ;;  %v5736_v59 = vpop.f32.mrf.mxu1 }
 0x3e0   : > { %6551 = vst [vmem:[#allocation29_spill] sm:$0xff] %v5736_v59 }
 0x3e1   : > { %3497 = vmatpush.msra.mxu0 %v2663_v46  ;;  %v2659_v46 = vld [vmem:[#allocation4 + $0x380] sm:$0xff] }
 0x3e5   : > { %2973 = vmatmul.f32.gmra.mxu3 %v5704_v22 }
 0x3e6   : > { %2824 = vmatmul.f32.vlgmr.msrb.gmra.mxu2 %v2290_v52  ;;  %v5721_v52 = vpop.f32.mrf.mxu0 }
 0x3e7   : > { %6550 = vst [vmem:[#allocation28_spill] sm:$0xff] %v5721_v52  ;;  %v5747_v32 = vpop.f32.mrf.mxu1  ;;  %v2295_v52 = vld [vmem:[#allocation3 + $0x39] sm:$0xff] }
 0x3e8   : > { %v2187_v1 = vpop.f32.mrf.mxu3  ;;  %6554 = vst [vmem:[#allocation32_spill] sm:$0xff] %v5747_v32 }
 0x3e9   : > { %v2188_v35 = vadd.f32 %v5629_v8, %v2187_v1  ;;  %v2662_v1 = vld [vmem:[#allocation4 + $0x398] sm:$0xff] }
 0x3ea   : > { %3498 = vmatpush.msra.mxu0 %v2662_v1 }
 0x3eb   : > { %v5726_v12 = vmax.f32 %v2188_v35, 0.0  ;;  %v2660_v35 = vld [vmem:[#allocation4 + $0x388] sm:$0xff] }
 0x3ec   : > { %3499 = vmatpush.msra.mxu0 %v2661_v24  ;;  %v2639_v24 = vld [vmem:[#allocation4 + $0x2e0] sm:$0xff] }
 0x3ed   : > { %2976 = vmatmul.f32.gmra.mxu3 %v5724_v63  ;;  %2256 = vst [vmem:[#allocation3 + $0x181] sm:$0xff] %v5726_v12  ;;  %3253 = vmatmul.f32.gmra.mxu1 %v5726_v12 }
 0x3ee   : > { %2827 = vmatmul.f32.gmra.mxu2 %v2291_v16  ;;  %3500 = vmatpush.msra.mxu0 %v2660_v35  ;;  %v5744_v1 = vpop.f32.mrf.mxu0  ;;  %v2292_v16 = vld [vmem:[#allocation3 + $0x19] sm:$0xff] }
 0x3ef   : > { %6553 = vst [vmem:[#allocation31_spill] sm:$0xff] %v5744_v1  ;;  %3263 = vmatpush.msra.mxu2 %v2639_v24  ;;  %v5751_v35 = vld [vmem:[#allocation3 + $0xb2] sm:$0xff]  ;;  %v5759_v56 = vpop.f32.mrf.mxu1 }
 0x3f0   : > { %3501 = vmatpush.msra.mxu0 %v2659_v46  ;;  %v2293_v46 = vld [vmem:[#allocation3 + $0x21] sm:$0xff]  ;;  %6558 = vst [vmem:[#allocation36_spill] sm:$0xff] %v5759_v56  ;;  %v2294_v24 = vld [vmem:[#allocation3 + $0x31] sm:$0xff] }
 0x3f4   : > { %v2384_v59 = vld [vmem:[#allocation3 + $0x180] sm:$0xff] }
 0x3f5   : > { %2979 = vmatmul.f32.gmra.mxu3 %v5742_v20  ;;  %3140 = vmatmul.f32.gmra.mxu0 %v2384_v59 }
 0x3f6   : > { %2830 = vmatmul.f32.gmra.mxu2 %v2292_v16  ;;  %v5754_v38 = vpop.f32.mrf.mxu0  ;;  %v5757_v16 = vpop.f32.mrf.mxu2 }
 0x3f7   : > { %6556 = vst [vmem:[#allocation34_spill] sm:$0xff] %v5754_v38  ;;  %v5776_v38 = vpop.f32.mrf.mxu1 }
 0x3f8   : > { %6557 = vst [vmem:[#allocation35_spill] sm:$0xff] %v5757_v16  ;;  %v5774_v16 = vld [vmem:[#allocation3 + $0xca] sm:$0xff] }
 0x3f9   : > { %6561 = vst [vmem:[#allocation39_spill] sm:$0xff] %v5776_v38 }
 0x3fd   : > { %2982 = vmatmul.f32.gmra.mxu3 %v5751_v35 }
 0x3fe   : > { %2833 = vmatmul.f32.gmra.mxu2 %v2293_v46 }
 0x3ff   : > { %v2190_v1 = vpop.f32.mrf.mxu3  ;;  %v5790_v38 = vpop.f32.mrf.mxu1 }
 0x400   : > { %v2191_v59 = vadd.f32 %v5629_v8, %v2190_v1  ;;  %v2638_v8 = vld [vmem:[#allocation4 + $0x2d8] sm:$0xff]  ;;  %v5770_v1 = vpop.f32.mrf.mxu0  ;;  %6564 = vst [vmem:[#allocation42_spill] sm:$0xff] %v5790_v38 }
 0x401   : > { %6559 = vst [vmem:[#allocation37_spill] sm:$0xff] %v5770_v1  ;;  %3264 = vmatpush.msra.mxu2 %v2638_v8  ;;  %v5786_v8 = vld [vmem:[#allocation3 + $0xda] sm:$0xff] }
 0x402   : > { %v5761_v32 = vmax.f32 %v2191_v59, 0.0  ;;  %v5772_v59 = vpop.f32.mrf.mxu2  ;;  %v2637_v1 = vld [vmem:[#allocation4 + $0x2d0] sm:$0xff] }
 0x403   : > { %6560 = vst [vmem:[#allocation38_spill] sm:$0xff] %v5772_v59  ;;  %v2296_v59 = vld [vmem:[#allocation3 + $0x49] sm:$0xff]  ;;  %3265 = vmatpush.msra.mxu2 %v2637_v1  ;;  %v5808_v1 = vld [vmem:[#allocation3 + $0xf2] sm:$0xff] }
 0x404   : > { %2257 = vst [vmem:[#allocation3 + $0x189] sm:$0xff] %v5761_v32  ;;  %3256 = vmatmul.f32.gmra.mxu1 %v5761_v32 }
 0x405   : > { %2985 = vmatmul.f32.gmra.mxu3 %v5763_v47 }
 0x406   : > { %2836 = vmatmul.f32.gmra.mxu2 %v2294_v24 }
 0x407   : > { %v5768_v46 = vpop.f32.mrf.mxu3  ;;  %v5804_v38 = vpop.f32.mrf.mxu1 }
 0x408   : > { %v5784_v30 = vpop.f32.mrf.mxu0  ;;  %6567 = vst [vmem:[#allocation45_spill] sm:$0xff] %v5804_v38  ;;  %v5820_v38 = vld [vmem:[#allocation3 + $0xfa] sm:$0xff] }
 0x409   : > { %6563 = vst [vmem:[#allocation41_spill] sm:$0xff] %v5784_v30  ;;  %v5796_v30 = vld [vmem:[#allocation3 + $0xe2] sm:$0xff] }
 0x40a   : > { %v5782_v0 = vpop.f32.mrf.mxu2 }
 0x40b   : > { %v2385_v56 = vld [vmem:[#allocation3 + $0x188] sm:$0xff]  ;;  %6562 = vst [vmem:[#allocation40_spill] sm:$0xff] %v5782_v0 }
 0x40c   : > { %3143 = vmatmul.f32.gmra.mxu0 %v2385_v56  ;;  %3615 = vmatmul.f32.vlgmr.msra.gmra.mxu1 %v5623_v15  ;;  %v2653_v15 = vld [vmem:[#allocation4 + $0x350] sm:$0xff] }
 0x40d   : > { %2988 = vmatmul.f32.gmra.mxu3 %v5774_v16 }
 0x40e   : > { %2839 = vmatmul.f32.gmra.mxu2 %v2295_v52  ;;  %3378 = vmatpush.msra.mxu3 %v2653_v15  ;;  %v2298_v15 = vld [vmem:[#allocation3 + $0x61] sm:$0xff] }
 0x410   : > { %v5780_v41 = vpop.f32.mrf.mxu3  ;;  %v5798_v5 = vpop.f32.mrf.mxu0 }
 0x411   : > { %6566 = vst [vmem:[#allocation44_spill] sm:$0xff] %v5798_v5  ;;  %v2636_v5 = vld [vmem:[#allocation4 + $0x2c8] sm:$0xff] }
 0x412   : > { %v5794_v0 = vpop.f32.mrf.mxu2  ;;  %3266 = vmatpush.msra.mxu2 %v2636_v5 }
 0x413   : > { %6565 = vst [vmem:[#allocation43_spill] sm:$0xff] %v5794_v0 }
 0x414   : > { %3502 = vmatmul.f32.vlgmr.msra.gmra.mxu0 %v2294_v24  ;;  %3618 = vmatmul.f32.gmra.mxu1 %v5632_v36  ;;  %v2297_v24 = vld [vmem:[#allocation3 + $0x51] sm:$0xff] }
 0x415   : > { %2991 = vmatmul.f32.gmra.mxu3 %v5786_v8 }
 0x416   : > { %2842 = vmatmul.f32.gmra.mxu2 %v2296_v59 }
 0x418   : > { %v5792_v56 = vpop.f32.mrf.mxu3  ;;  %v5812_v0 = vpop.f32.mrf.mxu0 }
 0x419   : > { %6569 = vst [vmem:[#allocation47_spill] sm:$0xff] %v5812_v0 }
 0x41a   : > { %v5806_v27 = vpop.f32.mrf.mxu2 }
 0x41b   : > { %6568 = vst [vmem:[#allocation46_spill] sm:$0xff] %v5806_v27  ;;  %v5818_v27 = vpop.f32.mrf.mxu1 }
 0x41c   : > { %3505 = vmatmul.f32.gmra.mxu0 %v2295_v52  ;;  %3621 = vmatmul.f32.gmra.mxu1 %v5637_v55  ;;  %v2652_v55 = vld [vmem:[#allocation4 + $0x348] sm:$0xff]  ;;  %6571 = vst [vmem:[#allocation49_spill] sm:$0xff] %v5818_v27  ;;  %v2635_v27 = vld [vmem:[#allocation4 + $0x2c0] sm:$0xff] }
 0x41d   : > { %2994 = vmatmul.f32.gmra.mxu3 %v5796_v30  ;;  %3267 = vmatpush.msra.mxu2 %v2635_v27  ;;  %v5852_v27 = vld [vmem:[#allocation3 + $0x122] sm:$0xff] }
 0x41e   : > { %2845 = vmatmul.f32.gmra.mxu2 %v2297_v24  ;;  %3379 = vmatpush.msra.mxu3 %v2652_v55  ;;  %v2300_v55 = vld [vmem:[#allocation3 + $0x79] sm:$0xff] }
 0x420   : > { %v5802_v36 = vpop.f32.mrf.mxu3  ;;  %v5826_v0 = vpop.f32.mrf.mxu0 }
 0x421   : > { %6573 = vst [vmem:[#allocation51_spill] sm:$0xff] %v5826_v0 }
 0x422   : > { %v5816_v33 = vpop.f32.mrf.mxu2 }
 0x423   : > { %6570 = vst [vmem:[#allocation48_spill] sm:$0xff] %v5816_v33  ;;  %v5830_v33 = vld [vmem:[#allocation3 + $0x10a] sm:$0xff]  ;;  %v5832_v5 = vpop.f32.mrf.mxu1 }
 0x424   : > { %3508 = vmatmul.f32.gmra.mxu0 %v2296_v59  ;;  %3624 = vmatmul.f32.gmra.mxu1 %v5642_v3  ;;  %v2299_v59 = vld [vmem:[#allocation3 + $0x69] sm:$0xff]  ;;  %6575 = vst [vmem:[#allocation53_spill] sm:$0xff] %v5832_v5 }
 0x425   : > { %2997 = vmatmul.f32.gmra.mxu3 %v5808_v1 }
 0x426   : > { %2848 = vmatmul.f32.gmra.mxu2 %v2298_v15 }
 0x428   : > { %v5814_v52 = vpop.f32.mrf.mxu3 }
 0x42a   : > { %v5828_v28 = vpop.f32.mrf.mxu2 }
 0x42b   : > { %6574 = vst [vmem:[#allocation52_spill] sm:$0xff] %v5828_v28  ;;  %v5840_v28 = vpop.f32.mrf.mxu0 }
 0x42c   : > { %3511 = vmatmul.f32.gmra.mxu0 %v2297_v24  ;;  %3627 = vmatmul.f32.gmra.mxu1 %v5648_v53  ;;  %v2651_v53 = vld [vmem:[#allocation4 + $0x340] sm:$0xff]  ;;  %6578 = vst [vmem:[#allocation56_spill] sm:$0xff] %v5840_v28 }
 0x42d   : > { %3000 = vmatmul.f32.gmra.mxu3 %v5820_v38 }
 0x42e   : > { %2851 = vmatmul.f32.gmra.mxu2 %v2299_v59  ;;  %3380 = vmatpush.msra.mxu3 %v2651_v53 }
 0x430   : > { %v5824_v3 = vpop.f32.mrf.mxu3 }
 0x431   : > { %6572 = vst [vmem:[#allocation50_spill] sm:$0xff] %v5824_v3  ;;  %v5898_v3 = vld [vmem:[#allocation3 + $0x152] sm:$0xff] }
 0x432   : > { %v5838_v0 = vpop.f32.mrf.mxu2 }
 0x433   : > { %6577 = vst [vmem:[#allocation55_spill] sm:$0xff] %v5838_v0  ;;  %v5854_v53 = vpop.f32.mrf.mxu0  ;;  %v2302_v0 = vld [vmem:[#allocation3 + $0x91] sm:$0xff] }
 0x434   : > { %3514 = vmatmul.f32.gmra.mxu0 %v2298_v15  ;;  %3630 = vmatmul.f32.gmra.mxu1 %v5655_v40  ;;  %v2301_v15 = vld [vmem:[#allocation3 + $0x81] sm:$0xff]  ;;  %v5846_v40 = vpop.f32.mrf.mxu1  ;;  %6582 = vst [vmem:[#allocation60_spill] sm:$0xff] %v5854_v53 }
 0x435   : > { %3003 = vmatmul.f32.gmra.mxu3 %v5830_v33  ;;  %6579 = vst [vmem:[#allocation57_spill] sm:$0xff] %v5846_v40  ;;  %v2634_v40 = vld [vmem:[#allocation4 + $0x2b8] sm:$0xff] }
 0x436   : > { %2854 = vmatmul.f32.gmra.mxu2 %v2300_v55 }
 0x437   : > { %3268 = vmatpush.msra.mxu2 %v2634_v40  ;;  %v5876_v40 = vld [vmem:[#allocation3 + $0x13a] sm:$0xff] }
 0x438   : > { %v5836_v24 = vpop.f32.mrf.mxu3 }
 0x439   : > { %6576 = vst [vmem:[#allocation54_spill] sm:$0xff] %v5836_v24 }
 0x43a   : > { %v5850_v24 = vpop.f32.mrf.mxu2 }
 0x43b   : > { %6581 = vst [vmem:[#allocation59_spill] sm:$0xff] %v5850_v24 }
 0x43c   : > { %3517 = vmatmul.f32.gmra.mxu0 %v2299_v59  ;;  %3633 = vmatmul.f32.gmra.mxu1 %v5672_v13  ;;  %v2650_v13 = vld [vmem:[#allocation4 + $0x338] sm:$0xff]  ;;  %v5860_v28 = vpop.f32.mrf.mxu1 }
 0x43d   : > { %3006 = vmatmul.f32.gmra.mxu3 %v5842_v25  ;;  %6584 = vst [vmem:[#allocation62_spill] sm:$0xff] %v5860_v28 }
 0x43e   : > { %2857 = vmatmul.f32.gmra.mxu2 %v2301_v15  ;;  %3381 = vmatpush.msra.mxu3 %v2650_v13  ;;  %v2304_v13 = vld [vmem:[#allocation3 + $0xa9] sm:$0xff] }
 0x440   : > { %v5848_v5 = vpop.f32.mrf.mxu3 }
 0x441   : > { %6580 = vst [vmem:[#allocation58_spill] sm:$0xff] %v5848_v5  ;;  %v5864_v5 = vld [vmem:[#allocation3 + $0x12a] sm:$0xff] }
 0x442   : > { %v5862_v24 = vpop.f32.mrf.mxu2 }
 0x443   : > { %6585 = vst [vmem:[#allocation63_spill] sm:$0xff] %v5862_v24  ;;  %v2649_v24 = vld [vmem:[#allocation4 + $0x330] sm:$0xff] }
 0x444   : > { %3520 = vmatmul.f32.gmra.mxu0 %v2300_v55  ;;  %3636 = vmatmul.f32.gmra.mxu1 %v5688_v31  ;;  %v2303_v55 = vld [vmem:[#allocation3 + $0x99] sm:$0xff]  ;;  %v5868_v31 = vpop.f32.mrf.mxu0  ;;  %v5874_v28 = vpop.f32.mrf.mxu1 }
 0x445   : > { %3009 = vmatmul.f32.gmra.mxu3 %v5852_v27  ;;  %6586 = vst [vmem:[#allocation64_spill] sm:$0xff] %v5868_v31  ;;  %v2648_v31 = vld [vmem:[#allocation4 + $0x328] sm:$0xff] }
 0x446   : > { %2860 = vmatmul.f32.gmra.mxu2 %v2302_v0  ;;  %6589 = vst [vmem:[#allocation67_spill] sm:$0xff] %v5874_v28  ;;  %3382 = vmatpush.msra.mxu3 %v2649_v24  ;;  %v2647_v28 = vld [vmem:[#allocation4 + $0x320] sm:$0xff] }
 0x448   : > { %v5858_v59 = vpop.f32.mrf.mxu3  ;;  %3383 = vmatpush.msra.mxu3 %v2648_v31  ;;  %v2644_v31 = vld [vmem:[#allocation4 + $0x308] sm:$0xff] }
 0x449   : > { %6583 = vst [vmem:[#allocation61_spill] sm:$0xff] %v5858_v59 }
 0x44a   : > { %v5872_v59 = vpop.f32.mrf.mxu2  ;;  %3384 = vmatpush.msra.mxu3 %v2647_v28 }
 0x44b   : > { %6588 = vst [vmem:[#allocation66_spill] sm:$0xff] %v5872_v59 }
 0x44c   : > { %3523 = vmatmul.f32.gmra.mxu0 %v2301_v15  ;;  %3639 = vmatmul.f32.gmra.mxu1 %v5704_v22  ;;  %v5880_v15 = vpop.f32.mrf.mxu0 }
 0x44d   : > { %3012 = vmatmul.f32.gmra.mxu3 %v5864_v5  ;;  %6590 = vst [vmem:[#allocation68_spill] sm:$0xff] %v5880_v15  ;;  %v2305_v15 = vld [vmem:[#allocation3 + $0xb1] sm:$0xff] }
 0x44e   : > { %2863 = vmatmul.f32.gmra.mxu2 %v2303_v55 }
 0x450   : > { %v5870_v53 = vpop.f32.mrf.mxu3 }
 0x451   : > { %6587 = vst [vmem:[#allocation65_spill] sm:$0xff] %v5870_v53  ;;  %v2633_v53 = vld [vmem:[#allocation4 + $0x2b0] sm:$0xff] }
 0x452   : > { %3269 = vmatpush.msra.mxu2 %v2633_v53  ;;  %v5884_v59 = vpop.f32.mrf.mxu2  ;;  %v2645_v53 = vld [vmem:[#allocation4 + $0x310] sm:$0xff] }
 0x453   : > { %6592 = vst [vmem:[#allocation70_spill] sm:$0xff] %v5884_v59 }
 0x454   : > { %3526 = vmatmul.f32.gmra.mxu0 %v2302_v0  ;;  %3642 = vmatmul.f32.gmra.mxu1 %v5724_v63  ;;  %v5888_v0 = vpop.f32.mrf.mxu1  ;;  %v2646_v63 = vld [vmem:[#allocation4 + $0x318] sm:$0xff] }
 0x455   : > { %3015 = vmatmul.f32.gmra.mxu3 %v5876_v40  ;;  %6593 = vst [vmem:[#allocation71_spill] sm:$0xff] %v5888_v0  ;;  %v2643_v0 = vld [vmem:[#allocation4 + $0x300] sm:$0xff] }
 0x456   : > { %2866 = vmatmul.f32.gmra.mxu2 %v2304_v13  ;;  %3385 = vmatpush.msra.mxu3 %v2646_v63 }
 0x458   : > { %v5882_v22 = vpop.f32.mrf.mxu3  ;;  %3386 = vmatpush.msra.mxu3 %v2645_v53 }
 0x459   : > { %6591 = vst [vmem:[#allocation69_spill] sm:$0xff] %v5882_v22  ;;  %v5892_v22 = vpop.f32.mrf.mxu0 }
 0x45a   : > { %6594 = vst [vmem:[#allocation72_spill] sm:$0xff] %v5892_v22  ;;  %3387 = vmatpush.msra.mxu3 %v2644_v31  ;;  %v2632_v31 = vld [vmem:[#allocation4 + $0x2a8] sm:$0xff]  ;;  %v2463_v22 = vld [vmem:[#allocation3 + $0xc0] sm:$0xff] }
 0x45b   : > { %3270 = vmatpush.msra.mxu2 %v2632_v31  ;;  %v5928_v31 = vld [vmem:[#allocation3 + $0x16a] sm:$0xff] }
 0x45c   : > { %3529 = vmatmul.f32.gmra.mxu0 %v2303_v55  ;;  %3645 = vmatmul.f32.gmra.mxu1 %v5742_v20  ;;  %v2306_v20 = vld [vmem:[#allocation3 + $0xc1] sm:$0xff]  ;;  %v5904_v55 = vpop.f32.mrf.mxu1 }
 0x45d   : > { %3018 = vmatmul.f32.gmra.mxu3 %v5886_v34  ;;  %6596 = vst [vmem:[#allocation74_spill] sm:$0xff] %v5904_v55  ;;  %v2317_v55 = vld [vmem:[#allocation3 + $0x141] sm:$0xff] }
 0x45e   : > { %2869 = vmatmul.f32.gmra.mxu2 %v2305_v15  ;;  %3388 = vmatpush.msra.mxu3 %v2643_v0 }
 0x460   : > { %v5894_v24 = vpop.f32.mrf.mxu3  ;;  %3936 = vmatpush.msrb.mxu3 %v5658_v37 }
 0x461   : > { %v5896_v59 = vpop.f32.mrf.mxu2  ;;  %v5902_v28 = vpop.f32.mrf.mxu0 }
 0x462   : > { %6595 = vst [vmem:[#allocation73_spill] sm:$0xff] %v5902_v28  ;;  %3937 = vmatpush.msrb.mxu3 %v5661_v51 }
 0x464   : > { %3532 = vmatmul.f32.gmra.mxu0 %v2304_v13  ;;  %3648 = vmatmul.f32.gmra.mxu1 %v5751_v35  ;;  %v5913_v13 = vld [vmem:[#allocation3 + $0x15a] sm:$0xff]  ;;  %v2307_v35 = vld [vmem:[#allocation3 + $0xc9] sm:$0xff]  ;;  %v5920_v0 = vpop.f32.mrf.mxu1 }
 0x465   : > { %3021 = vmatmul.f32.gmra.mxu3 %v5898_v3  ;;  %6599 = vst [vmem:[#allocation77_spill] sm:$0xff] %v5920_v0  ;;  %v2315_v0 = vld [vmem:[#allocation3 + $0x129] sm:$0xff] }
 0x466   : > { %2872 = vmatmul.f32.gmra.mxu2 %v2306_v20  ;;  %3938 = vmatpush.msrb.mxu3 %v5666_v26 }
 0x468   : > { %v5907_v63 = vpop.f32.mrf.mxu3  ;;  %3939 = vmatpush.msrb.mxu3 %v5670_v49  ;;  %v2308_v49 = vld [vmem:[#allocation3 + $0xd9] sm:$0xff] }
 0x469   : > { %6597 = vst [vmem:[#allocation75_spill] sm:$0xff] %v5907_v63  ;;  %v5910_v53 = vpop.f32.mrf.mxu2  ;;  %v5918_v37 = vpop.f32.mrf.mxu0 }
 0x46a   : > { %6598 = vst [vmem:[#allocation76_spill] sm:$0xff] %v5918_v37  ;;  %3940 = vmatpush.msrb.mxu3 %v5676_v44  ;;  %v2318_v37 = vld [vmem:[#allocation3 + $0x151] sm:$0xff] }
 0x46c   : > { %3535 = vmatmul.f32.gmra.mxu0 %v2305_v15  ;;  %3651 = vmatmul.f32.gmra.mxu1 %v5763_v47  ;;  %v5936_v15 = vpop.f32.mrf.mxu1 }
 0x46d   : > { %3024 = vmatmul.f32.gmra.mxu3 %v5913_v13  ;;  %6602 = vst [vmem:[#allocation80_spill] sm:$0xff] %v5936_v15 }
 0x46e   : > { %2875 = vmatmul.f32.gmra.mxu2 %v2307_v35  ;;  %3941 = vmatpush.msrb.mxu3 %v5680_v14 }
 0x470   : > { %v5922_v51 = vpop.f32.mrf.mxu3  ;;  %3942 = vmatpush.msrb.mxu3 %v5683_v58  ;;  %v2631_v58 = vld [vmem:[#allocation4 + $0x2a0] sm:$0xff] }
 0x471   : > { %6600 = vst [vmem:[#allocation78_spill] sm:$0xff] %v5922_v51  ;;  %v5925_v26 = vpop.f32.mrf.mxu2  ;;  %v5934_v47 = vpop.f32.mrf.mxu0  ;;  %3271 = vmatpush.msra.mxu2 %v2631_v58 }
 0x472   : > { %3943 = vmatpush.msrb.mxu3 %v5692_v54  ;;  %6601 = vst [vmem:[#allocation79_spill] sm:$0xff] %v5934_v47  ;;  %v2309_v54 = vld [vmem:[#allocation3 + $0xe1] sm:$0xff]  ;;  %v2316_v47 = vld [vmem:[#allocation3 + $0x139] sm:$0xff] }
 0x474   : > { %3538 = vmatmul.f32.gmra.mxu0 %v2306_v20  ;;  %3654 = vmatmul.f32.gmra.mxu1 %v5774_v16  ;;  %v5944_v20 = vld [vmem:[#allocation3 + $0x172] sm:$0xff] }
 0x475   : > { %3027 = vmatmul.f32.gmra.mxu3 %v5928_v31 }
 0x476   : > { %2878 = vmatmul.f32.gmra.mxu2 %v2308_v49  ;;  %3944 = vmatpush.msrb.mxu3 %v5694_v62  ;;  %v5952_v62 = vpop.f32.mrf.mxu1 }
 0x477   : > { %6605 = vst [vmem:[#allocation83_spill] sm:$0xff] %v5952_v62  ;;  %v2452_v62 = vld [vmem:[#allocation3 + $0x38] sm:$0xff] }
 0x478   : > { %v5938_v44 = vpop.f32.mrf.mxu3  ;;  %3945 = vmatpush.msrb.mxu3 %v5699_v4 }
 0x479   : > { %6603 = vst [vmem:[#allocation81_spill] sm:$0xff] %v5938_v44  ;;  %v5941_v14 = vpop.f32.mrf.mxu2  ;;  %v5950_v16 = vpop.f32.mrf.mxu0  ;;  %v2430_v44 = vld [vmem:[#allocation3 + $0xaa] sm:$0xff] }
 0x47a   : > { %3946 = vmatpush.msrb.mxu3 %v5702_v43  ;;  %6604 = vst [vmem:[#allocation82_spill] sm:$0xff] %v5950_v16  ;;  %v2451_v43 = vld [vmem:[#allocation3 + $0x30] sm:$0xff] }
 0x47b   : > { %v2313_v16 = vld [vmem:[#allocation3 + $0x111] sm:$0xff] }
 0x47c   : > { %3541 = vmatmul.f32.gmra.mxu0 %v2307_v35  ;;  %3657 = vmatmul.f32.gmra.mxu1 %v5786_v8  ;;  %v2310_v8 = vld [vmem:[#allocation3 + $0xf1] sm:$0xff] }
 0x47d   : > { %3030 = vmatmul.f32.gmra.mxu3 %v5944_v20 }
 0x47e   : > { %3947 = vmatpush.msrb.mxu3 %v5710_v45  ;;  %2881 = vmatmul.f32.gmra.mxu2 %v2309_v54  ;;  %v5965_v35 = vpop.f32.mrf.mxu1 }
 0x47f   : > { %6608 = vst [vmem:[#allocation86_spill] sm:$0xff] %v5965_v35  ;;  %v2453_v35 = vld [vmem:[#allocation3 + $0x48] sm:$0xff] }
 0x480   : > { %v5954_v15 = vpop.f32.mrf.mxu3  ;;  %3948 = vmatpush.msrb.mxu3 %v5714_v6 }
 0x481   : > { %6606 = vst [vmem:[#allocation84_spill] sm:$0xff] %v5954_v15  ;;  %v5957_v4 = vpop.f32.mrf.mxu2  ;;  %v5963_v45 = vpop.f32.mrf.mxu0  ;;  %v2467_v15 = vld [vmem:[#allocation3 + $0xf0] sm:$0xff] }
 0x482   : > { %3949 = vmatpush.msrb.mxu3 %v5719_v61  ;;  %6607 = vst [vmem:[#allocation85_spill] sm:$0xff] %v5963_v45  ;;  %v2630_v61 = vld [vmem:[#allocation4 + $0x298] sm:$0xff] }
 0x483   : > { %3272 = vmatpush.msra.mxu2 %v2630_v61  ;;  %v2312_v45 = vld [vmem:[#allocation3 + $0x109] sm:$0xff]  ;;  %v2629_v61 = vld [vmem:[#allocation4 + $0x290] sm:$0xff] }
 0x484   : > { %3950 = vmatpush.msrb.mxu3 %v5728_v50  ;;  %3544 = vmatmul.f32.gmra.mxu0 %v2308_v49  ;;  %v2311_v50 = vld [vmem:[#allocation3 + $0xf9] sm:$0xff] }
 0x485   : > { %3389 = vmatmul.f32.vlgmr.msra.gmra.mxu3 %v2451_v43  ;;  %3660 = vmatmul.f32.gmra.mxu1 %v5796_v30 }
 0x486   : > { %3951 = vmatpush.msrb.mxu3 %v5734_v57  ;;  %2884 = vmatmul.f32.gmra.mxu2 %v2310_v8  ;;  %v5974_v57 = vpop.f32.mrf.mxu1 }
 0x487   : > { %6611 = vst [vmem:[#allocation89_spill] sm:$0xff] %v5974_v57  ;;  %3273 = vmatpush.msra.mxu2 %v2629_v61  ;;  %v2314_v61 = vld [vmem:[#allocation3 + $0x121] sm:$0xff] }
 0x488   : > { %v5967_v6 = vpop.f32.mrf.mxu3 }
 0x489   : > { %6609 = vst [vmem:[#allocation87_spill] sm:$0xff] %v5967_v6  ;;  %v5969_v58 = vpop.f32.mrf.mxu2  ;;  %v5972_v30 = vpop.f32.mrf.mxu0 }
 0x48a   : > { %6610 = vst [vmem:[#allocation88_spill] sm:$0xff] %v5972_v30  ;;  %v2454_v30 = vld [vmem:[#allocation3 + $0x50] sm:$0xff] }
 0x48c   : > { %3547 = vmatmul.f32.gmra.mxu0 %v2309_v54 }
 0x48d   : > { %3392 = vmatmul.f32.gmra.mxu3 %v2452_v62  ;;  %3663 = vmatmul.f32.gmra.mxu1 %v5808_v1 }
 0x48e   : > { %2887 = vmatmul.f32.gmra.mxu2 %v2311_v50  ;;  %v5983_v54 = vpop.f32.mrf.mxu1 }
 0x48f   : > { %6614 = vst [vmem:[#allocation92_spill] sm:$0xff] %v5983_v54  ;;  %v2455_v54 = vld [vmem:[#allocation3 + $0x60] sm:$0xff] }
 0x490   : > { %v5976_v49 = vpop.f32.mrf.mxu3 }
 0x491   : > { %6612 = vst [vmem:[#allocation90_spill] sm:$0xff] %v5976_v49  ;;  %v5978_v43 = vpop.f32.mrf.mxu2  ;;  %v5981_v62 = vpop.f32.mrf.mxu0  ;;  %v2419_v49 = vld [vmem:[#allocation3 + $0x22] sm:$0xff] }
 0x492   : > { %6613 = vst [vmem:[#allocation91_spill] sm:$0xff] %v5981_v62 }
 0x494   : > { %3550 = vmatmul.f32.gmra.mxu0 %v2310_v8 }
 0x495   : > { %3395 = vmatmul.f32.gmra.mxu3 %v2453_v35  ;;  %3666 = vmatmul.f32.gmra.mxu1 %v5820_v38 }
 0x496   : > { %2890 = vmatmul.f32.gmra.mxu2 %v2312_v45  ;;  %v5992_v38 = vpop.f32.mrf.mxu1 }
 0x497   : > { %6617 = vst [vmem:[#allocation95_spill] sm:$0xff] %v5992_v38  ;;  %v2456_v38 = vld [vmem:[#allocation3 + $0x68] sm:$0xff] }
 0x498   : > { %v5987_v57 = vpop.f32.mrf.mxu3 }
 0x499   : > { %v5985_v1 = vpop.f32.mrf.mxu2  ;;  %6615 = vst [vmem:[#allocation93_spill] sm:$0xff] %v5987_v57  ;;  %v5990_v8 = vpop.f32.mrf.mxu0  ;;  %v2464_v57 = vld [vmem:[#allocation3 + $0xc8] sm:$0xff] }
 0x49a   : > { %6616 = vst [vmem:[#allocation94_spill] sm:$0xff] %v5990_v8  ;;  %v2628_v8 = vld [vmem:[#allocation4 + $0x288] sm:$0xff] }
 0x49b   : > { %3274 = vmatpush.msra.mxu2 %v2628_v8 }
 0x49c   : > { %3553 = vmatmul.f32.gmra.mxu0 %v2311_v50 }
 0x49d   : > { %3398 = vmatmul.f32.gmra.mxu3 %v2454_v30  ;;  %3669 = vmatmul.f32.gmra.mxu1 %v5830_v33 }
 0x49e   : > { %2893 = vmatmul.f32.gmra.mxu2 %v2313_v16  ;;  %v6001_v50 = vpop.f32.mrf.mxu1 }
 0x49f   : > { %6620 = vst [vmem:[#allocation98_spill] sm:$0xff] %v6001_v50  ;;  %v2457_v50 = vld [vmem:[#allocation3 + $0x78] sm:$0xff] }
 0x4a0   : > { %v5996_v62 = vpop.f32.mrf.mxu3 }
 0x4a1   : > { %v5994_v35 = vpop.f32.mrf.mxu2  ;;  %6618 = vst [vmem:[#allocation96_spill] sm:$0xff] %v5996_v62  ;;  %v5999_v30 = vpop.f32.mrf.mxu0 }
 0x4a2   : > { %6619 = vst [vmem:[#allocation97_spill] sm:$0xff] %v5999_v30 }
 0x4a4   : > { %3556 = vmatmul.f32.gmra.mxu0 %v2312_v45 }
 0x4a5   : > { %3401 = vmatmul.f32.gmra.mxu3 %v2455_v54  ;;  %3672 = vmatmul.f32.gmra.mxu1 %v5842_v25 }
 0x4a6   : > { %2896 = vmatmul.f32.gmra.mxu2 %v2314_v61  ;;  %v6008_v54 = vpop.f32.mrf.mxu1 }
 0x4a7   : > { %6622 = vst [vmem:[#allocation100_spill] sm:$0xff] %v6008_v54  ;;  %v2627_v54 = vld [vmem:[#allocation4 + $0x280] sm:$0xff] }
 0x4a8   : > { %v6010_v25 = vpop.f32.mrf.mxu3  ;;  %3275 = vmatpush.msra.mxu2 %v2627_v54 }
 0x4a9   : > { %v6003_v33 = vpop.f32.mrf.mxu2  ;;  %v6006_v45 = vpop.f32.mrf.mxu0  ;;  %6623 = vst [vmem:[#allocation101_spill] sm:$0xff] %v6010_v25 }
 0x4aa   : > { %6621 = vst [vmem:[#allocation99_spill] sm:$0xff] %v6006_v45  ;;  %v2458_v45 = vld [vmem:[#allocation3 + $0x80] sm:$0xff] }
 0x4ac   : > { %3559 = vmatmul.f32.gmra.mxu0 %v2313_v16 }
 0x4ad   : > { %3404 = vmatmul.f32.gmra.mxu3 %v2456_v38  ;;  %3675 = vmatmul.f32.gmra.mxu1 %v5852_v27 }
 0x4ae   : > { %2899 = vmatmul.f32.gmra.mxu2 %v2315_v0  ;;  %v6017_v16 = vpop.f32.mrf.mxu1 }
 0x4af   : > { %6625 = vst [vmem:[#allocation103_spill] sm:$0xff] %v6017_v16 }
 0x4b0   : > { %v6019_v27 = vpop.f32.mrf.mxu3 }
 0x4b1   : > { %v6012_v30 = vpop.f32.mrf.mxu2  ;;  %v6015_v8 = vpop.f32.mrf.mxu0  ;;  %6626 = vst [vmem:[#allocation104_spill] sm:$0xff] %v6019_v27  ;;  %v2319_v27 = vld [vmem:[#allocation3 + $0x159] sm:$0xff] }
 0x4b2   : > { %6624 = vst [vmem:[#allocation102_spill] sm:$0xff] %v6015_v8  ;;  %v2459_v8 = vld [vmem:[#allocation3 + $0x90] sm:$0xff] }
 0x4b4   : > { %3562 = vmatmul.f32.gmra.mxu0 %v2314_v61 }
 0x4b5   : > { %3407 = vmatmul.f32.gmra.mxu3 %v2457_v50  ;;  %3678 = vmatmul.f32.gmra.mxu1 %v5864_v5 }
 0x4b6   : > { %2902 = vmatmul.f32.gmra.mxu2 %v2316_v47  ;;  %v6028_v50 = vpop.f32.mrf.mxu1 }
 0x4b8   : > { %v6030_v16 = vpop.f32.mrf.mxu3 }
 0x4b9   : > { %v6021_v38 = vpop.f32.mrf.mxu2  ;;  %v6024_v61 = vpop.f32.mrf.mxu0  ;;  %6628 = vst [vmem:[#allocation106_spill] sm:$0xff] %v6030_v16  ;;  %v2320_v16 = vld [vmem:[#allocation3 + $0x169] sm:$0xff] }
 0x4ba   : > { %6627 = vst [vmem:[#allocation105_spill] sm:$0xff] %v6024_v61 }
 0x4bc   : > { %3565 = vmatmul.f32.gmra.mxu0 %v2315_v0 }
 0x4bd   : > { %3410 = vmatmul.f32.gmra.mxu3 %v2458_v45  ;;  %3681 = vmatmul.f32.gmra.mxu1 %v5876_v40  ;;  %v2460_v40 = vld [vmem:[#allocation3 + $0x98] sm:$0xff] }
 0x4be   : > { %2905 = vmatmul.f32.gmra.mxu2 %v2317_v55  ;;  %v6037_v54 = vpop.f32.mrf.mxu1 }
 0x4c0   : > { %v6039_v61 = vpop.f32.mrf.mxu3 }
 0x4c1   : > { %v6026_v5 = vpop.f32.mrf.mxu2  ;;  %v6035_v45 = vpop.f32.mrf.mxu0  ;;  %6629 = vst [vmem:[#allocation107_spill] sm:$0xff] %v6039_v61  ;;  %v2462_v61 = vld [vmem:[#allocation3 + $0xb0] sm:$0xff] }
 0x4c4   : > { %3568 = vmatmul.f32.gmra.mxu0 %v2316_v47 }
 0x4c5   : > { %3413 = vmatmul.f32.gmra.mxu3 %v2459_v8  ;;  %3684 = vmatmul.f32.gmra.mxu1 %v5886_v34  ;;  %v2461_v8 = vld [vmem:[#allocation3 + $0xa8] sm:$0xff] }
 0x4c6   : > { %2908 = vmatmul.f32.gmra.mxu2 %v2318_v37  ;;  %v6047_v28 = vpop.f32.mrf.mxu1 }
 0x4c9   : > { %v6033_v0 = vpop.f32.mrf.mxu2  ;;  %v6044_v34 = vpop.f32.mrf.mxu0 }
 0x4cc   : > { %3571 = vmatmul.f32.gmra.mxu0 %v2317_v55  ;;  %v6049_v55 = vpop.f32.mrf.mxu3 }
 0x4cd   : > { %3416 = vmatmul.f32.gmra.mxu3 %v2460_v40  ;;  %3687 = vmatmul.f32.gmra.mxu1 %v5898_v3  ;;  %6631 = vst [vmem:[#allocation109_spill] sm:$0xff] %v6049_v55  ;;  %v2321_v3 = vld [vmem:[#allocation3 + $0x171] sm:$0xff]  ;;  %v2418_v55 = vld [vmem:[#allocation3 + $0x1a] sm:$0xff] }
 0x4ce   : > { %2911 = vmatmul.f32.gmra.mxu2 %v2319_v27 }
 0x4d1   : > { %v6042_v47 = vpop.f32.mrf.mxu2  ;;  %v6054_v25 = vpop.f32.mrf.mxu0 }
 0x4d2   : > { %6630 = vst [vmem:[#allocation108_spill] sm:$0xff] %v6042_v47 }
 0x4d4   : > { %3574 = vmatmul.f32.gmra.mxu0 %v2318_v37  ;;  %v6056_v37 = vpop.f32.mrf.mxu1 }
 0x4d5   : > { %3419 = vmatmul.f32.gmra.mxu3 %v2461_v8  ;;  %3690 = vmatmul.f32.gmra.mxu1 %v5913_v13  ;;  %v6058_v8 = vpop.f32.mrf.mxu3 }
 0x4d6   : > { %2914 = vmatmul.f32.gmra.mxu2 %v2320_v16  ;;  %6633 = vst [vmem:[#allocation111_spill] sm:$0xff] %v6058_v8  ;;  %v6071_v8 = vld [vmem:[#allocation3 + $0x182] sm:$0xff] }
 0x4d7   : > { %6637 = vst [vmem:[#allocation115_spill] sm:$0xff] %v6071_v8 }
 0x4d9   : > { %v6051_v40 = vpop.f32.mrf.mxu2 }
 0x4da   : > { %6632 = vst [vmem:[#allocation110_spill] sm:$0xff] %v6051_v40 }
 0x4dc   : > { %3577 = vmatmul.f32.gmra.mxu0 %v2319_v27  ;;  %v6063_v27 = vpop.f32.mrf.mxu0 }
 0x4dd   : > { %3422 = vmatmul.f32.gmra.mxu3 %v2462_v61  ;;  %3693 = vmatmul.f32.gmra.mxu1 %v5928_v31  ;;  %v6067_v31 = vpop.f32.mrf.mxu1  ;;  %v6069_v62 = vpop.f32.mrf.mxu3 }
 0x4de   : > { %2917 = vmatmul.f32.gmra.mxu2 %v2321_v3  ;;  %6636 = vst [vmem:[#allocation114_spill] sm:$0xff] %v6069_v62 }
 0x4e1   : > { %v6060_v13 = vpop.f32.mrf.mxu2 }
 0x4e2   : > { %6634 = vst [vmem:[#allocation112_spill] sm:$0xff] %v6060_v13  ;;  %v2429_v13 = vld [vmem:[#allocation3 + $0x9a] sm:$0xff] }
 0x4e4   : > { %3580 = vmatmul.f32.gmra.mxu0 %v2320_v16  ;;  %v2465_v16 = vld [vmem:[#allocation3 + $0xd8] sm:$0xff] }
 0x4e5   : > { %3425 = vmatmul.f32.gmra.mxu3 %v2463_v22  ;;  %3696 = vmatmul.f32.gmra.mxu1 %v5944_v20  ;;  %v6076_v20 = vpop.f32.mrf.mxu0  ;;  %v6081_v62 = vpop.f32.mrf.mxu1 }
 0x4e6   : > { %3276 = vmatmul.f32.vlgmr.msra.gmra.mxu2 %v2418_v55  ;;  %v6079_v55 = vld [vmem:[#allocation3 + $0x18a] sm:$0xff] }
 0x4e7   : > { %6639 = vst [vmem:[#allocation117_spill] sm:$0xff] %v6079_v55 }
 0x4e9   : > { %v6065_v61 = vpop.f32.mrf.mxu2 }
 0x4ea   : > { %6635 = vst [vmem:[#allocation113_spill] sm:$0xff] %v6065_v61 }
 0x4ec   : > { %3583 = vmatmul.f32.gmra.mxu0 %v2321_v3  ;;  %v2420_v3 = vld [vmem:[#allocation3 + $0x32] sm:$0xff] }
 0x4ed   : > { %3428 = vmatmul.f32.gmra.mxu3 %v2464_v57  ;;  %3699 = vmatmul.f32.gmra.mxu1 %v6071_v8  ;;  %v6083_v57 = vpop.f32.mrf.mxu3  ;;  %v2423_v8 = vld [vmem:[#allocation3 + $0x52] sm:$0xff] }
 0x4ee   : > { %3279 = vmatmul.f32.gmra.mxu2 %v2419_v49  ;;  %6640 = vst [vmem:[#allocation118_spill] sm:$0xff] %v6083_v57  ;;  %v2466_v49 = vld [vmem:[#allocation3 + $0xe0] sm:$0xff]  ;;  %v2422_v57 = vld [vmem:[#allocation3 + $0x4a] sm:$0xff] }
 0x4f1   : > { %v6074_v22 = vpop.f32.mrf.mxu2 }
 0x4f2   : > { %6638 = vst [vmem:[#allocation116_spill] sm:$0xff] %v6074_v22  ;;  %v6088_v22 = vpop.f32.mrf.mxu0 }
 0x4f4   : > { %3586 = vmatmul.f32.gmra.mxu0 %v5726_v12 }
 0x4f5   : > { %3431 = vmatmul.f32.gmra.mxu3 %v2465_v16  ;;  %3702 = vmatmul.f32.gmra.mxu1 %v6079_v55  ;;  %v2421_v16 = vld [vmem:[#allocation3 + $0x3a] sm:$0xff]  ;;  %v6091_v12 = vpop.f32.mrf.mxu3 }
 0x4f6   : > { %3282 = vmatmul.f32.gmra.mxu2 %v2420_v3  ;;  %6642 = vst [vmem:[#allocation120_spill] sm:$0xff] %v6091_v12  ;;  %v2424_v12 = vld [vmem:[#allocation3 + $0x62] sm:$0xff] }
 0x4f9   : > { %v6086_v6 = vpop.f32.mrf.mxu2 }
 0x4fa   : > { %6641 = vst [vmem:[#allocation119_spill] sm:$0xff] %v6086_v6  ;;  %v2468_v6 = vld [vmem:[#allocation3 + $0xf8] sm:$0xff] }
 0x4fc   : > { %3589 = vmatmul.f32.gmra.mxu0 %v5761_v32 }
 0x4fd   : > { %3434 = vmatmul.f32.gmra.mxu3 %v2466_v49  ;;  %v6095_v55 = vpop.f32.mrf.mxu3 }
 0x4fe   : > { %3285 = vmatmul.f32.gmra.mxu2 %v2421_v16  ;;  %6644 = vst [vmem:[#allocation122_spill] sm:$0xff] %v6095_v55  ;;  %v2469_v16 = vld [vmem:[#allocation3 + $0x108] sm:$0xff] }
 0x4ff   : > { %v2425_v55 = vld [vmem:[#allocation3 + $0x6a] sm:$0xff] }
 0x501   : > { %v6093_v61 = vpop.f32.mrf.mxu2 }
 0x502   : > { %6643 = vst [vmem:[#allocation121_spill] sm:$0xff] %v6093_v61 }
 0x505   : > { %3437 = vmatmul.f32.gmra.mxu3 %v2467_v15  ;;  %v6101_v32 = vpop.f32.mrf.mxu3  ;;  %v2470_v15 = vld [vmem:[#allocation3 + $0x110] sm:$0xff] }
 0x506   : > { %3288 = vmatmul.f32.gmra.mxu2 %v2422_v57  ;;  %6647 = vst [vmem:[#allocation125_spill] sm:$0xff] %v6101_v32 }
 0x509   : > { %v6097_v3 = vpop.f32.mrf.mxu2 }
 0x50a   : > { %6645 = vst [vmem:[#allocation123_spill] sm:$0xff] %v6097_v3 }
 0x50d   : > { %3440 = vmatmul.f32.gmra.mxu3 %v2468_v6  ;;  %v6105_v57 = vpop.f32.mrf.mxu3  ;;  %v2471_v6 = vld [vmem:[#allocation3 + $0x120] sm:$0xff] }
 0x50e   : > { %3291 = vmatmul.f32.gmra.mxu2 %v2423_v8  ;;  %6649 = vst [vmem:[#allocation127_spill] sm:$0xff] %v6105_v57  ;;  %v2426_v8 = vld [vmem:[#allocation3 + $0x7a] sm:$0xff] }
 0x50f   : > { %v2473_v57 = vld [vmem:[#allocation3 + $0x138] sm:$0xff] }
 0x511   : > { %v6099_v49 = vpop.f32.mrf.mxu2 }
 0x512   : > { %6646 = vst [vmem:[#allocation124_spill] sm:$0xff] %v6099_v49 }
 0x515   : > { %3443 = vmatmul.f32.gmra.mxu3 %v2469_v16  ;;  %v6109_v49 = vpop.f32.mrf.mxu3  ;;  %v2472_v16 = vld [vmem:[#allocation3 + $0x128] sm:$0xff] }
 0x516   : > { %3294 = vmatmul.f32.gmra.mxu2 %v2424_v12  ;;  %v2427_v12 = vld [vmem:[#allocation3 + $0x82] sm:$0xff] }
 0x519   : > { %v6103_v61 = vpop.f32.mrf.mxu2 }
 0x51a   : > { %6648 = vst [vmem:[#allocation126_spill] sm:$0xff] %v6103_v61 }
 0x51d   : > { %3446 = vmatmul.f32.gmra.mxu3 %v2470_v15  ;;  %v6113_v61 = vpop.f32.mrf.mxu3 }
 0x51e   : > { %3297 = vmatmul.f32.gmra.mxu2 %v2425_v55  ;;  %v2428_v55 = vld [vmem:[#allocation3 + $0x92] sm:$0xff] }
 0x521   : > { %v6107_v3 = vpop.f32.mrf.mxu2 }
 0x522   : > { %6650 = vst [vmem:[#allocation128_spill] sm:$0xff] %v6107_v3 }
 0x525   : > { %3449 = vmatmul.f32.gmra.mxu3 %v2471_v6  ;;  %v6119_v6 = vpop.f32.mrf.mxu3 }
 0x526   : > { %3300 = vmatmul.f32.gmra.mxu2 %v2426_v8  ;;  %v2474_v8 = vld [vmem:[#allocation3 + $0x140] sm:$0xff] }
 0x529   : > { %v6111_v32 = vpop.f32.mrf.mxu2 }
 0x52a   : > { %6651 = vst [vmem:[#allocation129_spill] sm:$0xff] %v6111_v32 }
 0x52d   : > { %3452 = vmatmul.f32.gmra.mxu3 %v2472_v16  ;;  %v2475_v16 = vld [vmem:[#allocation3 + $0x150] sm:$0xff] }
 0x52e   : > { %3303 = vmatmul.f32.gmra.mxu2 %v2427_v12  ;;  %v6123_v12 = vpop.f32.mrf.mxu3 }
 0x531   : > { %v6115_v15 = vpop.f32.mrf.mxu2 }
 0x532   : > { %6652 = vst [vmem:[#allocation130_spill] sm:$0xff] %v6115_v15 }
 0x535   : > { %3455 = vmatmul.f32.gmra.mxu3 %v2473_v57  ;;  %v2476_v57 = vld [vmem:[#allocation3 + $0x158] sm:$0xff] }
 0x536   : > { %3306 = vmatmul.f32.gmra.mxu2 %v2428_v55  ;;  %v2431_v55 = vld [vmem:[#allocation3 + $0xb2] sm:$0xff] }
 0x539   : > { %v6117_v3 = vpop.f32.mrf.mxu2 }
 0x53a   : > { %6653 = vst [vmem:[#allocation131_spill] sm:$0xff] %v6117_v3  ;;  %v6127_v3 = vpop.f32.mrf.mxu3 }
 0x53d   : > { %3458 = vmatmul.f32.gmra.mxu3 %v2474_v8  ;;  %v2477_v8 = vld [vmem:[#allocation3 + $0x168] sm:$0xff] }
 0x53e   : > { %3309 = vmatmul.f32.gmra.mxu2 %v2429_v13  ;;  %v2432_v13 = vld [vmem:[#allocation3 + $0xc2] sm:$0xff] }
 0x541   : > { %v6121_v32 = vpop.f32.mrf.mxu2 }
 0x542   : > { %6654 = vst [vmem:[#allocation132_spill] sm:$0xff] %v6121_v32 }
 0x545   : > { %3461 = vmatmul.f32.gmra.mxu3 %v2475_v16  ;;  %v6134_v16 = vld [vmem:[%s6526_s4] ss:$0 sm:$0xff] }
 0x546   : > { %3312 = vmatmul.f32.gmra.mxu2 %v2430_v44  ;;  %v6136_v44 = vpop.f32.mrf.mxu3  ;;  %v2716_v47 = vadd.f32 %v6134_v16, %v5423_v2  ;;  %v2719_v2 = vadd.f32 %v6134_v16, %v5447_v7  ;;  %v6169_v7 = vpop.f32.mrf.mxu1 }
 0x549   : > { %v6125_v15 = vpop.f32.mrf.mxu2 }
 0x54a   : > { %6655 = vst [vmem:[#allocation133_spill] sm:$0xff] %v6125_v15 }
 0x54d   : > { %3464 = vmatmul.f32.gmra.mxu3 %v2476_v57  ;;  %v2713_v57 = vadd.f32 %v6134_v16, %v5407_v17  ;;  %v2479_v17 = vld [vmem:[#allocation3 + $0x180] sm:$0xff] }
 0x54e   : > { %3315 = vmatmul.f32.gmra.mxu2 %v2431_v55  ;;  %v2478_v55 = vld [vmem:[#allocation3 + $0x170] sm:$0xff]  ;;  %v6150_v63 = vpop.f32.mrf.mxu3 }
 0x54f   : > { %v2826_v32 = vadd.f32 %v5910_v53, %v2713_v57  ;;  %v2829_v53 = vadd.f32 %v5925_v26, %v2716_v47  ;;  %v2434_v57 = vld [vmem:[#allocation3 + $0xda] sm:$0xff]  ;;  %v2832_v26 = vadd.f32 %v5941_v14, %v2719_v2 }
 0x551   : > { %v6129_v40 = vpop.f32.mrf.mxu2 }
 0x552   : > { %6656 = vst [vmem:[#allocation134_spill] sm:$0xff] %v6129_v40  ;;  %v2433_v40 = vld [vmem:[#allocation3 + $0xca] sm:$0xff] }
 0x555   : > { %3467 = vmatmul.f32.gmra.mxu3 %v2477_v8  ;;  %v2806_v8 = vadd.f32 %v6134_v16, %v5896_v59 }
 0x556   : > { %3318 = vmatmul.f32.gmra.mxu2 %v2432_v13  ;;  %v2939_v13 = vadd.f32 %v5768_v46, %v2826_v32  ;;  %v2942_v46 = vadd.f32 %v5780_v41, %v2829_v53  ;;  %v2435_v41 = vld [vmem:[#allocation3 + $0xe2] sm:$0xff] }
 0x558   : > { %v3055_v47 = vadd.f32 %v5616_v29, %v2942_v46  ;;  %v2722_v29 = vadd.f32 %v6134_v16, %v5463_v39 }
 0x559   : > { %v6138_v15 = vpop.f32.mrf.mxu2 }
 0x55a   : > { %6657 = vst [vmem:[#allocation135_spill] sm:$0xff] %v6138_v15  ;;  %v3168_v14 = vadd.f32 %v5614_v48, %v3055_v47  ;;  %v2835_v46 = vadd.f32 %v5957_v4, %v2722_v29  ;;  %v2436_v48 = vld [vmem:[#allocation3 + $0xf2] sm:$0xff]  ;;  %v2437_v47 = vld [vmem:[#allocation3 + $0xfa] sm:$0xff] }
 0x55b   : > { %v6658_v29 = vld [vmem:[#allocation50_spill] sm:$0xff] }
 0x55d   : > { %3470 = vmatmul.f32.gmra.mxu3 %v2478_v55 }
 0x55e   : > { %3321 = vmatmul.f32.gmra.mxu2 %v2433_v40  ;;  %v3052_v40 = vadd.f32 %v5607_v42, %v2939_v13  ;;  %v6164_v13 = vpop.f32.mrf.mxu3 }
 0x560   : > { %v3165_v59 = vadd.f32 %v5602_v11, %v3052_v40 }
 0x561   : > { %v2918_v51 = vpop.f32.mrf.mxu2 }
 0x562   : > { %v6148_v15 = vadd.f32 %v2918_v51, %v2806_v8  ;;  %v6158_v51 = vpop.f32.mrf.mxu0  ;;  %v2480_v8 = vld [vmem:[#allocation3 + $0x188] sm:$0xff] }
 0x565   : > { %3473 = vmatmul.f32.gmra.mxu3 %v2479_v17  ;;  %v2945_v17 = vadd.f32 %v5792_v56, %v2832_v26 }
 0x566   : > { %3324 = vmatmul.f32.gmra.mxu2 %v2434_v57  ;;  %v6185_v39 = vpop.f32.mrf.mxu3 }
 0x569   : > { %v3277_v32 = vpop.f32.mrf.mxu2 }
 0x56a   : > { %v3278_v55 = vadd.f32 %v3277_v32, %v3165_v59  ;;  %v6177_v59 = vpop.f32.mrf.mxu0  ;;  %v2948_v32 = vadd.f32 %v5802_v36, %v2835_v46  ;;  %v6659_v46 = vld [vmem:[#allocation20_spill] sm:$0xff] }
 0x56c   : > { %v3391_v42 = vadd.f32 %v6109_v49, %v3278_v55  ;;  %v6190_v55 = vpop.f32.mrf.mxu1  ;;  %v3061_v36 = vadd.f32 %v5640_v9, %v2948_v32 }
 0x56d   : > { %3476 = vmatmul.f32.gmra.mxu3 %v2480_v8 }
 0x56e   : > { %v3504_v11 = vadd.f32 %v6035_v45, %v3391_v42  ;;  %3327 = vmatmul.f32.gmra.mxu2 %v2435_v41 }
 0x570   : > { %v3617_v53 = vadd.f32 %v6028_v50, %v3504_v11  ;;  %v3058_v50 = vadd.f32 %v5621_v23, %v2945_v17  ;;  %v3174_v11 = vadd.f32 %v5634_v18, %v3061_v36  ;;  %v6204_v17 = vpop.f32.mrf.mxu3 }
 0x571   : > { %v3280_v40 = vpop.f32.mrf.mxu2 }
 0x572   : > { %v3712_v49 = vmax.f32 %v3617_v53, 0.0  ;;  %v3281_v57 = vadd.f32 %v3280_v40, %v3168_v14  ;;  %v3171_v2 = vadd.f32 %v5619_v60, %v3058_v50 }
 0x574   : > { %3744 = vst [vmem:[%s6179_s7] sm:$0xff] %v3712_v49  ;;  %v3394_v56 = vadd.f32 %v6113_v61, %v3281_v57  ;;  %v2725_v61 = vadd.f32 %v6134_v16, %v5480_v21  ;;  %v6208_v14 = vpop.f32.mrf.mxu1 }
 0x576   : > { %v3507_v45 = vadd.f32 %v6044_v34, %v3394_v56  ;;  %3330 = vmatmul.f32.gmra.mxu2 %v2436_v48  ;;  %v2838_v42 = vadd.f32 %v5969_v58, %v2725_v61 }
 0x578   : > { %v3620_v4 = vadd.f32 %v6037_v54, %v3507_v45  ;;  %v6198_v54 = vpop.f32.mrf.mxu0  ;;  %v2951_v41 = vadd.f32 %v5814_v52, %v2838_v42  ;;  %v6222_v32 = vpop.f32.mrf.mxu3 }
 0x579   : > { %v3283_v8 = vpop.f32.mrf.mxu2 }
 0x57a   : > { %v3713_v26 = vmax.f32 %v3620_v4, 0.0  ;;  %v3284_v23 = vadd.f32 %v3283_v8, %v3171_v2  ;;  %v6661_v4 = vld [vmem:[#allocation23_spill] sm:$0xff] }
 0x57c   : > { %3745 = vst [vmem:[%s6179_s7 + $0x8] sm:$0xff] %v3713_v26  ;;  %v3397_v34 = vadd.f32 %v6119_v6, %v3284_v23  ;;  %v2728_v6 = vadd.f32 %v6134_v16, %v5492_v19  ;;  %v6228_v8 = vpop.f32.mrf.mxu1  ;;  %v6662_v26 = vld [vmem:[#allocation54_spill] sm:$0xff] }
 0x57e   : > { %v3510_v60 = vadd.f32 %v6054_v25, %v3397_v34  ;;  %3333 = vmatmul.f32.gmra.mxu2 %v2437_v47  ;;  %v2841_v40 = vadd.f32 %v5978_v43, %v2728_v6  ;;  %v2438_v25 = vld [vmem:[#allocation3 + $0x10a] sm:$0xff] }
 0x57f   : > { %v6660_v43 = vld [vmem:[#allocation10_spill] sm:$0xff]  ;;  %v6663_v34 = vld [vmem:[#allocation21_spill] sm:$0xff] }
 0x580   : > { %v3623_v21 = vadd.f32 %v6047_v28, %v3510_v60  ;;  %v3064_v28 = vadd.f32 %v5653_v10, %v2951_v41  ;;  %v2954_v49 = vadd.f32 %v6658_v29, %v2841_v40  ;;  %v6216_v57 = vpop.f32.mrf.mxu0  ;;  %v2731_v48 = vadd.f32 %v6134_v16, %v6660_v43  ;;  %v6669_v43 = vld [vmem:[#allocation28_spill] sm:$0xff] }
 0x581   : > { %v3286_v58 = vpop.f32.mrf.mxu2 }
 0x582   : > { %v3714_v53 = vmax.f32 %v3623_v21, 0.0  ;;  %v3287_v9 = vadd.f32 %v3286_v58, %v3174_v11  ;;  %v3177_v56 = vadd.f32 %v6659_v46, %v3064_v28  ;;  %v2844_v10 = vadd.f32 %v5985_v1, %v2731_v48  ;;  %v6664_v1 = vld [vmem:[#allocation11_spill] sm:$0xff]  ;;  %v6665_v58 = vld [vmem:[#allocation25_spill] sm:$0xff] }
 0x583   : > { %v3067_v2 = vadd.f32 %v6661_v4, %v2954_v49  ;;  %v2734_v60 = vadd.f32 %v6134_v16, %v6664_v1  ;;  %v6668_v49 = vld [vmem:[#allocation12_spill] sm:$0xff] }
 0x584   : > { %3746 = vst [vmem:[%s6179_s7 + $0x10] sm:$0xff] %v3714_v53  ;;  %v3400_v52 = vadd.f32 %v6123_v12, %v3287_v9  ;;  %v2957_v23 = vadd.f32 %v6662_v26, %v2844_v10  ;;  %v6242_v53 = vpop.f32.mrf.mxu3  ;;  %v6245_v40 = vpop.f32.mrf.mxu1  ;;  %v6670_v10 = vld [vmem:[#allocation61_spill] sm:$0xff]  ;;  %v2442_v1 = vld [vmem:[#allocation3 + $0x13a] sm:$0xff] }
 0x585   : > { %v3180_v36 = vadd.f32 %v6663_v34, %v3067_v2  ;;  %v2847_v11 = vadd.f32 %v5994_v35, %v2734_v60  ;;  %v6671_v2 = vld [vmem:[#allocation24_spill] sm:$0xff]  ;;  %v6672_v26 = vld [vmem:[#allocation13_spill] sm:$0xff] }
 0x586   : > { %v3513_v18 = vadd.f32 %v6063_v27, %v3400_v52  ;;  %3336 = vmatmul.f32.gmra.mxu2 %v2438_v25  ;;  %v3070_v6 = vadd.f32 %v6665_v58, %v2957_v23  ;;  %v6666_v52 = vld [vmem:[#allocation58_spill] sm:$0xff] }
 0x587   : > { %v2960_v28 = vadd.f32 %v6666_v52, %v2847_v11 }
 0x588   : > { %v3626_v19 = vadd.f32 %v6056_v37, %v3513_v18  ;;  %v2439_v37 = vld [vmem:[#allocation3 + $0x112] sm:$0xff]  ;;  %v6236_v41 = vpop.f32.mrf.mxu0 }
 0x589   : > { %v3289_v50 = vpop.f32.mrf.mxu2  ;;  %v6667_v18 = vld [vmem:[#allocation22_spill] sm:$0xff]  ;;  %v3073_v48 = vadd.f32 %v6669_v43, %v2960_v28 }
 0x58a   : > { %v3715_v45 = vmax.f32 %v3626_v19, 0.0  ;;  %v3290_v12 = vadd.f32 %v3289_v50, %v3177_v56  ;;  %v3183_v35 = vadd.f32 %v6667_v18, %v3070_v6  ;;  %v6677_v18 = vld [vmem:[#allocation34_spill] sm:$0xff] }
 0x58c   : > { %3747 = vst [vmem:[%s6179_s7 + $0x18] sm:$0xff] %v3715_v45  ;;  %v3403_v27 = vadd.f32 %v6127_v3, %v3290_v12  ;;  %v2441_v45 = vld [vmem:[#allocation3 + $0x12a] sm:$0xff]  ;;  %v6259_v12 = vpop.f32.mrf.mxu3 }
 0x58e   : > { %v3516_v61 = vadd.f32 %v6076_v20, %v3403_v27  ;;  %3339 = vmatmul.f32.gmra.mxu2 %v2439_v37  ;;  %v6264_v37 = vpop.f32.mrf.mxu1 }
 0x590   : > { %v3629_v42 = vadd.f32 %v6067_v31, %v3516_v61  ;;  %v2440_v31 = vld [vmem:[#allocation3 + $0x122] sm:$0xff]  ;;  %v6253_v50 = vpop.f32.mrf.mxu0 }
 0x591   : > { %v3292_v47 = vpop.f32.mrf.mxu2 }
 0x592   : > { %v3716_v3 = vmax.f32 %v3629_v42, 0.0  ;;  %v3293_v21 = vadd.f32 %v3292_v47, %v3180_v36  ;;  %v6673_v36 = vld [vmem:[#allocation31_spill] sm:$0xff] }
 0x594   : > { %3748 = vst [vmem:[%s6179_s7 + $0x20] sm:$0xff] %v3716_v3  ;;  %v3406_v20 = vadd.f32 %v6136_v44, %v3293_v21  ;;  %v2737_v44 = vadd.f32 %v6134_v16, %v6668_v49  ;;  %v6674_v3 = vld [vmem:[#allocation65_spill] sm:$0xff]  ;;  %v6278_v6 = vpop.f32.mrf.mxu3 }
 0x595   : > { %v6678_v49 = vld [vmem:[#allocation69_spill] sm:$0xff] }
 0x596   : > { %v3519_v9 = vadd.f32 %v6088_v22, %v3406_v20  ;;  %3342 = vmatmul.f32.gmra.mxu2 %v2440_v31  ;;  %v2850_v56 = vadd.f32 %v6003_v33, %v2737_v44  ;;  %v3186_v33 = vadd.f32 %v6671_v2, %v3073_v48  ;;  %v6675_v20 = vld [vmem:[#allocation26_spill] sm:$0xff]  ;;  %v6282_v28 = vpop.f32.mrf.mxu1 }
 0x597   : > { %v6676_v31 = vld [vmem:[#allocation14_spill] sm:$0xff] }
 0x598   : > { %v3632_v25 = vadd.f32 %v6081_v62, %v3519_v9  ;;  %v2963_v27 = vadd.f32 %v6670_v10, %v2850_v56  ;;  %v6679_v56 = vld [vmem:[#allocation29_spill] sm:$0xff] }
 0x599   : > { %v3295_v29 = vpop.f32.mrf.mxu2 }
 0x59a   : > { %v3717_v19 = vmax.f32 %v3632_v25, 0.0  ;;  %v3296_v46 = vadd.f32 %v3295_v29, %v3183_v35  ;;  %v3076_v47 = vadd.f32 %v6673_v36, %v2963_v27  ;;  %v2443_v35 = vld [vmem:[#allocation3 + $0x142] sm:$0xff] }
 0x59b   : > { %v6681_v27 = vld [vmem:[#allocation37_spill] sm:$0xff] }
 0x59c   : > { %3749 = vst [vmem:[%s6179_s7 + $0x28] sm:$0xff] %v3717_v19  ;;  %v3409_v22 = vadd.f32 %v6150_v63, %v3296_v46  ;;  %v2740_v63 = vadd.f32 %v6134_v16, %v6672_v26  ;;  %v3189_v58 = vadd.f32 %v6675_v20, %v3076_v47  ;;  %v2481_v47 = vld [vmem:[#allocation3 + $0x198] sm:$0xff] }
 0x59d   : > { %3479 = vmatmul.f32.gmra.mxu3 %v2481_v47  ;;  %v6685_v20 = vld [vmem:[#allocation75_spill] sm:$0xff] }
 0x59e   : > { %v3522_v62 = vadd.f32 %v6158_v51, %v3409_v22  ;;  %3345 = vmatmul.f32.gmra.mxu2 %v2441_v45  ;;  %v2853_v34 = vadd.f32 %v6012_v30, %v2740_v63  ;;  %v6302_v2 = vpop.f32.mrf.mxu1  ;;  %v6682_v63 = vld [vmem:[#allocation32_spill] sm:$0xff] }
 0x5a0   : > { %v3635_v4 = vadd.f32 %v6169_v7, %v3522_v62  ;;  %v6272_v7 = vpop.f32.mrf.mxu0  ;;  %v2966_v21 = vadd.f32 %v6674_v3, %v2853_v34  ;;  %v6296_v62 = vpop.f32.mrf.mxu3  ;;  %v2445_v3 = vld [vmem:[#allocation3 + $0x15a] sm:$0xff] }
 0x5a1   : > { %v3298_v61 = vpop.f32.mrf.mxu2 }
 0x5a2   : > { %v3718_v23 = vmax.f32 %v3635_v4, 0.0  ;;  %v3299_v42 = vadd.f32 %v3298_v61, %v3186_v33 }
 0x5a4   : > { %3750 = vst [vmem:[%s6179_s7 + $0x30] sm:$0xff] %v3718_v23  ;;  %v3412_v51 = vadd.f32 %v6164_v13, %v3299_v42  ;;  %v2743_v13 = vadd.f32 %v6134_v16, %v6676_v31  ;;  %v6686_v31 = vld [vmem:[#allocation36_spill] sm:$0xff] }
 0x5a6   : > { %v3525_v60 = vadd.f32 %v6177_v59, %v3412_v51  ;;  %3348 = vmatmul.f32.gmra.mxu2 %v2442_v1  ;;  %v2856_v25 = vadd.f32 %v6021_v38, %v2743_v13  ;;  %v6680_v38 = vld [vmem:[#allocation15_spill] sm:$0xff] }
 0x5a7   : > { %v2746_v48 = vadd.f32 %v6134_v16, %v6680_v38 }
 0x5a8   : > { %v3638_v11 = vadd.f32 %v6190_v55, %v3525_v60  ;;  %v3079_v55 = vadd.f32 %v6677_v18, %v2966_v21  ;;  %v2969_v44 = vadd.f32 %v6678_v49, %v2856_v25  ;;  %v6290_v19 = vpop.f32.mrf.mxu0  ;;  %v6688_v18 = vld [vmem:[#allocation108_spill] sm:$0xff] }
 0x5a9   : > { %v3301_v30 = vpop.f32.mrf.mxu2  ;;  %v2859_v10 = vadd.f32 %v6026_v5, %v2746_v48  ;;  %v6683_v5 = vld [vmem:[#allocation16_spill] sm:$0xff]  ;;  %v6691_v48 = vld [vmem:[#allocation39_spill] sm:$0xff] }
 0x5aa   : > { %v3719_v9 = vmax.f32 %v3638_v11, 0.0  ;;  %v3302_v52 = vadd.f32 %v3301_v30, %v3189_v58  ;;  %v3192_v22 = vadd.f32 %v6679_v56, %v3079_v55  ;;  %v3082_v4 = vadd.f32 %v6681_v27, %v2969_v44  ;;  %v6319_v11 = vpop.f32.mrf.mxu1  ;;  %v2446_v44 = vld [vmem:[#allocation3 + $0x16a] sm:$0xff] }
 0x5ab   : > { %v2972_v61 = vadd.f32 %v5894_v24, %v2859_v10  ;;  %v2749_v34 = vadd.f32 %v6134_v16, %v6683_v5  ;;  %v6684_v24 = vld [vmem:[#allocation41_spill] sm:$0xff] }
 0x5ac   : > { %3751 = vst [vmem:[%s6179_s7 + $0x38] sm:$0xff] %v3719_v9  ;;  %v3415_v59 = vadd.f32 %v6185_v39, %v3302_v52  ;;  %v3195_v23 = vadd.f32 %v6682_v63, %v3082_v4  ;;  %v6687_v9 = vld [vmem:[#allocation17_spill] sm:$0xff] }
 0x5ad   : > { %v2862_v1 = vadd.f32 %v6033_v0, %v2749_v34  ;;  %v3085_v60 = vadd.f32 %v6684_v24, %v2972_v61 }
 0x5ae   : > { %v3528_v29 = vadd.f32 %v6198_v54, %v3415_v59  ;;  %3351 = vmatmul.f32.gmra.mxu2 %v2443_v35  ;;  %v4018_v59 = vld [vmem:[#allocation3 + $0x8] sm:$0xff] }
 0x5af   : > { %v2975_v58 = vadd.f32 %v6685_v20, %v2862_v1  ;;  %v3198_v0 = vadd.f32 %v6686_v31, %v3085_v60  ;;  %3482 = vmatmul.f32.gmra.mxu3 %v4018_v59  ;;  %v6696_v1 = vld [vmem:[#allocation42_spill] sm:$0xff] }
 0x5b0   : > { %v3641_v46 = vadd.f32 %v6208_v14, %v3528_v29  ;;  %v2444_v14 = vld [vmem:[#allocation3 + $0x152] sm:$0xff]  ;;  %v6689_v29 = vld [vmem:[#allocation44_spill] sm:$0xff] }
 0x5b1   : > { %v3304_v43 = vpop.f32.mrf.mxu2  ;;  %v3088_v49 = vadd.f32 %v6689_v29, %v2975_v58  ;;  %v6703_v29 = vld [vmem:[#allocation27_spill] sm:$0xff] }
 0x5b2   : > { %v3720_v45 = vmax.f32 %v3641_v46, 0.0  ;;  %v3305_v39 = vadd.f32 %v3304_v43, %v3192_v22  ;;  %v6690_v22 = vld [vmem:[#allocation78_spill] sm:$0xff]  ;;  %v6338_v10 = vpop.f32.mrf.mxu1 }
 0x5b4   : > { %3752 = vst [vmem:[%s6179_s7 + $0x40] sm:$0xff] %v3720_v45  ;;  %v3418_v54 = vadd.f32 %v6204_v17, %v3305_v39  ;;  %v6310_v17 = vpop.f32.mrf.mxu0  ;;  %v3201_v45 = vadd.f32 %v6691_v48, %v3088_v49  ;;  %v2545_v39 = vld [vmem:[#allocation3 + $0x19a] sm:$0xff]  ;;  %v2761_v49 = vadd.f32 %v6134_v16, %v6703_v29 }
 0x5b5   : > { %3705 = vmatmul.f32.gmra.mxu1 %v2545_v39  ;;  %v6707_v39 = vld [vmem:[#allocation87_spill] sm:$0xff] }
 0x5b6   : > { %v3531_v33 = vadd.f32 %v6216_v57, %v3418_v54  ;;  %3354 = vmatmul.f32.gmra.mxu2 %v2444_v14  ;;  %v6692_v54 = vld [vmem:[#allocation18_spill] sm:$0xff]  ;;  %v2546_v14 = vld [vmem:[#allocation3 + $0x1a2] sm:$0xff]  ;;  %v6719_v29 = vld [vmem:[#allocation35_spill] sm:$0xff] }
 0x5b7   : > { %v2755_v27 = vadd.f32 %v6134_v16, %v6692_v54  ;;  %3708 = vmatmul.f32.vlgmr.msrb.gmra.mxu3 %v2546_v14  ;;  %v6709_v14 = vld [vmem:[#allocation30_spill] sm:$0xff] }
 0x5b8   : > { %v3644_v26 = vadd.f32 %v6228_v8, %v3531_v33  ;;  %v6316_v8 = vpop.f32.mrf.mxu3  ;;  %v6693_v33 = vld [vmem:[#allocation110_spill] sm:$0xff] }
 0x5b9   : > { %v3307_v42 = vpop.f32.mrf.mxu2  ;;  %v2868_v61 = vadd.f32 %v6693_v33, %v2755_v27  ;;  %v6708_v27 = vld [vmem:[#allocation49_spill] sm:$0xff]  ;;  %v2764_v33 = vadd.f32 %v6134_v16, %v6709_v14 }
 0x5ba   : > { %v3721_v51 = vmax.f32 %v3644_v26, 0.0  ;;  %v3308_v36 = vadd.f32 %v3307_v42, %v3195_v23  ;;  %v2514_v23 = vld [vmem:[#allocation3 + $0x1a1] sm:$0xff]  ;;  %v2447_v42 = vld [vmem:[#allocation3 + $0x172] sm:$0xff]  ;;  %v3664_v58 = vpop.f32.mrf.mxu1 }
 0x5bc   : > { %3753 = vst [vmem:[%s6179_s7 + $0x48] sm:$0xff] %v3721_v51  ;;  %v3421_v57 = vadd.f32 %v6222_v32, %v3308_v36  ;;  %v2752_v32 = vadd.f32 %v6134_v16, %v6687_v9  ;;  %v6695_v51 = vld [vmem:[#allocation81_spill] sm:$0xff]  ;;  %v6700_v9 = vld [vmem:[#allocation115_spill] sm:$0xff] }
 0x5bd   : > { %v2981_v36 = vadd.f32 %v6695_v51, %v2868_v61 }
 0x5be   : > { %v3534_v21 = vadd.f32 %v6236_v41, %v3421_v57  ;;  %3357 = vmatmul.f32.gmra.mxu2 %v2445_v3  ;;  %v2865_v55 = vadd.f32 %v6688_v18, %v2752_v32  ;;  %v6327_v41 = vpop.f32.mrf.mxu0  ;;  %v6701_v32 = vld [vmem:[#allocation84_spill] sm:$0xff]  ;;  %v6702_v18 = vld [vmem:[#allocation45_spill] sm:$0xff] }
 0x5c0   : > { %v3647_v30 = vadd.f32 %v6245_v40, %v3534_v21  ;;  %v2513_v40 = vld [vmem:[#allocation3 + $0x199] sm:$0xff]  ;;  %v6333_v56 = vpop.f32.mrf.mxu3  ;;  %v2978_v43 = vadd.f32 %v6690_v22, %v2865_v55 }
 0x5c1   : > { %v3310_v13 = vpop.f32.mrf.mxu2  ;;  %3592 = vmatmul.f32.gmra.mxu0 %v2513_v40 }
 0x5c2   : > { %v3722_v52 = vmax.f32 %v3647_v30, 0.0  ;;  %v3311_v25 = vadd.f32 %v3310_v13, %v3198_v0  ;;  %v6698_v30 = vld [vmem:[#allocation112_spill] sm:$0xff]  ;;  %v6699_v0 = vld [vmem:[#allocation51_spill] sm:$0xff]  ;;  %v3667_v48 = vpop.f32.mrf.mxu1 }
 0x5c3   : > { %v3094_v13 = vadd.f32 %v6699_v0, %v2981_v36  ;;  %v6712_v36 = vld [vmem:[#allocation90_spill] sm:$0xff]  ;;  %v6716_v0 = vld [vmem:[#allocation64_spill] sm:$0xff] }
 0x5c4   : > { %3754 = vst [vmem:[%s6179_s7 + $0x50] sm:$0xff] %v3722_v52  ;;  %v3424_v35 = vadd.f32 %v6242_v53, %v3311_v25 }
 0x5c5   : > { %v3207_v55 = vadd.f32 %v6702_v18, %v3094_v13 }
 0x5c6   : > { %v3537_v46 = vadd.f32 %v6253_v50, %v3424_v35  ;;  %3360 = vmatmul.f32.gmra.mxu2 %v2446_v44  ;;  %v3551_v5 = vpop.f32.mrf.mxu0 }
 0x5c8   : > { %v3650_v38 = vadd.f32 %v6264_v37, %v3537_v46  ;;  %v6694_v37 = vld [vmem:[#allocation47_spill] sm:$0xff]  ;;  %v6350_v24 = vpop.f32.mrf.mxu3  ;;  %v6704_v46 = vld [vmem:[#allocation113_spill] sm:$0xff] }
 0x5c9   : > { %v3313_v53 = vpop.f32.mrf.mxu2  ;;  %v3091_v63 = vadd.f32 %v6694_v37, %v2978_v43  ;;  %3595 = vmatmul.f32.gmra.mxu0 %v2514_v23  ;;  %v2874_v22 = vadd.f32 %v6704_v46, %v2761_v49  ;;  %v6705_v43 = vld [vmem:[#allocation56_spill] sm:$0xff]  ;;  %v2770_v49 = vadd.f32 %v6134_v16, %v6719_v29  ;;  %v6720_v46 = vld [vmem:[#allocation121_spill] sm:$0xff] }
 0x5ca   : > { %v3723_v4 = vmax.f32 %v3650_v38, 0.0  ;;  %v3314_v50 = vadd.f32 %v3313_v53, %v3201_v45  ;;  %v6706_v45 = vld [vmem:[#allocation117_spill] sm:$0xff]  ;;  %v6710_v37 = vld [vmem:[#allocation116_spill] sm:$0xff]  ;;  %v3670_v51 = vpop.f32.mrf.mxu1 }
 0x5cb   : > { %v3204_v57 = vadd.f32 %v6696_v1, %v3091_v63  ;;  %v2987_v53 = vadd.f32 %v6707_v39, %v2874_v22  ;;  %v2877_v63 = vadd.f32 %v6710_v37, %v2764_v33  ;;  %v6711_v23 = vld [vmem:[#allocation60_spill] sm:$0xff]  ;;  %v2883_v22 = vadd.f32 %v6720_v46, %v2770_v49  ;;  %v6723_v39 = vld [vmem:[#allocation62_spill] sm:$0xff] }
 0x5cc   : > { %3755 = vst [vmem:[%s6179_s7 + $0x58] sm:$0xff] %v3723_v4  ;;  %v3427_v26 = vadd.f32 %v6259_v12, %v3314_v50  ;;  %v6697_v12 = vld [vmem:[#allocation19_spill] sm:$0xff]  ;;  %v6735_v49 = vld [vmem:[#allocation126_spill] sm:$0xff] }
 0x5cd   : > { %v2758_v3 = vadd.f32 %v6134_v16, %v6697_v12 }
 0x5ce   : > { %v3540_v34 = vadd.f32 %v6272_v7, %v3427_v26  ;;  %3363 = vmatmul.f32.gmra.mxu2 %v2447_v42  ;;  %v3554_v25 = vpop.f32.mrf.mxu0  ;;  %v3100_v42 = vadd.f32 %v6711_v23, %v2987_v53  ;;  %v6727_v23 = vld [vmem:[#allocation101_spill] sm:$0xff] }
 0x5cf   : > { %v2871_v31 = vadd.f32 %v6698_v30, %v2758_v3  ;;  %v6714_v3 = vld [vmem:[#allocation33_spill] sm:$0xff] }
 0x5d0   : > { %v3653_v47 = vadd.f32 %v6282_v28, %v3540_v34 }
 0x5d1   : > { %v3316_v60 = vpop.f32.mrf.mxu2  ;;  %v2984_v52 = vadd.f32 %v6701_v32, %v2871_v31  ;;  %v6715_v31 = vld [vmem:[#allocation119_spill] sm:$0xff] }
 0x5d2   : > { %v3724_v21 = vmax.f32 %v3653_v47, 0.0  ;;  %v3317_v20 = vadd.f32 %v3316_v60, %v3204_v57  ;;  %v2990_v47 = vadd.f32 %v6712_v36, %v2877_v63  ;;  %v6713_v57 = vld [vmem:[#allocation53_spill] sm:$0xff]  ;;  %v6726_v63 = vld [vmem:[#allocation72_spill] sm:$0xff]  ;;  %v6728_v36 = vld [vmem:[#allocation67_spill] sm:$0xff] }
 0x5d3   : > { %v3097_v38 = vadd.f32 %v6705_v43, %v2984_v52  ;;  %v3213_v60 = vadd.f32 %v6713_v57, %v3100_v42  ;;  %v6729_v57 = vld [vmem:[#allocation40_spill] sm:$0xff] }
 0x5d4   : > { %3756 = vst [vmem:[%s6179_s7 + $0x60] sm:$0xff] %v3724_v21  ;;  %v3430_v7 = vadd.f32 %v6278_v6, %v3317_v20  ;;  %v3444_v6 = vpop.f32.mrf.mxu3  ;;  %v2767_v21 = vadd.f32 %v6134_v16, %v6714_v3  ;;  %v3103_v13 = vadd.f32 %v6716_v0, %v2990_v47  ;;  %v6732_v0 = vld [vmem:[#allocation104_spill] sm:$0xff] }
 0x5d5   : > { %v3210_v4 = vadd.f32 %v6708_v27, %v3097_v38 }
 0x5d6   : > { %v3543_v28 = vadd.f32 %v6290_v19, %v3430_v7  ;;  %3366 = vmatmul.f32.gmra.mxu2 %v6700_v9  ;;  %v3557_v61 = vpop.f32.mrf.mxu0 }
 0x5d8   : > { %v3656_v59 = vadd.f32 %v6302_v2, %v3543_v28 }
 0x5d9   : > { %v3319_v35 = vpop.f32.mrf.mxu2 }
 0x5da   : > { %v3725_v40 = vmax.f32 %v3656_v59, 0.0  ;;  %v3320_v44 = vadd.f32 %v3319_v35, %v3207_v55  ;;  %v6718_v59 = vld [vmem:[#allocation57_spill] sm:$0xff]  ;;  %v3673_v55 = vpop.f32.mrf.mxu1 }
 0x5db   : > { %v3216_v18 = vadd.f32 %v6718_v59, %v3103_v13 }
 0x5dc   : > { %3757 = vst [vmem:[%s6179_s7 + $0x68] sm:$0xff] %v3725_v40  ;;  %v3433_v19 = vadd.f32 %v6296_v62, %v3320_v44  ;;  %v3447_v34 = vpop.f32.mrf.mxu3 }
 0x5de   : > { %v3546_v2 = vadd.f32 %v6310_v17, %v3433_v19  ;;  %3369 = vmatmul.f32.gmra.mxu2 %v6706_v45  ;;  %v3560_v7 = vpop.f32.mrf.mxu0 }
 0x5e0   : > { %v3659_v54 = vadd.f32 %v6319_v11, %v3546_v2 }
 0x5e1   : > { %v3322_v50 = vpop.f32.mrf.mxu2 }
 0x5e2   : > { %v3726_v26 = vmax.f32 %v3659_v54, 0.0  ;;  %v3323_v62 = vadd.f32 %v3322_v50, %v3210_v4  ;;  %v6724_v4 = vld [vmem:[#allocation38_spill] sm:$0xff] }
 0x5e3   : > { %v2773_v50 = vadd.f32 %v6134_v16, %v6724_v4  ;;  %v6740_v4 = vld [vmem:[#allocation128_spill] sm:$0xff] }
 0x5e4   : > { %3758 = vst [vmem:[%s6179_s7 + $0x70] sm:$0xff] %v3726_v26  ;;  %v3436_v17 = vadd.f32 %v6316_v8, %v3323_v62  ;;  %v2880_v8 = vadd.f32 %v6715_v31, %v2767_v21  ;;  %v3450_v9 = vpop.f32.mrf.mxu3  ;;  %v3676_v26 = vpop.f32.mrf.mxu1  ;;  %v6725_v62 = vld [vmem:[#allocation123_spill] sm:$0xff]  ;;  %v6731_v31 = vld [vmem:[#allocation73_spill] sm:$0xff] }
 0x5e6   : > { %v3549_v11 = vadd.f32 %v6327_v41, %v3436_v17  ;;  %v3563_v43 = vpop.f32.mrf.mxu0 }
 0x5e8   : > { %v3662_v1 = vadd.f32 %v6338_v10, %v3549_v11  ;;  %v6717_v10 = vld [vmem:[#allocation93_spill] sm:$0xff] }
 0x5e9   : > { %v3325_v12 = vpop.f32.mrf.mxu2  ;;  %v2993_v32 = vadd.f32 %v6717_v10, %v2880_v8 }
 0x5ea   : > { %v3727_v20 = vmax.f32 %v3662_v1, 0.0  ;;  %v3326_v30 = vadd.f32 %v3325_v12, %v3213_v60  ;;  %v2776_v60 = vadd.f32 %v6134_v16, %v6729_v57  ;;  %v6745_v57 = vld [vmem:[#allocation129_spill] sm:$0xff] }
 0x5ec   : > { %3759 = vst [vmem:[%s6179_s7 + $0x78] sm:$0xff] %v3727_v20  ;;  %v3439_v41 = vadd.f32 %v6333_v56, %v3326_v30  ;;  %v3453_v54 = vpop.f32.mrf.mxu3  ;;  %v6730_v20 = vld [vmem:[#allocation124_spill] sm:$0xff]  ;;  %v3679_v8 = vpop.f32.mrf.mxu1 }
 0x5ed   : > { %v2889_v30 = vadd.f32 %v6730_v20, %v2776_v60 }
 0x5ee   : > { %v3552_v28 = vadd.f32 %v3551_v5, %v3439_v41  ;;  %v6721_v5 = vld [vmem:[#allocation68_spill] sm:$0xff]  ;;  %v3566_v42 = vpop.f32.mrf.mxu0 }
 0x5ef   : > { %v3106_v19 = vadd.f32 %v6721_v5, %v2993_v32 }
 0x5f0   : > { %v3665_v52 = vadd.f32 %v3664_v58, %v3552_v28  ;;  %v6722_v58 = vld [vmem:[#allocation96_spill] sm:$0xff]  ;;  %v6733_v28 = vld [vmem:[#allocation71_spill] sm:$0xff] }
 0x5f1   : > { %v3328_v35 = vpop.f32.mrf.mxu2  ;;  %v2996_v2 = vadd.f32 %v6722_v58, %v2883_v22  ;;  %v3219_v53 = vadd.f32 %v6723_v39, %v3106_v19 }
 0x5f2   : > { %v3728_v40 = vmax.f32 %v3665_v52, 0.0  ;;  %v3329_v44 = vadd.f32 %v3328_v35, %v3216_v18  ;;  %v6734_v52 = vld [vmem:[#allocation43_spill] sm:$0xff] }
 0x5f3   : > { %v2779_v59 = vadd.f32 %v6134_v16, %v6734_v52  ;;  %v6750_v52 = vld [vmem:[#allocation130_spill] sm:$0xff] }
 0x5f4   : > { %3760 = vst [vmem:[%s6179_s7 + $0x80] sm:$0xff] %v3728_v40  ;;  %v3442_v56 = vadd.f32 %v6350_v24, %v3329_v44  ;;  %v2886_v24 = vadd.f32 %v6725_v62, %v2773_v50  ;;  %v3456_v21 = vpop.f32.mrf.mxu3  ;;  %v6736_v44 = vld [vmem:[#allocation76_spill] sm:$0xff] }
 0x5f5   : > { %v2892_v40 = vadd.f32 %v6735_v49, %v2779_v59  ;;  %v6752_v49 = vld [vmem:[#allocation111_spill] sm:$0xff] }
 0x5f6   : > { %v3555_v38 = vadd.f32 %v3554_v25, %v3442_v56  ;;  %v3109_v25 = vadd.f32 %v6726_v63, %v2996_v2  ;;  %v3569_v18 = vpop.f32.mrf.mxu0  ;;  %v3682_v56 = vpop.f32.mrf.mxu1 }
 0x5f8   : > { %v3668_v45 = vadd.f32 %v3667_v48, %v3555_v38  ;;  %v2999_v48 = vadd.f32 %v6727_v23, %v2886_v24  ;;  %v3222_v47 = vadd.f32 %v6728_v36, %v3109_v25  ;;  %v6738_v38 = vld [vmem:[#allocation74_spill] sm:$0xff]  ;;  %v6743_v25 = vld [vmem:[#allocation77_spill] sm:$0xff] }
 0x5f9   : > { %v3331_v27 = vpop.f32.mrf.mxu2 }
 0x5fa   : > { %v3729_v14 = vmax.f32 %v3668_v45, 0.0  ;;  %v3332_v33 = vadd.f32 %v3331_v27, %v3219_v53  ;;  %v6739_v45 = vld [vmem:[#allocation46_spill] sm:$0xff] }
 0x5fb   : > { %v2782_v39 = vadd.f32 %v6134_v16, %v6739_v45 }
 0x5fc   : > { %3761 = vst [vmem:[%s6179_s7 + $0x88] sm:$0xff] %v3729_v14  ;;  %v3445_v37 = vadd.f32 %v3444_v6, %v3332_v33  ;;  %v6741_v33 = vld [vmem:[#allocation79_spill] sm:$0xff] }
 0x5fd   : > { %v2895_v50 = vadd.f32 %v6740_v4, %v2782_v39  ;;  %v6756_v39 = vld [vmem:[#allocation88_spill] sm:$0xff] }
 0x5fe   : > { %v3558_v17 = vadd.f32 %v3557_v61, %v3445_v37  ;;  %v3112_v61 = vadd.f32 %v6731_v31, %v2999_v48  ;;  %v6742_v37 = vld [vmem:[#allocation107_spill] sm:$0xff]  ;;  %v3685_v23 = vpop.f32.mrf.mxu1 }
 0x600   : > { %v3671_v11 = vadd.f32 %v3670_v51, %v3558_v17  ;;  %v3002_v51 = vadd.f32 %v6732_v0, %v2889_v30  ;;  %v3225_v10 = vadd.f32 %v6733_v28, %v3112_v61  ;;  %v6747_v30 = vld [vmem:[#allocation109_spill] sm:$0xff]  ;;  %v6748_v61 = vld [vmem:[#allocation80_spill] sm:$0xff] }
 0x601   : > { %v3334_v1 = vpop.f32.mrf.mxu2 }
 0x602   : > { %v3730_v12 = vmax.f32 %v3671_v11, 0.0  ;;  %v3335_v3 = vadd.f32 %v3334_v1, %v3222_v47  ;;  %v3115_v46 = vadd.f32 %v6736_v44, %v3002_v51  ;;  %v6744_v11 = vld [vmem:[#allocation48_spill] sm:$0xff] }
 0x603   : > { %v2785_v36 = vadd.f32 %v6134_v16, %v6744_v11  ;;  %v6749_v51 = vld [vmem:[#allocation52_spill] sm:$0xff]  ;;  %v6761_v11 = vld [vmem:[#allocation91_spill] sm:$0xff] }
 0x604   : > { %3762 = vst [vmem:[%s6179_s7 + $0x90] sm:$0xff] %v3730_v12  ;;  %v3448_v6 = vadd.f32 %v3447_v34, %v3335_v3  ;;  %v3228_v58 = vadd.f32 %v6738_v38, %v3115_v46  ;;  %v6746_v12 = vld [vmem:[#allocation82_spill] sm:$0xff]  ;;  %v6753_v46 = vld [vmem:[#allocation83_spill] sm:$0xff] }
 0x605   : > { %v2898_v60 = vadd.f32 %v6745_v57, %v2785_v36 }
 0x606   : > { %v3561_v41 = vadd.f32 %v3560_v7, %v3448_v6  ;;  %v3459_v7 = vpop.f32.mrf.mxu3 }
 0x607   : > { %v3011_v6 = vadd.f32 %v6747_v30, %v2898_v60  ;;  %v6762_v60 = vld [vmem:[#allocation118_spill] sm:$0xff]  ;;  %v6764_v30 = vld [vmem:[#allocation63_spill] sm:$0xff] }
 0x608   : > { %v3674_v13 = vadd.f32 %v3673_v55, %v3561_v41  ;;  %v6737_v55 = vld [vmem:[#allocation106_spill] sm:$0xff] }
 0x609   : > { %v3337_v32 = vpop.f32.mrf.mxu2  ;;  %v3005_v5 = vadd.f32 %v6737_v55, %v2892_v40  ;;  %v6754_v55 = vld [vmem:[#allocation55_spill] sm:$0xff] }
 0x60a   : > { %v3731_v35 = vmax.f32 %v3674_v13, 0.0  ;;  %v3338_v29 = vadd.f32 %v3337_v32, %v3225_v10  ;;  %v2788_v13 = vadd.f32 %v6134_v16, %v6749_v51  ;;  %v3688_v32 = vpop.f32.mrf.mxu1 }
 0x60c   : > { %3763 = vst [vmem:[%s6179_s7 + $0x98] sm:$0xff] %v3731_v35  ;;  %v3451_v34 = vadd.f32 %v3450_v9, %v3338_v29  ;;  %v3572_v9 = vpop.f32.mrf.mxu0  ;;  %v6751_v35 = vld [vmem:[#allocation85_spill] sm:$0xff] }
 0x60e   : > { %v3564_v22 = vadd.f32 %v3563_v43, %v3451_v34  ;;  %v3118_v43 = vadd.f32 %v6741_v33, %v3005_v5  ;;  %v3462_v24 = vpop.f32.mrf.mxu3  ;;  %v2791_v5 = vadd.f32 %v6134_v16, %v6754_v55  ;;  %v6758_v33 = vld [vmem:[#allocation86_spill] sm:$0xff] }
 0x610   : > { %v3677_v19 = vadd.f32 %v3676_v26, %v3564_v22  ;;  %v3008_v26 = vadd.f32 %v6742_v37, %v2895_v50  ;;  %v3231_v17 = vadd.f32 %v6743_v25, %v3118_v43  ;;  %v6757_v50 = vld [vmem:[#allocation114_spill] sm:$0xff]  ;;  %v6759_v37 = vld [vmem:[#allocation59_spill] sm:$0xff] }
 0x611   : > { %v3340_v2 = vpop.f32.mrf.mxu2 }
 0x612   : > { %v3732_v53 = vmax.f32 %v3677_v19, 0.0  ;;  %v3341_v27 = vadd.f32 %v3340_v2, %v3228_v58  ;;  %v6755_v2 = vld [vmem:[#allocation131_spill] sm:$0xff] }
 0x613   : > { %v2904_v45 = vadd.f32 %v6755_v2, %v2791_v5  ;;  %v6771_v5 = vld [vmem:[#allocation97_spill] sm:$0xff]  ;;  %v6772_v2 = vld [vmem:[#allocation122_spill] sm:$0xff] }
 0x614   : > { %3764 = vst [vmem:[%s6179_s7 + $0xa0] sm:$0xff] %v3732_v53  ;;  %v3454_v14 = vadd.f32 %v3453_v54, %v3341_v27  ;;  %v3575_v3 = vpop.f32.mrf.mxu0  ;;  %v3691_v27 = vpop.f32.mrf.mxu1 }
 0x616   : > { %v3567_v62 = vadd.f32 %v3566_v42, %v3454_v14  ;;  %v3121_v42 = vadd.f32 %v6746_v12, %v3008_v26  ;;  %v3465_v41 = vpop.f32.mrf.mxu3  ;;  %v2794_v26 = vadd.f32 %v6134_v16, %v6759_v37 }
 0x618   : > { %v3680_v63 = vadd.f32 %v3679_v8, %v3567_v62  ;;  %v3234_v8 = vadd.f32 %v6748_v61, %v3121_v42  ;;  %v6763_v42 = vld [vmem:[#allocation89_spill] sm:$0xff] }
 0x619   : > { %v3343_v48 = vpop.f32.mrf.mxu2 }
 0x61a   : > { %v3733_v47 = vmax.f32 %v3680_v63, 0.0  ;;  %v3344_v1 = vadd.f32 %v3343_v48, %v3231_v17 }
 0x61c   : > { %3765 = vst [vmem:[%s6179_s7 + $0xa8] sm:$0xff] %v3733_v47  ;;  %v3457_v54 = vadd.f32 %v3456_v21, %v3344_v1  ;;  %v2901_v21 = vadd.f32 %v6750_v52, %v2788_v13  ;;  %v3578_v34 = vpop.f32.mrf.mxu0  ;;  %v3694_v57 = vpop.f32.mrf.mxu1  ;;  %v6766_v13 = vld [vmem:[#allocation94_spill] sm:$0xff]  ;;  %v6767_v52 = vld [vmem:[#allocation120_spill] sm:$0xff] }
 0x61e   : > { %v3570_v20 = vadd.f32 %v3569_v18, %v3457_v54  ;;  %v3124_v18 = vadd.f32 %v6751_v35, %v3011_v6  ;;  %v3014_v40 = vadd.f32 %v6752_v49, %v2901_v21  ;;  %v3468_v58 = vpop.f32.mrf.mxu3  ;;  %v2797_v6 = vadd.f32 %v6134_v16, %v6764_v30  ;;  %v6768_v35 = vld [vmem:[#allocation92_spill] sm:$0xff]  ;;  %v6780_v30 = vld [vmem:[#allocation127_spill] sm:$0xff] }
 0x620   : > { %v3683_v31 = vadd.f32 %v3682_v56, %v3570_v20  ;;  %v3237_v22 = vadd.f32 %v6753_v46, %v3124_v18  ;;  %v3127_v53 = vadd.f32 %v6756_v39, %v3014_v40  ;;  %v6769_v40 = vld [vmem:[#allocation66_spill] sm:$0xff]  ;;  %v6773_v39 = vld [vmem:[#allocation95_spill] sm:$0xff] }
 0x621   : > { %v3346_v0 = vpop.f32.mrf.mxu2 }
 0x622   : > { %v3734_v28 = vmax.f32 %v3683_v31, 0.0  ;;  %v3347_v10 = vadd.f32 %v3346_v0, %v3234_v8  ;;  %v3240_v43 = vadd.f32 %v6758_v33, %v3127_v53  ;;  %v6765_v8 = vld [vmem:[#allocation133_spill] sm:$0xff] }
 0x623   : > { %v2910_v0 = vadd.f32 %v6765_v8, %v2797_v6  ;;  %v3032_v6 = vadd.f32 %v6780_v30, %v6148_v15 }
 0x624   : > { %3766 = vst [vmem:[%s6179_s7 + $0xb0] sm:$0xff] %v3734_v28  ;;  %v3460_v59 = vadd.f32 %v3459_v7, %v3347_v10  ;;  %v3581_v63 = vpop.f32.mrf.mxu0 }
 0x625   : > { %v3023_v21 = vadd.f32 %v6767_v52, %v2910_v0 }
 0x626   : > { %v3573_v29 = vadd.f32 %v3572_v9, %v3460_v59  ;;  %v3017_v9 = vadd.f32 %v6757_v50, %v2904_v45  ;;  %v3471_v47 = vpop.f32.mrf.mxu3  ;;  %v6774_v50 = vld [vmem:[#allocation70_spill] sm:$0xff] }
 0x628   : > { %v3686_v44 = vadd.f32 %v3685_v23, %v3573_v29  ;;  %v6760_v23 = vld [vmem:[#allocation132_spill] sm:$0xff]  ;;  %v3130_v36 = vadd.f32 %v6761_v11, %v3017_v9  ;;  %v3697_v29 = vpop.f32.mrf.mxu1  ;;  %v2803_v9 = vadd.f32 %v6134_v16, %v6774_v50 }
 0x629   : > { %v3349_v56 = vpop.f32.mrf.mxu2  ;;  %v2907_v48 = vadd.f32 %v6760_v23, %v2794_v26  ;;  %v6777_v23 = vld [vmem:[#allocation125_spill] sm:$0xff] }
 0x62a   : > { %v3735_v19 = vmax.f32 %v3686_v44, 0.0  ;;  %v3350_v38 = vadd.f32 %v3349_v56, %v3237_v22  ;;  %v6770_v22 = vld [vmem:[#allocation134_spill] sm:$0xff] }
 0x62b   : > { %v3020_v54 = vadd.f32 %v6762_v60, %v2907_v48 }
 0x62c   : > { %3767 = vst [vmem:[%s6179_s7 + $0xb8] sm:$0xff] %v3735_v19  ;;  %v3463_v7 = vadd.f32 %v3462_v24, %v3350_v38  ;;  %v3136_v19 = vadd.f32 %v6771_v5, %v3023_v21 }
 0x62d   : > { %v3133_v28 = vadd.f32 %v6766_v13, %v3020_v54 }
 0x62e   : > { %v3576_v4 = vadd.f32 %v3575_v3, %v3463_v7  ;;  %v3243_v3 = vadd.f32 %v6763_v42, %v3130_v36  ;;  %v3249_v53 = vadd.f32 %v6773_v39, %v3136_v19  ;;  %v6778_v36 = vld [vmem:[#allocation98_spill] sm:$0xff] }
 0x62f   : > { %v3246_v18 = vadd.f32 %v6768_v35, %v3133_v28 }
 0x630   : > { %v3689_v14 = vadd.f32 %v3688_v32, %v3576_v4  ;;  %v3474_v32 = vpop.f32.mrf.mxu3 }
 0x631   : > { %v3352_v62 = vpop.f32.mrf.mxu2 }
 0x632   : > { %v3736_v25 = vmax.f32 %v3689_v14, 0.0  ;;  %v3353_v17 = vadd.f32 %v3352_v62, %v3240_v43  ;;  %v3700_v43 = vpop.f32.mrf.mxu1  ;;  %v6775_v62 = vld [vmem:[#allocation135_spill] sm:$0xff] }
 0x633   : > { %v2916_v37 = vadd.f32 %v6775_v62, %v2803_v9 }
 0x634   : > { %3768 = vst [vmem:[%s6179_s7 + $0xc0] sm:$0xff] %v3736_v25  ;;  %v3466_v24 = vadd.f32 %v3465_v41, %v3353_v17  ;;  %v3584_v41 = vpop.f32.mrf.mxu0 }
 0x635   : > { %v3029_v48 = vadd.f32 %v6777_v23, %v2916_v37 }
 0x636   : > { %v3579_v1 = vadd.f32 %v3578_v34, %v3466_v24  ;;  %v2800_v34 = vadd.f32 %v6134_v16, %v6769_v40 }
 0x638   : > { %v3692_v12 = vadd.f32 %v3691_v27, %v3579_v1  ;;  %v2913_v56 = vadd.f32 %v6770_v22, %v2800_v34  ;;  %v3477_v27 = vpop.f32.mrf.mxu3 }
 0x639   : > { %v3355_v20 = vpop.f32.mrf.mxu2 }
 0x63a   : > { %v3737_v31 = vmax.f32 %v3692_v12, 0.0  ;;  %v3356_v61 = vadd.f32 %v3355_v20, %v3243_v3  ;;  %v3026_v45 = vadd.f32 %v6772_v2, %v2913_v56  ;;  %v6779_v12 = vld [vmem:[#allocation102_spill] sm:$0xff]  ;;  %v3703_v3 = vpop.f32.mrf.mxu1 }
 0x63b   : > { %v3142_v42 = vadd.f32 %v6779_v12, %v3029_v48 }
 0x63c   : > { %3769 = vst [vmem:[%s6179_s7 + $0xc8] sm:$0xff] %v3737_v31  ;;  %v3469_v51 = vadd.f32 %v3468_v58, %v3356_v61  ;;  %v3587_v38 = vpop.f32.mrf.mxu0  ;;  %v6781_v61 = vld [vmem:[#allocation100_spill] sm:$0xff] }
 0x63d   : > { %v3255_v8 = vadd.f32 %v6781_v61, %v3142_v42 }
 0x63e   : > { %v3582_v10 = vadd.f32 %v3581_v63, %v3469_v51  ;;  %v6776_v63 = vld [vmem:[#allocation99_spill] sm:$0xff] }
 0x63f   : > { %v3139_v25 = vadd.f32 %v6776_v63, %v3026_v45 }
 0x640   : > { %v3695_v59 = vadd.f32 %v3694_v57, %v3582_v10  ;;  %v3480_v57 = vpop.f32.mrf.mxu3 }
 0x641   : > { %v3358_v49 = vpop.f32.mrf.mxu2 }
 0x642   : > { %v3738_v44 = vmax.f32 %v3695_v59, 0.0  ;;  %v3359_v46 = vadd.f32 %v3358_v49, %v3246_v18  ;;  %v3706_v21 = vpop.f32.mrf.mxu1  ;;  %v6783_v18 = vld [vmem:[#allocation103_spill] sm:$0xff] }
 0x644   : > { %3770 = vst [vmem:[%s6179_s7 + $0xd0] sm:$0xff] %v3738_v44  ;;  %v3472_v55 = vadd.f32 %v3471_v47, %v3359_v46  ;;  %v3590_v24 = vpop.f32.mrf.mxu0  ;;  %v3252_v47 = vadd.f32 %v6778_v36, %v3139_v25 }
 0x646   : > { %v3585_v58 = vadd.f32 %v3584_v41, %v3472_v55 }
 0x648   : > { %v3698_v7 = vadd.f32 %v3697_v29, %v3585_v58  ;;  %v3483_v28 = vpop.f32.mrf.mxu3 }
 0x649   : > { %v3361_v4 = vpop.f32.mrf.mxu2 }
 0x64a   : > { %v3739_v14 = vmax.f32 %v3698_v7, 0.0  ;;  %v3362_v33 = vadd.f32 %v3361_v4, %v3249_v53 }
 0x64c   : > { %3771 = vst [vmem:[%s6179_s7 + $0xd8] sm:$0xff] %v3739_v14  ;;  %v3475_v26 = vadd.f32 %v3474_v32, %v3362_v33  ;;  %v3593_v41 = vpop.f32.mrf.mxu0  ;;  %v6782_v32 = vld [vmem:[#allocation105_spill] sm:$0xff] }
 0x64d   : > { %v3145_v52 = vadd.f32 %v6782_v32, %v3032_v6 }
 0x64e   : > { %v3588_v17 = vadd.f32 %v3587_v38, %v3475_v26 }
 0x64f   : > { %v3258_v15 = vadd.f32 %v6783_v18, %v3145_v52 }
 0x650   : > { %v3701_v11 = vadd.f32 %v3700_v43, %v3588_v17  ;;  %v3709_v46 = vpop.f32.mrf.mxu3 }
 0x651   : > { %v3364_v1 = vpop.f32.mrf.mxu2 }
 0x652   : > { %v3740_v16 = vmax.f32 %v3701_v11, 0.0  ;;  %v3365_v60 = vadd.f32 %v3364_v1, %v3252_v47 }
 0x654   : > { %3772 = vst [vmem:[%s6179_s7 + $0xe0] sm:$0xff] %v3740_v16  ;;  %v3478_v54 = vadd.f32 %v3477_v27, %v3365_v60  ;;  %v3596_v34 = vpop.f32.mrf.mxu0 }
 0x656   : > { %v3591_v20 = vadd.f32 %v3590_v24, %v3478_v54 }
 0x658   : > { %v3704_v31 = vadd.f32 %v3703_v3, %v3591_v20 }
 0x659   : > { %v3367_v0 = vpop.f32.mrf.mxu2 }
 0x65a   : > { %v3741_v51 = vmax.f32 %v3704_v31, 0.0  ;;  %v3368_v13 = vadd.f32 %v3367_v0, %v3255_v8 }
 0x65c   : > { %3773 = vst [vmem:[%s6179_s7 + $0xe8] sm:$0xff] %v3741_v51  ;;  %v3481_v10 = vadd.f32 %v3480_v57, %v3368_v13 }
 0x65e   : > { %v3594_v59 = vadd.f32 %v3593_v41, %v3481_v10 }
 0x660   : > { %v3707_v35 = vadd.f32 %v3706_v21, %v3594_v59 }
 0x661   : > { %v3370_v29 = vpop.f32.mrf.mxu2 }
 0x662   : > { %v3742_v49 = vmax.f32 %v3707_v35, 0.0  ;;  %v3371_v40 = vadd.f32 %v3370_v29, %v3258_v15 }
 0x664   : > { %3774 = vst [vmem:[%s6179_s7 + $0xf0] sm:$0xff] %v3742_v49  ;;  %v3484_v44 = vadd.f32 %v3483_v28, %v3371_v40 }
 0x666   : > { %v3597_v22 = vadd.f32 %v3596_v34, %v3484_v44 }
 0x668   : > { %v3710_v56 = vadd.f32 %v3709_v46, %v3597_v22 }
 0x66a   : > { %v3743_v55 = vmax.f32 %v3710_v56, 0.0 }
 0x66c   : > { %3775 = vst [vmem:[%s6179_s7 + $0xf8] sm:$0xff] %v3743_v55 }
 0x66d   : > { %4076 = shalt.err (!%p4073_p8)
}
 0x66e   : > { %s4129_s30 = smov 128  }
 0x66f   : > { %3956 = dma.vmem_to_hbm [thread:$0]  (%p4198_p5), %s3790_s14, 4096, %s3792_s15, %s3777_s22, %s4129_s30, %s4129_s30, %s4122_s13  }
 0x670 PF: > { %p3968_p9 = scmp.ge.s32.totalorder %s4115_s21, 2  ;;  %s3806_s7 = sand.u32 1, %s4103_s18  }
 0x671   : > { %s3807_s8 = scalar_lea.sflag [#allocation6], %s3806_s7 }
 0x672   : > { %p3963_p10 = pnand %p3968_p9, %p4202_p6 }
 0x674   : > { %p3964_p11 = pneg %p3963_p10 }
 0x676   : > { %4098 = dma.done.wait (%p3964_p11), %s3807_s8, 4096  }
 0x677   : > { %4100 = vsyncadd (%p3964_p11), %s3807_s8, 4294963200  ;;  %p16_p12 = scmp.ge.s32.totalorder %s4185_s24, 4   ;;  %s6784_s18 = smov %s4107_s19 }
 0x678   : > { %s6785_s19 = smov %s4111_s20  ;;  %s6786_s20 = smov %s4196_s27 }
 0x679   : > { %s6787_s21 = smov %s4185_s24  ;;  %18 = sbr.rel (!%p16_p12) target bundleno = 4 (0x4), region = 86 }
 0x67e   :  { %3813 = vsyncpa [#allocation5], 1 }
 0x67f   :  { %3815 = vsyncpa [#allocation5 + $0x1], 1 }
 0x680   :  { %3816 = vsyncpa [#allocation6], 1 }
 0x681   :  { %3818 = vsyncpa [#allocation6 + $0x1], 1 }

</bundles_post_ra>
